<compile_context>
chip_gen: v6e
topology: v6e:2x2x1
jax: 0.10.0
libtpu: 0.0.40
codegen_flags: <defaults>
</compile_context>

<pallas_src>
import functools

import jax
import jax.numpy as jnp
from jax.experimental import pallas as pl
from jax.experimental.pallas import tpu as pltpu


# ------------------------------------------------------------------ kernel

def _cifar_kernel(x_ref, sel_ref, w1_ref, b1_ref, w2_ref, b2_ref,
                  w3_ref, b3_ref, w4_ref, b4_ref, w5_ref, b5_ref,
                  out_ref, *, tb):
    """Full Cifar_Net forward for one batch tile of `tb` images.

    x_ref  : (4, tb*7, 480) bf16  row-im2col input, grouped by conv1-row parity
    sel_ref: (tb, tb*7-6) f32     picks row t*7 of every image (valid fc rows)
    w1_ref : (480, 168) bf16      conv1 banded weight, [even|odd] output cols
    w2_ref : (5, 84, 160) bf16    conv2 banded weights per kernel row
    w3_ref : (5, 80, 120) f32     fc1 weight (torch-flatten permutation folded)
    out_ref: (tb, 128) f32        logits in lanes [0:10], zeros elsewhere
    """
    f32 = jnp.float32
    m1 = tb * 7        # conv1 rows per row-group (one per pooled row, all imgs)
    m2 = m1 - 2        # conv2 / pool2 rows kept (band shifts <= 2)
    m3 = m1 - 6        # fc1 rows kept (row shifts <= 4)

    def mm(a, b):
        return jnp.dot(a, b, preferred_element_type=f32)

    # ---- conv1 (5x5, 3->6) + ReLU + 2x2 max-pool, fully batched ------------
    # One (m1,480)x(480,168) matmul per row group; even/odd output columns live
    # in lanes [0:84]/[84:168], so pooling is a pair of elementwise maxima.
    w1 = w1_ref[...]
    b1 = b1_ref[...]

    def colmax(y):
        return jnp.maximum(y[:, :84], y[:, 84:])

    pa = jnp.maximum(colmax(mm(x_ref[0], w1)), colmax(mm(x_ref[1], w1)))
    pb = jnp.maximum(colmax(mm(x_ref[2], w1)), colmax(mm(x_ref[3], w1)))
    # relu(max + b) == max over the pool window of relu(conv + b)  (monotone)
    pa = jnp.maximum(pa + b1, 0.0).astype(jnp.bfloat16)   # pool1 rows p = 2k
    pb = jnp.maximum(pb + b1, 0.0).astype(jnp.bfloat16)   # pool1 rows p = 2k+1

    # ---- conv2 (5x5, 6->16) + ReLU + 2x2 max-pool, fully batched -----------
    # Per-image row windows are realised as contiguous sublane shifts of the
    # batched slab; rows that mix neighbouring images land at k in {5,6} of
    # each 7-row block and are discarded downstream.
    even_terms = ((pa, 0, 0), (pb, 1, 0), (pa, 2, 1), (pb, 3, 1), (pa, 4, 2))
    odd_terms = ((pb, 0, 0), (pa, 1, 1), (pb, 2, 1), (pa, 3, 2), (pb, 4, 2))

    def conv2_rows(terms):
        acc = None
        for src, band, shift in terms:
            term = mm(src[shift:shift + m2, :], w2_ref[band])
            acc = term if acc is None else acc + term
        return acc

    a_even = conv2_rows(even_terms)                        # (m2, 160)
    a_odd = conv2_rows(odd_terms)
    p2 = jnp.maximum(jnp.maximum(a_even[:, :80], a_even[:, 80:]),
                     jnp.maximum(a_odd[:, :80], a_odd[:, 80:]))
    p2 = jnp.maximum(p2 + b2_ref[...], 0.0)                # (m2, 80) float32

    # ---- fc1 (flatten permutation folded into w3) + ReLU --------------------
    # Sum over the 5 spatial rows via shifted slabs; valid results at rows t*7.
    acc = mm(p2[0:m3, :], w3_ref[0])
    for r in range(1, 5):
        acc = acc + mm(p2[r:r + m3, :], w3_ref[r])
    h1 = jnp.maximum(acc + b3_ref[...], 0.0)               # (m3, 120)

    # ---- pick the one valid row per image with a selection matmul, fc2, fc3 -
    hsel = mm(sel_ref[...], h1)                            # (tb, 120)
    h2 = jnp.maximum(mm(hsel, w4_ref[...]) + b4_ref[...], 0.0)
    out_ref[...] = (mm(h2, w5_ref[...]) + b5_ref[...]).astype(out_ref.dtype)


# ------------------------------------------------------------------ weight prep

def _conv1_matrix(w):
    """(6,3,5,5) OIHW conv1 weight -> (480, 168) banded im2col matrix.

    Input lane  = j*96 + x*3 + ci   (kernel row j, input col x, channel ci)
    Output lane = par*84 + q*6 + co (output-col parity par, pooled col q)
    """
    o_ch, i_ch, kh, kw = w.shape
    w_in, q_out = 32, 14
    wp = jnp.transpose(w, (2, 3, 1, 0))                    # (kh, kw, I, O)
    blocks = []
    for par in (0, 1):
        kidx = jnp.arange(w_in)[:, None] - (2 * jnp.arange(q_out)[None, :] + par)
        valid = (kidx >= 0) & (kidx < kw)
        band = wp[:, jnp.clip(kidx, 0, kw - 1)]            # (kh, 32, 14, I, O)
        band = band * valid[None, :, :, None, None]
        band = jnp.transpose(band, (0, 1, 3, 2, 4))        # (kh, 32, I, 14, O)
        blocks.append(band.reshape(kh * w_in * i_ch, q_out * o_ch))
    return jnp.concatenate(blocks, axis=1)                 # (480, 168)


def _conv2_bands(w):
    """(16,6,5,5) conv2 weight -> (5, 84, 160) banded per-kernel-row matrices.

    Input lane  = q1*6 + ci   (pool1 column q1, channel ci)
    Output lane = par*80 + q2*16 + co
    """
    o_ch, i_ch, kh, kw = w.shape
    w_in, q_out = 14, 5
    wp = jnp.transpose(w, (2, 3, 1, 0))                    # (kh, kw, I, O)
    blocks = []
    for par in (0, 1):
        kidx = jnp.arange(w_in)[:, None] - (2 * jnp.arange(q_out)[None, :] + par)
        valid = (kidx >= 0) & (kidx < kw)
        band = wp[:, jnp.clip(kidx, 0, kw - 1)]            # (kh, 14, 5, I, O)
        band = band * valid[None, :, :, None, None]
        band = jnp.transpose(band, (0, 1, 3, 2, 4))        # (kh, 14, I, 5, O)
        blocks.append(band.reshape(kh, w_in * i_ch, q_out * o_ch))
    return jnp.concatenate(blocks, axis=2)                 # (5, 84, 160)


def _fc1_weight(w):
    """torch fc1 (120, 400) -> (5, 80, 120), input lane = s*16 + c per row r."""
    w = w.reshape(120, 16, 5, 5)                           # (n, c, r, s)
    w = jnp.transpose(w, (2, 3, 1, 0))                     # (r, s, c, n)
    return w.reshape(5, 80, 120)


def _const_spec(arr):
    zeros = (0,) * arr.ndim
    return pl.BlockSpec(arr.shape, lambda g, _z=zeros: _z)


# ------------------------------------------------------------------ model

def init_params(key):
    ks = jax.random.split(key, 10)

    def u(k, shape, fan_in):
        bound = 1.0 / jnp.sqrt(jnp.float32(fan_in))
        return jax.random.uniform(k, shape, jnp.float32, -bound, bound)

    return {
        "conv1_w": u(ks[0], (6, 3, 5, 5), 75), "conv1_b": u(ks[1], (6,), 75),
        "conv2_w": u(ks[2], (16, 6, 5, 5), 150), "conv2_b": u(ks[3], (16,), 150),
        "fc1_w": u(ks[4], (120, 400), 400), "fc1_b": u(ks[5], (120,), 400),
        "fc2_w": u(ks[6], (84, 120), 120), "fc2_b": u(ks[7], (84,), 120),
        "fc3_w": u(ks[8], (10, 84), 84), "fc3_b": u(ks[9], (10,), 84),
    }


def cifar_net_forward(params, x_nchw):
    """Equivalent of Cifar_Net.forward. x_nchw: (B, 3, 32, 32) float32."""
    bsz = x_nchw.shape[0]

    # Batch tile: up to 128 images per grid step (tb*7 must be a multiple of 8).
    tb = 128
    if bsz < tb:
        tb = max(8, ((bsz + 7) // 8) * 8)
    b_pad = ((bsz + tb - 1) // tb) * tb
    grid = (b_pad // tb,)
    m1 = tb * 7
    m3 = m1 - 6

    # NCHW -> (B, 32, 96), lane = w*3 + c; pad the batch to a tile multiple.
    x = jnp.transpose(x_nchw, (0, 2, 3, 1)).reshape(bsz, 32, 96)
    if b_pad != bsz:
        x = jnp.pad(x, ((0, b_pad - bsz), (0, 0), (0, 0)))

    # Row-only im2col (K = 5*96 = 480), then group conv1 rows by the parity of
    # the pooled row / position within the pool pair:
    #   group 0: conv rows 4k,  group 1: 4k+1  (pool row 2k)
    #   group 2: conv rows 4k+2, group 3: 4k+3 (pool row 2k+1)
    im2 = jnp.concatenate([x[:, j:j + 28, :] for j in range(5)], axis=2)
    xg = jnp.transpose(im2.reshape(b_pad, 7, 4, 480), (2, 0, 1, 3))
    xg = xg.reshape(4, b_pad * 7, 480).astype(jnp.bfloat16)

    # Banded conv weights (bf16 MXU operands), biases pre-tiled per lane layout.
    w1cat = _conv1_matrix(params["conv1_w"]).astype(jnp.bfloat16)     # (480,168)
    w2b = _conv2_bands(params["conv2_w"]).astype(jnp.bfloat16)        # (5,84,160)
    b1r = jnp.tile(params["conv1_b"], 14)[None, :]                    # (1, 84)
    b2r = jnp.tile(params["conv2_b"], 5)[None, :]                     # (1, 80)

    # fc weights (f32, tiny): flatten permutation folded into fc1.
    w3p = _fc1_weight(params["fc1_w"])                                # (5,80,120)
    b3r = params["fc1_b"][None, :]
    w4t = params["fc2_w"].T                                           # (120, 84)
    b4r = params["fc2_b"][None, :]
    w5p = jnp.pad(params["fc3_w"].T, ((0, 0), (0, 118)))              # (84, 128)
    b5p = jnp.pad(params["fc3_b"], (0, 118))[None, :]                 # (1, 128)

    # Selection matrix: picks h1 row t*7 (the one valid fc row per image).
    sel = (jnp.arange(m3)[None, :] == (7 * jnp.arange(tb))[:, None])
    sel = sel.astype(jnp.float32)                                     # (tb, m3)

    out = pl.pallas_call(
        functools.partial(_cifar_kernel, tb=tb),
        out_shape=jax.ShapeDtypeStruct((b_pad, 128), jnp.float32),
        grid=grid,
        in_specs=[
            pl.BlockSpec((4, m1, 480), lambda g: (0, g, 0)),          # images
            _const_spec(sel),
            _const_spec(w1cat), _const_spec(b1r),
            _const_spec(w2b), _const_spec(b2r),
            _const_spec(w3p), _const_spec(b3r),
            _const_spec(w4t), _const_spec(b4r),
            _const_spec(w5p), _const_spec(b5p),
        ],
        out_specs=pl.BlockSpec((tb, 128), lambda g: (g, 0)),
        compiler_params=pltpu.CompilerParams(
            dimension_semantics=("parallel",),
            vmem_limit_bytes=48 * 1024 * 1024),
    )(xg, sel, w1cat, b1r, w2b, b2r, w3p, b3r, w4t, b4r, w5p, b5p)

    return out[:bsz, :10]


# ------------------------------------------------------------------ pure-JAX reference

def reference_forward(params, x_nchw):
    def conv_relu(x, w, b):
        y = jax.lax.conv_general_dilated(
            x, w, (1, 1), "VALID",
            dimension_numbers=("NCHW", "OIHW", "NCHW"))
        return jax.nn.relu(y + b[None, :, None, None])

    def pool(x):
        b, c, h, w = x.shape
        return x.reshape(b, c, h // 2, 2, w // 2, 2).max(axis=(3, 5))

    x = pool(conv_relu(x_nchw, params["conv1_w"], params["conv1_b"]))
    x = pool(conv_relu(x, params["conv2_w"], params["conv2_b"]))
    x = x.reshape(x.shape[0], -1)                 # torch.flatten(x, 1) on NCHW
    x = jax.nn.relu(x @ params["fc1_w"].T + params["fc1_b"])
    x = jax.nn.relu(x @ params["fc2_w"].T + params["fc2_b"])
    return x @ params["fc3_w"].T + params["fc3_b"]


if __name__ == "__main__":
    key = jax.random.PRNGKey(0)
    k_param, k_x = jax.random.split(key)
    params = init_params(k_param)
    # CIFAR-sized input is required by the architecture (fc1 expects 16*5*5).
    x = jax.random.normal(k_x, (2, 3, 32, 32), jnp.float32)

    out = jax.block_until_ready(jax.jit(cifar_net_forward)(params, x))
    assert out.shape == (2, 10) and out.dtype == jnp.float32

    with jax.default_matmul_precision("float32"):
        ref = jax.block_until_ready(jax.jit(reference_forward)(params, x))
    err = float(jnp.max(jnp.abs(out - ref)))
    # bf16 MXU operands in the conv phase -> allow bf16-level noise.
    assert err < 5e-2, f"mismatch vs reference: {err}"

    print("KERNEL_OK")
</pallas_src>

<mosaic_0001>
module attributes {stable_mosaic.version = 11 : i64} {
  func.func @_cifar_kernel(%arg0: i32, %arg1: memref<4x56x480xbf16, #tpu.memory_space<vmem>>, %arg2: memref<8x50xf32, #tpu.memory_space<vmem>>, %arg3: memref<480x168xbf16, #tpu.memory_space<vmem>>, %arg4: memref<1x84xf32, #tpu.memory_space<vmem>>, %arg5: memref<5x84x160xbf16, #tpu.memory_space<vmem>>, %arg6: memref<1x80xf32, #tpu.memory_space<vmem>>, %arg7: memref<5x80x120xf32, #tpu.memory_space<vmem>>, %arg8: memref<1x120xf32, #tpu.memory_space<vmem>>, %arg9: memref<120x84xf32, #tpu.memory_space<vmem>>, %arg10: memref<1x84xf32, #tpu.memory_space<vmem>>, %arg11: memref<84x128xf32, #tpu.memory_space<vmem>>, %arg12: memref<1x128xf32, #tpu.memory_space<vmem>>, %arg13: memref<8x128xf32, #tpu.memory_space<vmem>>) attributes {dimension_semantics = [#tpu.dimension_semantics<parallel>], iteration_bounds = array<i64: 1>, scalar_prefetch = 0 : i64, scratch_operands = 0 : i64, tpu.core_type = #tpu.core_type<tc>, window_params = [{transform_indices = @transform_0, window_bounds = array<i64: 4, 56, 480>}, {pipeline_mode = #tpu.pipeline_mode<synchronous>, transform_indices = @transform_1, window_bounds = array<i64: 8, 50>}, {pipeline_mode = #tpu.pipeline_mode<synchronous>, transform_indices = @transform_2, window_bounds = array<i64: 480, 168>}, {pipeline_mode = #tpu.pipeline_mode<synchronous>, transform_indices = @transform_3, window_bounds = array<i64: 1, 84>}, {pipeline_mode = #tpu.pipeline_mode<synchronous>, transform_indices = @transform_4, window_bounds = array<i64: 5, 84, 160>}, {pipeline_mode = #tpu.pipeline_mode<synchronous>, transform_indices = @transform_5, window_bounds = array<i64: 1, 80>}, {pipeline_mode = #tpu.pipeline_mode<synchronous>, transform_indices = @transform_6, window_bounds = array<i64: 5, 80, 120>}, {pipeline_mode = #tpu.pipeline_mode<synchronous>, transform_indices = @transform_7, window_bounds = array<i64: 1, 120>}, {pipeline_mode = #tpu.pipeline_mode<synchronous>, transform_indices = @transform_8, window_bounds = array<i64: 120, 84>}, {pipeline_mode = #tpu.pipeline_mode<synchronous>, transform_indices = @transform_9, window_bounds = array<i64: 1, 84>}, {pipeline_mode = #tpu.pipeline_mode<synchronous>, transform_indices = @transform_10, window_bounds = array<i64: 84, 128>}, {pipeline_mode = #tpu.pipeline_mode<synchronous>, transform_indices = @transform_11, window_bounds = array<i64: 1, 128>}, {transform_indices = @transform_12, window_bounds = array<i64: 8, 128>}]} {
    %c0 = arith.constant 0 : index
    %c0_0 = arith.constant 0 : index
    %0 = vector.load %arg3[%c0, %c0_0] : memref<480x168xbf16, #tpu.memory_space<vmem>>, vector<480x168xbf16>
    %c0_1 = arith.constant 0 : index
    %c0_2 = arith.constant 0 : index
    %1 = vector.load %arg4[%c0_1, %c0_2] : memref<1x84xf32, #tpu.memory_space<vmem>>, vector<1x84xf32>
    %c0_3 = arith.constant 0 : index
    %c0_4 = arith.constant 0 : index
    %c0_5 = arith.constant 0 : index
    %2 = vector.load %arg1[%c0_3, %c0_4, %c0_5] : memref<4x56x480xbf16, #tpu.memory_space<vmem>>, vector<1x56x480xbf16>
    %3 = vector.shape_cast %2 : vector<1x56x480xbf16> to vector<56x480xbf16>
    %cst = arith.constant dense<0.000000e+00> : vector<56x168xf32>
    %4 = tpu.matmul %3, %0, %cst {dimension_numbers = #tpu.dot_dimension_numbers<[1], [0], [0], [1], [0, 0, 1, 1], [], []>} : vector<56x480xbf16>, vector<480x168xbf16>, vector<56x168xf32> -> vector<56x168xf32>
    %5 = vector.extract_strided_slice %4 {offsets = [0, 0], sizes = [56, 84], strides = [1, 1]} : vector<56x168xf32> to vector<56x84xf32>
    %6 = vector.extract_strided_slice %4 {offsets = [0, 84], sizes = [56, 84], strides = [1, 1]} : vector<56x168xf32> to vector<56x84xf32>
    %7 = arith.maximumf %5, %6 : vector<56x84xf32>
    %c1 = arith.constant 1 : index
    %c0_6 = arith.constant 0 : index
    %c0_7 = arith.constant 0 : index
    %8 = vector.load %arg1[%c1, %c0_6, %c0_7] : memref<4x56x480xbf16, #tpu.memory_space<vmem>>, vector<1x56x480xbf16>
    %9 = vector.shape_cast %8 : vector<1x56x480xbf16> to vector<56x480xbf16>
    %cst_8 = arith.constant dense<0.000000e+00> : vector<56x168xf32>
    %10 = tpu.matmul %9, %0, %cst_8 {dimension_numbers = #tpu.dot_dimension_numbers<[1], [0], [0], [1], [0, 0, 1, 1], [], []>} : vector<56x480xbf16>, vector<480x168xbf16>, vector<56x168xf32> -> vector<56x168xf32>
    %11 = vector.extract_strided_slice %10 {offsets = [0, 0], sizes = [56, 84], strides = [1, 1]} : vector<56x168xf32> to vector<56x84xf32>
    %12 = vector.extract_strided_slice %10 {offsets = [0, 84], sizes = [56, 84], strides = [1, 1]} : vector<56x168xf32> to vector<56x84xf32>
    %13 = arith.maximumf %11, %12 : vector<56x84xf32>
    %14 = arith.maximumf %7, %13 : vector<56x84xf32>
    %c2 = arith.constant 2 : index
    %c0_9 = arith.constant 0 : index
    %c0_10 = arith.constant 0 : index
    %15 = vector.load %arg1[%c2, %c0_9, %c0_10] : memref<4x56x480xbf16, #tpu.memory_space<vmem>>, vector<1x56x480xbf16>
    %16 = vector.shape_cast %15 : vector<1x56x480xbf16> to vector<56x480xbf16>
    %cst_11 = arith.constant dense<0.000000e+00> : vector<56x168xf32>
    %17 = tpu.matmul %16, %0, %cst_11 {dimension_numbers = #tpu.dot_dimension_numbers<[1], [0], [0], [1], [0, 0, 1, 1], [], []>} : vector<56x480xbf16>, vector<480x168xbf16>, vector<56x168xf32> -> vector<56x168xf32>
    %18 = vector.extract_strided_slice %17 {offsets = [0, 0], sizes = [56, 84], strides = [1, 1]} : vector<56x168xf32> to vector<56x84xf32>
    %19 = vector.extract_strided_slice %17 {offsets = [0, 84], sizes = [56, 84], strides = [1, 1]} : vector<56x168xf32> to vector<56x84xf32>
    %20 = arith.maximumf %18, %19 : vector<56x84xf32>
    %c3 = arith.constant 3 : index
    %c0_12 = arith.constant 0 : index
    %c0_13 = arith.constant 0 : index
    %21 = vector.load %arg1[%c3, %c0_12, %c0_13] : memref<4x56x480xbf16, #tpu.memory_space<vmem>>, vector<1x56x480xbf16>
    %22 = vector.shape_cast %21 : vector<1x56x480xbf16> to vector<56x480xbf16>
    %cst_14 = arith.constant dense<0.000000e+00> : vector<56x168xf32>
    %23 = tpu.matmul %22, %0, %cst_14 {dimension_numbers = #tpu.dot_dimension_numbers<[1], [0], [0], [1], [0, 0, 1, 1], [], []>} : vector<56x480xbf16>, vector<480x168xbf16>, vector<56x168xf32> -> vector<56x168xf32>
    %24 = vector.extract_strided_slice %23 {offsets = [0, 0], sizes = [56, 84], strides = [1, 1]} : vector<56x168xf32> to vector<56x84xf32>
    %25 = vector.extract_strided_slice %23 {offsets = [0, 84], sizes = [56, 84], strides = [1, 1]} : vector<56x168xf32> to vector<56x84xf32>
    %26 = arith.maximumf %24, %25 : vector<56x84xf32>
    %27 = arith.maximumf %20, %26 : vector<56x84xf32>
    %28 = vector.broadcast %1 : vector<1x84xf32> to vector<56x84xf32>
    %29 = arith.addf %14, %28 : vector<56x84xf32>
    %cst_15 = arith.constant 0.000000e+00 : f32
    %30 = vector.broadcast %cst_15 : f32 to vector<56x84xf32>
    %31 = arith.maximumf %29, %30 : vector<56x84xf32>
    %32 = arith.truncf %31 : vector<56x84xf32> to vector<56x84xbf16>
    %33 = vector.broadcast %1 : vector<1x84xf32> to vector<56x84xf32>
    %34 = arith.addf %27, %33 : vector<56x84xf32>
    %cst_16 = arith.constant 0.000000e+00 : f32
    %35 = vector.broadcast %cst_16 : f32 to vector<56x84xf32>
    %36 = arith.maximumf %34, %35 : vector<56x84xf32>
    %37 = arith.truncf %36 : vector<56x84xf32> to vector<56x84xbf16>
    %38 = vector.extract_strided_slice %32 {offsets = [0, 0], sizes = [54, 84], strides = [1, 1]} : vector<56x84xbf16> to vector<54x84xbf16>
    %c0_17 = arith.constant 0 : index
    %c0_18 = arith.constant 0 : index
    %c0_19 = arith.constant 0 : index
    %39 = vector.load %arg5[%c0_17, %c0_18, %c0_19] : memref<5x84x160xbf16, #tpu.memory_space<vmem>>, vector<1x84x160xbf16>
    %40 = vector.shape_cast %39 : vector<1x84x160xbf16> to vector<84x160xbf16>
    %cst_20 = arith.constant dense<0.000000e+00> : vector<54x160xf32>
    %41 = tpu.matmul %38, %40, %cst_20 {dimension_numbers = #tpu.dot_dimension_numbers<[1], [0], [0], [1], [0, 0, 1, 1], [], []>} : vector<54x84xbf16>, vector<84x160xbf16>, vector<54x160xf32> -> vector<54x160xf32>
    %42 = vector.extract_strided_slice %37 {offsets = [0, 0], sizes = [54, 84], strides = [1, 1]} : vector<56x84xbf16> to vector<54x84xbf16>
    %c1_21 = arith.constant 1 : index
    %c0_22 = arith.constant 0 : index
    %c0_23 = arith.constant 0 : index
    %43 = vector.load %arg5[%c1_21, %c0_22, %c0_23] : memref<5x84x160xbf16, #tpu.memory_space<vmem>>, vector<1x84x160xbf16>
    %44 = vector.shape_cast %43 : vector<1x84x160xbf16> to vector<84x160xbf16>
    %cst_24 = arith.constant dense<0.000000e+00> : vector<54x160xf32>
    %45 = tpu.matmul %42, %44, %cst_24 {dimension_numbers = #tpu.dot_dimension_numbers<[1], [0], [0], [1], [0, 0, 1, 1], [], []>} : vector<54x84xbf16>, vector<84x160xbf16>, vector<54x160xf32> -> vector<54x160xf32>
    %46 = arith.addf %41, %45 : vector<54x160xf32>
    %47 = vector.extract_strided_slice %32 {offsets = [1, 0], sizes = [54, 84], strides = [1, 1]} : vector<56x84xbf16> to vector<54x84xbf16>
    %c2_25 = arith.constant 2 : index
    %c0_26 = arith.constant 0 : index
    %c0_27 = arith.constant 0 : index
    %48 = vector.load %arg5[%c2_25, %c0_26, %c0_27] : memref<5x84x160xbf16, #tpu.memory_space<vmem>>, vector<1x84x160xbf16>
    %49 = vector.shape_cast %48 : vector<1x84x160xbf16> to vector<84x160xbf16>
    %cst_28 = arith.constant dense<0.000000e+00> : vector<54x160xf32>
    %50 = tpu.matmul %47, %49, %cst_28 {dimension_numbers = #tpu.dot_dimension_numbers<[1], [0], [0], [1], [0, 0, 1, 1], [], []>} : vector<54x84xbf16>, vector<84x160xbf16>, vector<54x160xf32> -> vector<54x160xf32>
    %51 = arith.addf %46, %50 : vector<54x160xf32>
    %52 = vector.extract_strided_slice %37 {offsets = [1, 0], sizes = [54, 84], strides = [1, 1]} : vector<56x84xbf16> to vector<54x84xbf16>
    %c3_29 = arith.constant 3 : index
    %c0_30 = arith.constant 0 : index
    %c0_31 = arith.constant 0 : index
    %53 = vector.load %arg5[%c3_29, %c0_30, %c0_31] : memref<5x84x160xbf16, #tpu.memory_space<vmem>>, vector<1x84x160xbf16>
    %54 = vector.shape_cast %53 : vector<1x84x160xbf16> to vector<84x160xbf16>
    %cst_32 = arith.constant dense<0.000000e+00> : vector<54x160xf32>
    %55 = tpu.matmul %52, %54, %cst_32 {dimension_numbers = #tpu.dot_dimension_numbers<[1], [0], [0], [1], [0, 0, 1, 1], [], []>} : vector<54x84xbf16>, vector<84x160xbf16>, vector<54x160xf32> -> vector<54x160xf32>
    %56 = arith.addf %51, %55 : vector<54x160xf32>
    %57 = vector.extract_strided_slice %32 {offsets = [2, 0], sizes = [54, 84], strides = [1, 1]} : vector<56x84xbf16> to vector<54x84xbf16>
    %c4 = arith.constant 4 : index
    %c0_33 = arith.constant 0 : index
    %c0_34 = arith.constant 0 : index
    %58 = vector.load %arg5[%c4, %c0_33, %c0_34] : memref<5x84x160xbf16, #tpu.memory_space<vmem>>, vector<1x84x160xbf16>
    %59 = vector.shape_cast %58 : vector<1x84x160xbf16> to vector<84x160xbf16>
    %cst_35 = arith.constant dense<0.000000e+00> : vector<54x160xf32>
    %60 = tpu.matmul %57, %59, %cst_35 {dimension_numbers = #tpu.dot_dimension_numbers<[1], [0], [0], [1], [0, 0, 1, 1], [], []>} : vector<54x84xbf16>, vector<84x160xbf16>, vector<54x160xf32> -> vector<54x160xf32>
    %61 = arith.addf %56, %60 : vector<54x160xf32>
    %62 = vector.extract_strided_slice %37 {offsets = [0, 0], sizes = [54, 84], strides = [1, 1]} : vector<56x84xbf16> to vector<54x84xbf16>
    %c0_36 = arith.constant 0 : index
    %c0_37 = arith.constant 0 : index
    %c0_38 = arith.constant 0 : index
    %63 = vector.load %arg5[%c0_36, %c0_37, %c0_38] : memref<5x84x160xbf16, #tpu.memory_space<vmem>>, vector<1x84x160xbf16>
    %64 = vector.shape_cast %63 : vector<1x84x160xbf16> to vector<84x160xbf16>
    %cst_39 = arith.constant dense<0.000000e+00> : vector<54x160xf32>
    %65 = tpu.matmul %62, %64, %cst_39 {dimension_numbers = #tpu.dot_dimension_numbers<[1], [0], [0], [1], [0, 0, 1, 1], [], []>} : vector<54x84xbf16>, vector<84x160xbf16>, vector<54x160xf32> -> vector<54x160xf32>
    %66 = vector.extract_strided_slice %32 {offsets = [1, 0], sizes = [54, 84], strides = [1, 1]} : vector<56x84xbf16> to vector<54x84xbf16>
    %c1_40 = arith.constant 1 : index
    %c0_41 = arith.constant 0 : index
    %c0_42 = arith.constant 0 : index
    %67 = vector.load %arg5[%c1_40, %c0_41, %c0_42] : memref<5x84x160xbf16, #tpu.memory_space<vmem>>, vector<1x84x160xbf16>
    %68 = vector.shape_cast %67 : vector<1x84x160xbf16> to vector<84x160xbf16>
    %cst_43 = arith.constant dense<0.000000e+00> : vector<54x160xf32>
    %69 = tpu.matmul %66, %68, %cst_43 {dimension_numbers = #tpu.dot_dimension_numbers<[1], [0], [0], [1], [0, 0, 1, 1], [], []>} : vector<54x84xbf16>, vector<84x160xbf16>, vector<54x160xf32> -> vector<54x160xf32>
    %70 = arith.addf %65, %69 : vector<54x160xf32>
    %71 = vector.extract_strided_slice %37 {offsets = [1, 0], sizes = [54, 84], strides = [1, 1]} : vector<56x84xbf16> to vector<54x84xbf16>
    %c2_44 = arith.constant 2 : index
    %c0_45 = arith.constant 0 : index
    %c0_46 = arith.constant 0 : index
    %72 = vector.load %arg5[%c2_44, %c0_45, %c0_46] : memref<5x84x160xbf16, #tpu.memory_space<vmem>>, vector<1x84x160xbf16>
    %73 = vector.shape_cast %72 : vector<1x84x160xbf16> to vector<84x160xbf16>
    %cst_47 = arith.constant dense<0.000000e+00> : vector<54x160xf32>
    %74 = tpu.matmul %71, %73, %cst_47 {dimension_numbers = #tpu.dot_dimension_numbers<[1], [0], [0], [1], [0, 0, 1, 1], [], []>} : vector<54x84xbf16>, vector<84x160xbf16>, vector<54x160xf32> -> vector<54x160xf32>
    %75 = arith.addf %70, %74 : vector<54x160xf32>
    %76 = vector.extract_strided_slice %32 {offsets = [2, 0], sizes = [54, 84], strides = [1, 1]} : vector<56x84xbf16> to vector<54x84xbf16>
    %c3_48 = arith.constant 3 : index
    %c0_49 = arith.constant 0 : index
    %c0_50 = arith.constant 0 : index
    %77 = vector.load %arg5[%c3_48, %c0_49, %c0_50] : memref<5x84x160xbf16, #tpu.memory_space<vmem>>, vector<1x84x160xbf16>
    %78 = vector.shape_cast %77 : vector<1x84x160xbf16> to vector<84x160xbf16>
    %cst_51 = arith.constant dense<0.000000e+00> : vector<54x160xf32>
    %79 = tpu.matmul %76, %78, %cst_51 {dimension_numbers = #tpu.dot_dimension_numbers<[1], [0], [0], [1], [0, 0, 1, 1], [], []>} : vector<54x84xbf16>, vector<84x160xbf16>, vector<54x160xf32> -> vector<54x160xf32>
    %80 = arith.addf %75, %79 : vector<54x160xf32>
    %81 = vector.extract_strided_slice %37 {offsets = [2, 0], sizes = [54, 84], strides = [1, 1]} : vector<56x84xbf16> to vector<54x84xbf16>
    %c4_52 = arith.constant 4 : index
    %c0_53 = arith.constant 0 : index
    %c0_54 = arith.constant 0 : index
    %82 = vector.load %arg5[%c4_52, %c0_53, %c0_54] : memref<5x84x160xbf16, #tpu.memory_space<vmem>>, vector<1x84x160xbf16>
    %83 = vector.shape_cast %82 : vector<1x84x160xbf16> to vector<84x160xbf16>
    %cst_55 = arith.constant dense<0.000000e+00> : vector<54x160xf32>
    %84 = tpu.matmul %81, %83, %cst_55 {dimension_numbers = #tpu.dot_dimension_numbers<[1], [0], [0], [1], [0, 0, 1, 1], [], []>} : vector<54x84xbf16>, vector<84x160xbf16>, vector<54x160xf32> -> vector<54x160xf32>
    %85 = arith.addf %80, %84 : vector<54x160xf32>
    %86 = vector.extract_strided_slice %61 {offsets = [0, 0], sizes = [54, 80], strides = [1, 1]} : vector<54x160xf32> to vector<54x80xf32>
    %87 = vector.extract_strided_slice %61 {offsets = [0, 80], sizes = [54, 80], strides = [1, 1]} : vector<54x160xf32> to vector<54x80xf32>
    %88 = arith.maximumf %86, %87 : vector<54x80xf32>
    %89 = vector.extract_strided_slice %85 {offsets = [0, 0], sizes = [54, 80], strides = [1, 1]} : vector<54x160xf32> to vector<54x80xf32>
    %90 = vector.extract_strided_slice %85 {offsets = [0, 80], sizes = [54, 80], strides = [1, 1]} : vector<54x160xf32> to vector<54x80xf32>
    %91 = arith.maximumf %89, %90 : vector<54x80xf32>
    %92 = arith.maximumf %88, %91 : vector<54x80xf32>
    %c0_56 = arith.constant 0 : index
    %c0_57 = arith.constant 0 : index
    %93 = vector.load %arg6[%c0_56, %c0_57] : memref<1x80xf32, #tpu.memory_space<vmem>>, vector<1x80xf32>
    %94 = vector.broadcast %93 : vector<1x80xf32> to vector<54x80xf32>
    %95 = arith.addf %92, %94 : vector<54x80xf32>
    %cst_58 = arith.constant 0.000000e+00 : f32
    %96 = vector.broadcast %cst_58 : f32 to vector<54x80xf32>
    %97 = arith.maximumf %95, %96 : vector<54x80xf32>
    %98 = vector.extract_strided_slice %97 {offsets = [0, 0], sizes = [50, 80], strides = [1, 1]} : vector<54x80xf32> to vector<50x80xf32>
    %c0_59 = arith.constant 0 : index
    %c0_60 = arith.constant 0 : index
    %c0_61 = arith.constant 0 : index
    %99 = vector.load %arg7[%c0_59, %c0_60, %c0_61] : memref<5x80x120xf32, #tpu.memory_space<vmem>>, vector<1x80x120xf32>
    %100 = vector.shape_cast %99 : vector<1x80x120xf32> to vector<80x120xf32>
    %cst_62 = arith.constant dense<0.000000e+00> : vector<50x120xf32>
    %101 = tpu.matmul %98, %100, %cst_62 {dimension_numbers = #tpu.dot_dimension_numbers<[1], [0], [0], [1], [0, 0, 1, 1], [], []>} : vector<50x80xf32>, vector<80x120xf32>, vector<50x120xf32> -> vector<50x120xf32>
    %102 = vector.extract_strided_slice %97 {offsets = [1, 0], sizes = [50, 80], strides = [1, 1]} : vector<54x80xf32> to vector<50x80xf32>
    %c1_63 = arith.constant 1 : index
    %c0_64 = arith.constant 0 : index
    %c0_65 = arith.constant 0 : index
    %103 = vector.load %arg7[%c1_63, %c0_64, %c0_65] : memref<5x80x120xf32, #tpu.memory_space<vmem>>, vector<1x80x120xf32>
    %104 = vector.shape_cast %103 : vector<1x80x120xf32> to vector<80x120xf32>
    %cst_66 = arith.constant dense<0.000000e+00> : vector<50x120xf32>
    %105 = tpu.matmul %102, %104, %cst_66 {dimension_numbers = #tpu.dot_dimension_numbers<[1], [0], [0], [1], [0, 0, 1, 1], [], []>} : vector<50x80xf32>, vector<80x120xf32>, vector<50x120xf32> -> vector<50x120xf32>
    %106 = arith.addf %101, %105 : vector<50x120xf32>
    %107 = vector.extract_strided_slice %97 {offsets = [2, 0], sizes = [50, 80], strides = [1, 1]} : vector<54x80xf32> to vector<50x80xf32>
    %c2_67 = arith.constant 2 : index
    %c0_68 = arith.constant 0 : index
    %c0_69 = arith.constant 0 : index
    %108 = vector.load %arg7[%c2_67, %c0_68, %c0_69] : memref<5x80x120xf32, #tpu.memory_space<vmem>>, vector<1x80x120xf32>
    %109 = vector.shape_cast %108 : vector<1x80x120xf32> to vector<80x120xf32>
    %cst_70 = arith.constant dense<0.000000e+00> : vector<50x120xf32>
    %110 = tpu.matmul %107, %109, %cst_70 {dimension_numbers = #tpu.dot_dimension_numbers<[1], [0], [0], [1], [0, 0, 1, 1], [], []>} : vector<50x80xf32>, vector<80x120xf32>, vector<50x120xf32> -> vector<50x120xf32>
    %111 = arith.addf %106, %110 : vector<50x120xf32>
    %112 = vector.extract_strided_slice %97 {offsets = [3, 0], sizes = [50, 80], strides = [1, 1]} : vector<54x80xf32> to vector<50x80xf32>
    %c3_71 = arith.constant 3 : index
    %c0_72 = arith.constant 0 : index
    %c0_73 = arith.constant 0 : index
    %113 = vector.load %arg7[%c3_71, %c0_72, %c0_73] : memref<5x80x120xf32, #tpu.memory_space<vmem>>, vector<1x80x120xf32>
    %114 = vector.shape_cast %113 : vector<1x80x120xf32> to vector<80x120xf32>
    %cst_74 = arith.constant dense<0.000000e+00> : vector<50x120xf32>
    %115 = tpu.matmul %112, %114, %cst_74 {dimension_numbers = #tpu.dot_dimension_numbers<[1], [0], [0], [1], [0, 0, 1, 1], [], []>} : vector<50x80xf32>, vector<80x120xf32>, vector<50x120xf32> -> vector<50x120xf32>
    %116 = arith.addf %111, %115 : vector<50x120xf32>
    %117 = vector.extract_strided_slice %97 {offsets = [4, 0], sizes = [50, 80], strides = [1, 1]} : vector<54x80xf32> to vector<50x80xf32>
    %c4_75 = arith.constant 4 : index
    %c0_76 = arith.constant 0 : index
    %c0_77 = arith.constant 0 : index
    %118 = vector.load %arg7[%c4_75, %c0_76, %c0_77] : memref<5x80x120xf32, #tpu.memory_space<vmem>>, vector<1x80x120xf32>
    %119 = vector.shape_cast %118 : vector<1x80x120xf32> to vector<80x120xf32>
    %cst_78 = arith.constant dense<0.000000e+00> : vector<50x120xf32>
    %120 = tpu.matmul %117, %119, %cst_78 {dimension_numbers = #tpu.dot_dimension_numbers<[1], [0], [0], [1], [0, 0, 1, 1], [], []>} : vector<50x80xf32>, vector<80x120xf32>, vector<50x120xf32> -> vector<50x120xf32>
    %121 = arith.addf %116, %120 : vector<50x120xf32>
    %c0_79 = arith.constant 0 : index
    %c0_80 = arith.constant 0 : index
    %122 = vector.load %arg8[%c0_79, %c0_80] : memref<1x120xf32, #tpu.memory_space<vmem>>, vector<1x120xf32>
    %123 = vector.broadcast %122 : vector<1x120xf32> to vector<50x120xf32>
    %124 = arith.addf %121, %123 : vector<50x120xf32>
    %cst_81 = arith.constant 0.000000e+00 : f32
    %125 = vector.broadcast %cst_81 : f32 to vector<50x120xf32>
    %126 = arith.maximumf %124, %125 : vector<50x120xf32>
    %c0_82 = arith.constant 0 : index
    %c0_83 = arith.constant 0 : index
    %127 = vector.load %arg2[%c0_82, %c0_83] : memref<8x50xf32, #tpu.memory_space<vmem>>, vector<8x50xf32>
    %cst_84 = arith.constant dense<0.000000e+00> : vector<8x120xf32>
    %128 = tpu.matmul %127, %126, %cst_84 {dimension_numbers = #tpu.dot_dimension_numbers<[1], [0], [0], [1], [0, 0, 1, 1], [], []>} : vector<8x50xf32>, vector<50x120xf32>, vector<8x120xf32> -> vector<8x120xf32>
    %c0_85 = arith.constant 0 : index
    %c0_86 = arith.constant 0 : index
    %129 = vector.load %arg9[%c0_85, %c0_86] : memref<120x84xf32, #tpu.memory_space<vmem>>, vector<120x84xf32>
    %cst_87 = arith.constant dense<0.000000e+00> : vector<8x84xf32>
    %130 = tpu.matmul %128, %129, %cst_87 {dimension_numbers = #tpu.dot_dimension_numbers<[1], [0], [0], [1], [0, 0, 1, 1], [], []>} : vector<8x120xf32>, vector<120x84xf32>, vector<8x84xf32> -> vector<8x84xf32>
    %c0_88 = arith.constant 0 : index
    %c0_89 = arith.constant 0 : index
    %131 = vector.load %arg10[%c0_88, %c0_89] : memref<1x84xf32, #tpu.memory_space<vmem>>, vector<1x84xf32>
    %132 = vector.broadcast %131 : vector<1x84xf32> to vector<8x84xf32>
    %133 = arith.addf %130, %132 : vector<8x84xf32>
    %cst_90 = arith.constant 0.000000e+00 : f32
    %134 = vector.broadcast %cst_90 : f32 to vector<8x84xf32>
    %135 = arith.maximumf %133, %134 : vector<8x84xf32>
    %c0_91 = arith.constant 0 : index
    %c0_92 = arith.constant 0 : index
    %136 = vector.load %arg11[%c0_91, %c0_92] : memref<84x128xf32, #tpu.memory_space<vmem>>, vector<84x128xf32>
    %cst_93 = arith.constant dense<0.000000e+00> : vector<8x128xf32>
    %137 = tpu.matmul %135, %136, %cst_93 {dimension_numbers = #tpu.dot_dimension_numbers<[1], [0], [0], [1], [0, 0, 1, 1], [], []>} : vector<8x84xf32>, vector<84x128xf32>, vector<8x128xf32> -> vector<8x128xf32>
    %c0_94 = arith.constant 0 : index
    %c0_95 = arith.constant 0 : index
    %138 = vector.load %arg12[%c0_94, %c0_95] : memref<1x128xf32, #tpu.memory_space<vmem>>, vector<1x128xf32>
    %139 = vector.broadcast %138 : vector<1x128xf32> to vector<8x128xf32>
    %140 = arith.addf %137, %139 : vector<8x128xf32>
    %c0_96 = arith.constant 0 : index
    %c0_97 = arith.constant 0 : index
    %141 = vector.load %arg13[%c0_96, %c0_97] : memref<8x128xf32, #tpu.memory_space<vmem>>, vector<8x128xf32>
    tpu.vector_store %arg13[%c0_96, %c0_97], %140 {strides = array<i32>} : memref<8x128xf32, #tpu.memory_space<vmem>>, vector<8x128xf32>,
    return
  }
  func.func @transform_0(%arg0: i32) -> (i32, i32, i32) {
    %c0_i32 = arith.constant 0 : i32
    %c0_i32_0 = arith.constant 0 : i32
    %c0_i32_1 = arith.constant 0 : i32
    return %c0_i32, %arg0, %c0_i32_0 : i32, i32, i32
  }
  func.func @transform_1(%arg0: i32) -> (i32, i32) {
    %c0_i32 = arith.constant 0 : i32
    %c0_i32_0 = arith.constant 0 : i32
    %c0_i32_1 = arith.constant 0 : i32
    return %c0_i32, %c0_i32_0 : i32, i32
  }
  func.func @transform_2(%arg0: i32) -> (i32, i32) {
    %c0_i32 = arith.constant 0 : i32
    %c0_i32_0 = arith.constant 0 : i32
    %c0_i32_1 = arith.constant 0 : i32
    return %c0_i32, %c0_i32_0 : i32, i32
  }
  func.func @transform_3(%arg0: i32) -> (i32, i32) {
    %c0_i32 = arith.constant 0 : i32
    %c0_i32_0 = arith.constant 0 : i32
    %c0_i32_1 = arith.constant 0 : i32
    return %c0_i32, %c0_i32_0 : i32, i32
  }
  func.func @transform_4(%arg0: i32) -> (i32, i32, i32) {
    %c0_i32 = arith.constant 0 : i32
    %c0_i32_0 = arith.constant 0 : i32
    %c0_i32_1 = arith.constant 0 : i32
    %c0_i32_2 = arith.constant 0 : i32
    return %c0_i32, %c0_i32_0, %c0_i32_1 : i32, i32, i32
  }
  func.func @transform_5(%arg0: i32) -> (i32, i32) {
    %c0_i32 = arith.constant 0 : i32
    %c0_i32_0 = arith.constant 0 : i32
    %c0_i32_1 = arith.constant 0 : i32
    return %c0_i32, %c0_i32_0 : i32, i32
  }
  func.func @transform_6(%arg0: i32) -> (i32, i32, i32) {
    %c0_i32 = arith.constant 0 : i32
    %c0_i32_0 = arith.constant 0 : i32
    %c0_i32_1 = arith.constant 0 : i32
    %c0_i32_2 = arith.constant 0 : i32
    return %c0_i32, %c0_i32_0, %c0_i32_1 : i32, i32, i32
  }
  func.func @transform_7(%arg0: i32) -> (i32, i32) {
    %c0_i32 = arith.constant 0 : i32
    %c0_i32_0 = arith.constant 0 : i32
    %c0_i32_1 = arith.constant 0 : i32
    return %c0_i32, %c0_i32_0 : i32, i32
  }
  func.func @transform_8(%arg0: i32) -> (i32, i32) {
    %c0_i32 = arith.constant 0 : i32
    %c0_i32_0 = arith.constant 0 : i32
    %c0_i32_1 = arith.constant 0 : i32
    return %c0_i32, %c0_i32_0 : i32, i32
  }
  func.func @transform_9(%arg0: i32) -> (i32, i32) {
    %c0_i32 = arith.constant 0 : i32
    %c0_i32_0 = arith.constant 0 : i32
    %c0_i32_1 = arith.constant 0 : i32
    return %c0_i32, %c0_i32_0 : i32, i32
  }
  func.func @transform_10(%arg0: i32) -> (i32, i32) {
    %c0_i32 = arith.constant 0 : i32
    %c0_i32_0 = arith.constant 0 : i32
    %c0_i32_1 = arith.constant 0 : i32
    return %c0_i32, %c0_i32_0 : i32, i32
  }
  func.func @transform_11(%arg0: i32) -> (i32, i32) {
    %c0_i32 = arith.constant 0 : i32
    %c0_i32_0 = arith.constant 0 : i32
    %c0_i32_1 = arith.constant 0 : i32
    return %c0_i32, %c0_i32_0 : i32, i32
  }
  func.func @transform_12(%arg0: i32) -> (i32, i32) {
    %c0_i32 = arith.constant 0 : i32
    %c0_i32_0 = arith.constant 0 : i32
    return %arg0, %c0_i32 : i32, i32
  }
}

</mosaic_0001>

<bundles_post_ra>
// kernel: tile.13
= control target key start
LH: loop header
LB: loop body
LE: loop exit
PB: predicated region body
PF: predicated region fallthrough
CT: control target
= control target key end

     0   :  { %s28_s0 = inlined_call_operand.vmem [shape: f32[6], index: 0, kind: input, shape index: {}]   ;;  %s29_s1 = inlined_call_operand.vmem [shape: f32[14,6], index: 1, kind: output, shape index: {}]  }
   0x1   :  { %v4_v0 = vld [vmem:[%s28_s0] ss:$0 sm:$0xff] }
   0x2   :  { %5 = vst [vmem:[%s29_s1] sm:$0xff] %v4_v0  ;;  %8 = vst [vmem:[%s29_s1 + $0x8] sm:$0xff] %v4_v0 }

// kernel: tile.14
= control target key start
LH: loop header
LB: loop body
LE: loop exit
PB: predicated region body
PF: predicated region fallthrough
CT: control target
= control target key end

     0   :  { %s117_s10 = smov 78   ;;  %s118_s11 = smov 66   ;;  %vm3_vm0 = vcmask 48128   ;;  %vm9_vm1 = vcmask 687728   ;;  %vm15_vm2 = vcmask 638528   ;;  %vm21_vm3 = vcmask 589328   ;;  %s185_s0 = inlined_call_operand.vmem [shape: f32[14,6], index: 0, kind: input, shape index: {}]   ;;  %s186_s1 = inlined_call_operand.vmem [shape: f32[1,84], index: 1, kind: output, shape index: {}]  }
   0x1   :  { %v91_v0 = vld [vmem:[%s185_s0 + $0xd] sm:$0x1]   ;;  %v93_v1 = vld [vmem:[%s185_s0 + $0xb] sm:$0x1]   ;;  %v92_v2 = vld [vmem:[%s185_s0 + $0xc] sm:$0x1]  }
   0x2   :  { %7 = vrot.lane.b32.xlu0 %v91_v0, %s117_s10  ;;  %19 = vrot.lane.b32.xlu1 %v93_v1, %s118_s11  ;;  %v94_v3 = vld [vmem:[%s185_s0 + $0xa] sm:$0x1]   ;;  %s119_s16 = smov 72   ;;  %s120_s17 = smov 60   ;;  %v95_v4 = vld [vmem:[%s185_s0 + $0x9] sm:$0x1]  }
   0x3   :  { %v96_v5 = vld [vmem:[%s185_s0 + $0x8] sm:$0x1]   ;;  %v2_v6 = vld [vmem:[%s185_s0] sm:$0x1]   ;;  %s121_s24 = smov 54   ;;  %s122_s25 = smov 48  }
   0x4   :  { %4 = vst.msk [vmem:[#allocation0] sm:$0x1] %vm3_vm0, %v2_v6   ;;  %v97_v7 = vld [vmem:[%s185_s0 + $0x7] sm:$0x1]   ;;  %v98_v8 = vld [vmem:[%s185_s0 + $0x6] sm:$0x1]  }
   0x5   :  { %s123_s30 = smov 42   ;;  %s124_s2 = smov 36   ;;  %v99_v9 = vld [vmem:[%s185_s0 + $0x5] sm:$0x1]   ;;  %v100_v10 = vld [vmem:[%s185_s0 + $0x4] sm:$0x1]  }
   0x6   :  { %13 = vrot.lane.b32.xlu0 %v92_v2, %s119_s16  ;;  %25 = vrot.lane.b32.xlu1 %v94_v3, %s120_s17  ;;  %s125_s7 = smov 30   ;;  %s126_s8 = smov 24   ;;  %v101_v11 = vld [vmem:[%s185_s0 + $0x3] sm:$0x1]   ;;  %v102_v12 = vld [vmem:[%s185_s0 + $0x2] sm:$0x1]  }
   0x7   :  { %s127_s13 = smov 18   ;;  %s128_s14 = smov 12   ;;  %v103_v13 = vld [vmem:[%s185_s0 + $0x1] sm:$0x1]   ;;  %vm27_vm4 = vcmask 540128   ;;  %vm33_vm5 = vcmask 490928  }
   0x8   :  { %s129_s0 = smov 6   ;;  %vm39_vm6 = vcmask 441728   ;;  %vm45_vm7 = vcmask 392528   ;;  %vm51_vm8 = vcmask 343328   ;;  %vm57_vm9 = vcmask 294128  }
   0x9   :  { %vm63_vm10 = vcmask 244928   ;;  %vm69_vm11 = vcmask 195728   ;;  %vm75_vm12 = vcmask 146528   ;;  %vm81_vm13 = vcmask 97328  }
   0xa   :  { %31 = vrot.lane.b32.xlu0 %v95_v4, %s121_s24  ;;  %37 = vrot.lane.b32.xlu1 %v96_v5, %s122_s25 }
   0xe   :  { %43 = vrot.lane.b32.xlu0 %v97_v7, %s123_s30  ;;  %49 = vrot.lane.b32.xlu1 %v98_v8, %s124_s2 }
  0x12   :  { %55 = vrot.lane.b32.xlu0 %v99_v9, %s125_s7  ;;  %61 = vrot.lane.b32.xlu1 %v100_v10, %s126_s8 }
  0x16   :  { %67 = vrot.lane.b32.xlu0 %v101_v11, %s127_s13  ;;  %73 = vrot.lane.b32.xlu1 %v102_v12, %s128_s14 }
  0x1a   :  { %79 = vrot.lane.b32.xlu0 %v103_v13, %s129_s0 }
  0x74   :  { %v8_v14 = vpop.permute.xlu0 %7   ;;  %v20_v15 = vpop.permute.xlu1 %19  }
  0x75   :  { %10 = vst.msk [vmem:[#allocation0] sm:$0x1] %vm9_vm1, %v8_v14  }
  0x78   :  { %v14_v16 = vpop.permute.xlu0 %13   ;;  %v26_v17 = vpop.permute.xlu1 %25  }
  0x79   :  { %16 = vst.msk [vmem:[#allocation0] sm:$0x1] %vm15_vm2, %v14_v16  }
  0x7a   :  { %22 = vst.msk [vmem:[#allocation0] sm:$0x1] %vm21_vm3, %v20_v15  }
  0x7b   :  { %28 = vst.msk [vmem:[#allocation0] sm:$0x1] %vm27_vm4, %v26_v17  }
  0x7c   :  { %v32_v18 = vpop.permute.xlu0 %31   ;;  %v38_v19 = vpop.permute.xlu1 %37  }
  0x7d   :  { %34 = vst.msk [vmem:[#allocation0] sm:$0x1] %vm33_vm5, %v32_v18  }
  0x7e   :  { %40 = vst.msk [vmem:[#allocation0] sm:$0x1] %vm39_vm6, %v38_v19  }
  0x80   :  { %v44_v20 = vpop.permute.xlu0 %43   ;;  %v50_v21 = vpop.permute.xlu1 %49  }
  0x81   :  { %46 = vst.msk [vmem:[#allocation0] sm:$0x1] %vm45_vm7, %v44_v20  }
  0x82   :  { %52 = vst.msk [vmem:[#allocation0] sm:$0x1] %vm51_vm8, %v50_v21  }
  0x84   :  { %v56_v22 = vpop.permute.xlu0 %55   ;;  %v62_v23 = vpop.permute.xlu1 %61  }
  0x85   :  { %58 = vst.msk [vmem:[#allocation0] sm:$0x1] %vm57_vm9, %v56_v22  }
  0x86   :  { %64 = vst.msk [vmem:[#allocation0] sm:$0x1] %vm63_vm10, %v62_v23  }
  0x88   :  { %v68_v24 = vpop.permute.xlu0 %67   ;;  %v74_v25 = vpop.permute.xlu1 %73  }
  0x89   :  { %70 = vst.msk [vmem:[#allocation0] sm:$0x1] %vm69_vm11, %v68_v24  }
  0x8a   :  { %76 = vst.msk [vmem:[#allocation0] sm:$0x1] %vm75_vm12, %v74_v25  }
  0x8c   :  { %v80_v26 = vpop.permute.xlu0 %79  }
  0x8d   :  { %82 = vst.msk [vmem:[#allocation0] sm:$0x1] %vm81_vm13, %v80_v26  }
  0x94   :  { %v87_v27 = vld [vmem:[#allocation0] sm:$0x1] }
  0x95   :  { %90 = vst [vmem:[%s186_s1] sm:$0x1] %v87_v27 }

// kernel: tile.18
= control target key start
LH: loop header
LB: loop body
LE: loop exit
PB: predicated region body
PF: predicated region fallthrough
CT: control target
= control target key end

     0   :  { %s22_s0 = inlined_call_operand.vmem [shape: f32[16], index: 0, kind: input, shape index: {}]   ;;  %s23_s1 = inlined_call_operand.vmem [shape: f32[5,16], index: 1, kind: output, shape index: {}]  }
   0x1   :  { %v4_v0 = vld [vmem:[%s22_s0] ss:$0 sm:$0xff] }
   0x2   :  { %5 = vst [vmem:[%s23_s1] sm:$0xff] %v4_v0 }

// kernel: tile.19
= control target key start
LH: loop header
LB: loop body
LE: loop exit
PB: predicated region body
PF: predicated region fallthrough
CT: control target
= control target key end

     0   :  { %s45_s10 = smov 64   ;;  %s46_s11 = smov 32   ;;  %vm3_vm0 = vcmask 130048   ;;  %vm9_vm1 = vcmask 654848   ;;  %vm15_vm2 = vcmask 523648   ;;  %vm21_vm3 = vcmask 392448   ;;  %s77_s0 = inlined_call_operand.vmem [shape: f32[5,16], index: 0, kind: input, shape index: {}]   ;;  %s78_s1 = inlined_call_operand.vmem [shape: f32[1,80], index: 1, kind: output, shape index: {}]  }
   0x1   :  { %v37_v0 = vld [vmem:[%s77_s0 + $0x4] sm:$0x1]   ;;  %v39_v1 = vld [vmem:[%s77_s0 + $0x2] sm:$0x1]   ;;  %v38_v2 = vld [vmem:[%s77_s0 + $0x3] sm:$0x1]  }
   0x2   :  { %7 = vrot.lane.b32.xlu0 %v37_v0, %s45_s10  ;;  %19 = vrot.lane.b32.xlu1 %v39_v1, %s46_s11  ;;  %v40_v3 = vld [vmem:[%s77_s0 + $0x1] sm:$0x1]   ;;  %v2_v4 = vld [vmem:[%s77_s0] sm:$0x1]   ;;  %s47_s0 = smov 48   ;;  %s48_s18 = smov 16  }
   0x3   :  { %4 = vst.msk [vmem:[#allocation0] sm:$0x1] %vm3_vm0, %v2_v4   ;;  %vm27_vm4 = vcmask 261248  }
   0x6   :  { %13 = vrot.lane.b32.xlu0 %v38_v2, %s47_s0  ;;  %25 = vrot.lane.b32.xlu1 %v40_v3, %s48_s18 }
  0x74   :  { %v8_v5 = vpop.permute.xlu0 %7   ;;  %v20_v6 = vpop.permute.xlu1 %19  }
  0x75   :  { %10 = vst.msk [vmem:[#allocation0] sm:$0x1] %vm9_vm1, %v8_v5  }
  0x78   :  { %v14_v7 = vpop.permute.xlu0 %13   ;;  %v26_v8 = vpop.permute.xlu1 %25  }
  0x79   :  { %16 = vst.msk [vmem:[#allocation0] sm:$0x1] %vm15_vm2, %v14_v7  }
  0x7a   :  { %22 = vst.msk [vmem:[#allocation0] sm:$0x1] %vm21_vm3, %v20_v6  }
  0x7b   :  { %28 = vst.msk [vmem:[#allocation0] sm:$0x1] %vm27_vm4, %v26_v8  }
  0x82   :  { %v33_v9 = vld [vmem:[#allocation0] sm:$0x1] }
  0x83   :  { %36 = vst [vmem:[%s78_s1] sm:$0x1] %v33_v9 }

// kernel: cifar_net_forward.1
= control target key start
LH: loop header
LB: loop body
LE: loop exit
PB: predicated region body
PF: predicated region fallthrough
CT: control target
= control target key end

     0   :  { %vm487_vm0 = vcmask 785408   ;;  %s5237_s13 = smov 44   ;;  %vm1759_vm1 = vcmask 1041408   ;;  %vm684_vm2 = vcmask 359424   ;;  %vm1746_vm3 = vcmask 687104   ;;  %s7743_s2 = inlined_call_operand.vmem [shape: bf16[480,168], index: 2, kind: input, shape index: {}]   ;;  %s7744_s0 = inlined_call_operand.vmem [shape: bf16[4,56,480], index: 0, kind: input, shape index: {}]   ;;  %s7745_s4 = inlined_call_operand.vmem [shape: bf16[5,84,160], index: 4, kind: input, shape index: {}]   ;;  %s7746_s3 = inlined_call_operand.vmem [shape: f32[1,84], index: 3, kind: input, shape index: {}]   ;;  %s7747_s6 = inlined_call_operand.vmem [shape: f32[5,80,120], index: 6, kind: input, shape index: {}]   ;;  %s7748_s5 = inlined_call_operand.vmem [shape: f32[1,80], index: 5, kind: input, shape index: {}]   ;;  %s7749_s8 = inlined_call_operand.vmem [shape: f32[120,84], index: 8, kind: input, shape index: {}]   ;;  %s7750_s7 = inlined_call_operand.vmem [shape: f32[1,120], index: 7, kind: input, shape index: {}]   ;;  %s7751_s1 = inlined_call_operand.vmem [shape: f32[8,50], index: 1, kind: input, shape index: {}]   ;;  %s7752_s10 = inlined_call_operand.vmem [shape: f32[84,128], index: 10, kind: input, shape index: {}]   ;;  %s7753_s9 = inlined_call_operand.vmem [shape: f32[1,84], index: 9, kind: input, shape index: {}]   ;;  %s7754_s11 = inlined_call_operand.vmem [shape: f32[1,128], index: 11, kind: input, shape index: {}]   ;;  %s7755_s12 = inlined_call_operand.vmem [shape: f32[8,128], index: 12, kind: output, shape index: {}]  }
   0x1   :  { %v5310_v0 = vld [vmem:[%s7743_s2 + $0x74] ss:$8 sps:$4 sm:$0xff]   ;;  %v5321_v2 = vld [vmem:[%s7743_s2 + $0x70] ss:$8 sps:$4 sm:$0xff]   ;;  %v5332_v4 = vld [vmem:[%s7743_s2 + $0x64] ss:$8 sps:$4 sm:$0xff]  }
   0x2   :  { %v5315_v1 = vld [vmem:[%s7743_s2 + $0x174] ss:$8 sps:$4 sm:$0xff]   ;;  %500 = vmatprep.subr.bf16.mxu0 %v5310_v0  ;;  %v5326_v3 = vld [vmem:[%s7743_s2 + $0x170] ss:$8 sps:$4 sm:$0xff]   ;;  %7781 = vst [vmem:[#allocation2_spill] sm:$0xff] %v5332_v4  ;;  %vm2392_vm4 = vcmask 1046528  }
   0x3   :  { %571 = vmatprep.subr.bf16.mxu1 %v5315_v1  ;;  %501 = vmatpush1.bf16.msra.mxu0 %v5321_v2  ;;  %v5339_v5 = vld [vmem:[%s7743_s2 + $0x164] ss:$8 sps:$4 sm:$0xff]   ;;  %v5344_v6 = vld [vmem:[%s7743_s2 + $0x60] ss:$8 sps:$4 sm:$0xff]   ;;  %v5356_v8 = vld [vmem:[%s7743_s2 + $0x54] ss:$8 sps:$4 sm:$0xff]  }
   0x4   :  { %572 = vmatpush1.bf16.msra.mxu1 %v5326_v3  ;;  %502 = vmatprep.subr.bf16.mxu0 %v5332_v4  ;;  %v5350_v7 = vld [vmem:[%s7743_s2 + $0x160] ss:$8 sps:$4 sm:$0xff]   ;;  %v5361_v9 = vld [vmem:[%s7743_s2 + $0x154] ss:$8 sps:$4 sm:$0xff]   ;;  %v5366_v10 = vld [vmem:[%s7743_s2 + $0x50] ss:$8 sps:$4 sm:$0xff]  }
   0x5   :  { %573 = vmatprep.subr.bf16.mxu1 %v5339_v5  ;;  %7782 = vst [vmem:[#allocation3_spill] sm:$0xff] %v5361_v9  ;;  %v5371_v11 = vld [vmem:[%s7743_s2 + $0x150] ss:$8 sps:$4 sm:$0xff]   ;;  %v5378_v12 = vld [vmem:[%s7743_s2 + $0x44] ss:$8 sps:$4 sm:$0xff]   ;;  %vm5241_vm6 = vmmov 0  }
   0x6   :  { %7783 = vst [vmem:[#allocation4_spill] sm:$0xff] %v5371_v11  ;;  %v5385_v13 = vld [vmem:[%s7743_s2 + $0x144] ss:$8 sps:$4 sm:$0xff]   ;;  %v5390_v14 = vld [vmem:[%s7743_s2 + $0x40] ss:$8 sps:$4 sm:$0xff]   ;;  %vm3020_vm7 = vcmask 392192  }
   0x7   :  { %503 = vmatpush1.bf16.msra.mxu0 %v5344_v6  ;;  %7784 = vst [vmem:[#allocation5_spill] sm:$0xff] %v5385_v13  ;;  %v5397_v15 = vld [vmem:[%s7743_s2 + $0x140] ss:$8 sps:$4 sm:$0xff]   ;;  %v5402_v16 = vld [vmem:[%s7743_s2 + $0x34] ss:$8 sps:$4 sm:$0xff]   ;;  %vm3175_vm8 = vcmask 654336  }
   0x8   :  { %574 = vmatpush1.bf16.msra.mxu1 %v5350_v7  ;;  %504 = vmatprep.subr.bf16.mxu0 %v5356_v8  ;;  %7785 = vst [vmem:[#allocation6_spill] sm:$0xff] %v5397_v15  ;;  %7786 = vst [vmem:[#allocation7_spill] sm:$0xff] %v5402_v16  ;;  %v5409_v17 = vld [vmem:[%s7743_s2 + $0x134] ss:$8 sps:$4 sm:$0xff]   ;;  %v5414_v18 = vld [vmem:[%s7743_s2 + $0x30] ss:$8 sps:$4 sm:$0xff]  }
   0x9   :  { %575 = vmatprep.subr.bf16.mxu1 %v5361_v9  ;;  %v5419_v19 = vld [vmem:[%s7743_s2 + $0x130] ss:$8 sps:$4 sm:$0xff]   ;;  %v5426_v20 = vld [vmem:[%s7743_s2 + $0x24] ss:$8 sps:$4 sm:$0xff]   ;;  %v5438_v22 = vld [vmem:[%s7743_s2 + $0x20] ss:$8 sps:$4 sm:$0xff]  }
   0xa   :  { %v5433_v21 = vld [vmem:[%s7743_s2 + $0x124] ss:$8 sps:$4 sm:$0xff]   ;;  %v5445_v23 = vld [vmem:[%s7743_s2 + $0x120] ss:$8 sps:$4 sm:$0xff]   ;;  %v5450_v24 = vld [vmem:[%s7743_s2 + $0x14] ss:$8 sps:$4 sm:$0xff]  }
   0xb   :  { %505 = vmatpush1.bf16.msra.mxu0 %v5366_v10  ;;  %v5457_v25 = vld [vmem:[%s7743_s2 + $0x114] ss:$8 sps:$4 sm:$0xff]   ;;  %v5462_v26 = vld [vmem:[%s7743_s2 + $0x10] ss:$8 sps:$4 sm:$0xff]   ;;  %v5474_v28 = vld [vmem:[%s7743_s2 + $0x4] ss:$8 sps:$4 sm:$0xff]  }
   0xc   :  { %576 = vmatpush1.bf16.msra.mxu1 %v5371_v11  ;;  %506 = vmatprep.subr.bf16.mxu0 %v5378_v12  ;;  %v5467_v27 = vld [vmem:[%s7743_s2 + $0x110] ss:$8 sps:$4 sm:$0xff]   ;;  %v5481_v29 = vld [vmem:[%s7743_s2 + $0x104] ss:$8 sps:$4 sm:$0xff]   ;;  %v5486_v30 = vld [vmem:[%s7743_s2] ss:$8 sps:$4 sm:$0xff]  }
   0xd   :  { %577 = vmatprep.subr.bf16.mxu1 %v5385_v13  ;;  %v5493_v31 = vld [vmem:[%s7743_s2 + $0x100] ss:$8 sps:$4 sm:$0xff]   ;;  %v5498_v32 = vld [vmem:[%s7743_s2 + $0xf4] ss:$8 sps:$4 sm:$0xff]   ;;  %v5510_v34 = vld [vmem:[%s7743_s2 + $0xf0] ss:$8 sps:$4 sm:$0xff]  }
   0xe   :  { %v5505_v33 = vld [vmem:[%s7743_s2 + $0x1d4] ss:$8 sps:$4 sm:$0xff]   ;;  %v5515_v35 = vld [vmem:[%s7743_s2 + $0x1d0] ss:$8 sps:$4 sm:$0xff]   ;;  %v5522_v36 = vld [vmem:[%s7743_s2 + $0xe4] ss:$8 sps:$4 sm:$0xff]  }
   0xf   :  { %507 = vmatpush1.bf16.msra.mxu0 %v5390_v14  ;;  %v5529_v37 = vld [vmem:[%s7743_s2 + $0x1c4] ss:$8 sps:$4 sm:$0xff]   ;;  %v5534_v38 = vld [vmem:[%s7743_s2 + $0xe0] ss:$8 sps:$4 sm:$0xff]   ;;  %v5546_v40 = vld [vmem:[%s7743_s2 + $0xd4] ss:$8 sps:$4 sm:$0xff]  }
  0x10   :  { %578 = vmatpush1.bf16.msra.mxu1 %v5397_v15  ;;  %508 = vmatprep.subr.bf16.mxu0 %v5402_v16  ;;  %v5541_v39 = vld [vmem:[%s7743_s2 + $0x1c0] ss:$8 sps:$4 sm:$0xff]   ;;  %v5553_v41 = vld [vmem:[%s7743_s2 + $0x1b4] ss:$8 sps:$4 sm:$0xff]   ;;  %v5561_v43 = vld [vmem:[%s7743_s2 + $0xd0] ss:$8 sps:$4 sm:$0xff]  }
  0x11   :  { %579 = vmatprep.subr.bf16.mxu1 %v5409_v17  ;;  %v5050_v42 = vld [vmem:[%s7744_s0 + $0xc] ss:$16 sps:$4 sm:$0xff]   ;;  %v5566_v44 = vld [vmem:[%s7743_s2 + $0x1b0] ss:$8 sps:$4 sm:$0xff]   ;;  %v5059_v47 = vld [vmem:[%s7744_s0 + $0x4] ss:$16 sps:$4 sm:$0xff]  }
  0x12   :  { %v5573_v45 = vld [vmem:[%s7743_s2 + $0xc4] ss:$8 sps:$4 sm:$0xff]   ;;  %4213 = vmatprep.mubr.msk.bf16.mxu1 %vm487_vm0, %v5050_v42  ;;  %v5589_v48 = vld [vmem:[%s7743_s2 + $0xc0] ss:$8 sps:$4 sm:$0xff]   ;;  %v5601_v50 = vld [vmem:[%s7743_s2 + $0xb4] ss:$8 sps:$4 sm:$0xff]   ;;  %532 = vmatprep.mubr.bf16.mxu0 %v5059_v47 }
  0x13   :  { %509 = vmatpush1.bf16.msra.mxu0 %v5414_v18  ;;  %v5580_v46 = vld [vmem:[%s7743_s2 + $0x1a4] ss:$8 sps:$4 sm:$0xff]   ;;  %v5596_v49 = vld [vmem:[%s7743_s2 + $0x1a0] ss:$8 sps:$4 sm:$0xff]   ;;  %v5608_v51 = vld [vmem:[%s7743_s2 + $0x194] ss:$8 sps:$4 sm:$0xff]  }
  0x14   :  { %580 = vmatpush1.bf16.msra.mxu1 %v5419_v19  ;;  %510 = vmatprep.subr.bf16.mxu0 %v5426_v20  ;;  %v5615_v52 = vld [vmem:[%s7743_s2 + $0xb0] ss:$8 sps:$4 sm:$0xff]   ;;  %v5627_v54 = vld [vmem:[%s7743_s2 + $0xa4] ss:$8 sps:$4 sm:$0xff]   ;;  %v5637_v56 = vld [vmem:[%s7743_s2 + $0xa0] ss:$8 sps:$4 sm:$0xff]  }
  0x15   :  { %581 = vmatprep.subr.bf16.mxu1 %v5433_v21  ;;  %v5620_v53 = vld [vmem:[%s7743_s2 + $0x190] ss:$8 sps:$4 sm:$0xff]   ;;  %v5632_v55 = vld [vmem:[%s7743_s2 + $0x184] ss:$8 sps:$4 sm:$0xff]   ;;  %v5644_v57 = vld [vmem:[%s7743_s2 + $0x180] ss:$8 sps:$4 sm:$0xff]  }
  0x16   :  { %v5651_v58 = vld [vmem:[%s7743_s2 + $0x94] ss:$8 sps:$4 sm:$0xff]   ;;  %v5048_v59 = vld [vmem:[%s7744_s0 + $0x8] ss:$16 sps:$4 sm:$0xff]   ;;  %v5668_v61 = vld [vmem:[%s7743_s2 + $0x84] ss:$8 sps:$4 sm:$0xff]  }
  0x17   :  { %511 = vmatpush1.bf16.msra.mxu0 %v5438_v22  ;;  %v5661_v60 = vld [vmem:[%s7743_s2 + $0x90] ss:$8 sps:$4 sm:$0xff]   ;;  %v5062_v62 = vld [vmem:[%s7744_s0 + $0x2c] ss:$16 sps:$4 sm:$0xff]   ;;  %v5676_v63 = vld [vmem:[%s7743_s2 + $0x80] ss:$8 sps:$4 sm:$0xff]  }
  0x18   :  { %582 = vmatpush1.bf16.msra.mxu1 %v5445_v23  ;;  %512 = vmatprep.subr.bf16.mxu0 %v5450_v24  ;;  %v5057_v42 = vld [vmem:[%s7744_s0] ss:$16 sps:$4 sm:$0xff]   ;;  %v5065_v47 = vld [vmem:[%s7744_s0 + $0x28] ss:$16 sps:$4 sm:$0xff]   ;;  %vm1993_vm5 = vsmask.f32 7424 }
  0x19   :  { %583 = vmatprep.subr.bf16.mxu1 %v5457_v25  ;;  %vm3561_vm9 = vcmask 1044480   ;;  %vm3415_vm10 = vcmask 1045504   ;;  %vm3707_vm11 = vcmask 1043456   ;;  %vm3864_vm12 = vcmask 408576  }
  0x1a   :  { %vm3963_vm13 = vcmask 982016  }
  0x1b   :  { %513 = vmatpush1.bf16.msra.mxu0 %v5462_v26 }
  0x1c   :  { %584 = vmatpush1.bf16.msra.mxu1 %v5467_v27  ;;  %514 = vmatprep.subr.bf16.mxu0 %v5474_v28 }
  0x1d   :  { %585 = vmatprep.subr.bf16.mxu1 %v5481_v29 }
  0x1f   :  { %515 = vmatpush1.bf16.msra.mxu0 %v5486_v30 }
  0x20   :  { %586 = vmatpush1.bf16.msra.mxu1 %v5493_v31  ;;  %516 = vmatprep.subr.bf16.mxu0 %v5498_v32 }
  0x21   :  { %591 = vmatprep.subr.bf16.mxu1 %v5505_v33 }
  0x23   :  { %517 = vmatpush2.bf16.msra.mxu0 %v5510_v34 }
  0x24   :  { %592 = vmatpush2.bf16.msra.mxu1 %v5515_v35  ;;  %518 = vmatprep.subr.bf16.mxu0 %v5522_v36 }
  0x25   :  { %593 = vmatprep.subr.bf16.mxu1 %v5529_v37 }
  0x27   :  { %519 = vmatpush2.bf16.msra.mxu0 %v5534_v38 }
  0x28   :  { %594 = vmatpush2.bf16.msra.mxu1 %v5541_v39  ;;  %520 = vmatprep.subr.bf16.mxu0 %v5546_v40 }
  0x29   :  { %595 = vmatprep.subr.bf16.mxu1 %v5553_v41 }
  0x2b   :  { %521 = vmatpush2.bf16.msra.mxu0 %v5561_v43 }
  0x2c   :  { %596 = vmatpush2.bf16.msra.mxu1 %v5566_v44  ;;  %522 = vmatprep.subr.bf16.mxu0 %v5573_v45 }
  0x2d   :  { %597 = vmatprep.subr.bf16.mxu1 %v5580_v46 }
  0x2f   :  { %523 = vmatpush2.bf16.msra.mxu0 %v5589_v48 }
  0x30   :  { %598 = vmatpush2.bf16.msra.mxu1 %v5596_v49  ;;  %524 = vmatprep.subr.bf16.mxu0 %v5601_v50 }
  0x31   :  { %599 = vmatprep.subr.bf16.mxu1 %v5608_v51 }
  0x33   :  { %525 = vmatpush2.bf16.msra.mxu0 %v5615_v52 }
  0x34   :  { %600 = vmatpush2.bf16.msra.mxu1 %v5620_v53  ;;  %526 = vmatprep.subr.bf16.mxu0 %v5627_v54 }
  0x35   :  { %601 = vmatprep.subr.bf16.mxu1 %v5632_v55 }
  0x37   :  { %527 = vmatpush2.bf16.msra.mxu0 %v5637_v56 }
  0x38   :  { %602 = vmatpush2.bf16.msra.mxu1 %v5644_v57  ;;  %528 = vmatprep.subr.bf16.mxu0 %v5651_v58 }
  0x39   :  { %803 = vmatprep.subr.bf16.mxu1 %v5310_v0 }
  0x3b   :  { %604 = vmatmul.mubr.bf16.vlgmr.msra.gmra.mxu1 %v5048_v59  ;;  %529 = vmatpush2.bf16.msra.mxu0 %v5661_v60  ;;  %v5060_v59 = vld [vmem:[%s7744_s0 + $0x24] ss:$16 sps:$4 sm:$0xff]  }
  0x3c   :  { %804 = vmatpush1.bf16.msra.mxu1 %v5321_v2  ;;  %530 = vmatprep.subr.bf16.mxu0 %v5668_v61 }
  0x3d   :  { %805 = vmatprep.subr.bf16.mxu1 %v5332_v4  ;;  %4214 = vmatprep.mubr.msk.bf16.mxu1 %vm487_vm0, %v5062_v62  ;;  %v5068_v4 = vld [vmem:[%s7744_s0 + $0x4c] ss:$16 sps:$4 sm:$0xff]   ;;  %v5064_v62 = vld [vmem:[%s7744_s0 + $0x20] ss:$16 sps:$4 sm:$0xff]  }
  0x3f   :  { %531 = vmatpush2.bf16.msra.mxu0 %v5676_v63 }
  0x40   :  { %806 = vmatpush1.bf16.msra.mxu1 %v5344_v6  ;;  %874 = vmatprep.subr.bf16.mxu0 %v5315_v1 }
  0x41   :  { %807 = vmatprep.subr.bf16.mxu1 %v5356_v8 }
  0x42   :  { %533 = vmatmul.mubr.bf16.vlgmr.msra.gmra.mxu0 %v5057_v42  ;;  %v5071_v42 = vld [vmem:[%s7744_s0 + $0x48] ss:$16 sps:$4 sm:$0xff]  }
  0x43   :  { %614 = vmatmul.mubr.bf16.gmra.mxu1 %v5065_v47  ;;  %875 = vmatpush1.bf16.msra.mxu0 %v5326_v3  ;;  %v116_v47 = vld [vmem:[%s7744_s0 + $0x68] sm:$0xff] }
  0x44   :  { %808 = vmatpush1.bf16.msra.mxu1 %v5366_v10  ;;  %876 = vmatprep.subr.bf16.mxu0 %v5339_v5 }
  0x45   :  { %809 = vmatprep.subr.bf16.mxu1 %v5378_v12  ;;  %542 = vmatprep.mubr.bf16.mxu0 %v5060_v59  ;;  %v4152_v59 = vcombine.high %v116_v47, %v116_v47 }
  0x46   :  { %4215 = vmatprep.mubr.msk.bf16.mxu1 %vm487_vm0, %v5068_v4  ;;  %v5066_v4 = vld [vmem:[%s7744_s0 + $0x44] ss:$16 sps:$4 sm:$0xff]  }
  0x47   :  { %877 = vmatpush1.bf16.msra.mxu0 %v5350_v7 }
  0x48   :  { %810 = vmatpush1.bf16.msra.mxu1 %v5390_v14  ;;  %878 = vmatprep.subr.bf16.mxu0 %v5361_v9 }
  0x49   :  { %811 = vmatprep.subr.bf16.mxu1 %v5402_v16  ;;  %v5070_v16 = vld [vmem:[%s7744_s0 + $0x40] ss:$16 sps:$4 sm:$0xff]  }
  0x4a   :  { %543 = vmatmul.mubr.bf16.gmra.mxu0 %v5064_v62  ;;  %v115_v62 = vld [vmem:[%s7744_s0 + $0x60] sm:$0xff] }
  0x4b   :  { %624 = vmatmul.mubr.bf16.gmra.mxu1 %v5071_v42  ;;  %879 = vmatpush1.bf16.msra.mxu0 %v5371_v11  ;;  %v4151_v42 = vcombine.low %v116_v47, %v116_v47  ;;  %v4149_v47 = vcombine.low %v115_v62, %v115_v62 }
  0x4c   :  { %812 = vmatpush1.bf16.msra.mxu1 %v5414_v18  ;;  %880 = vmatprep.subr.bf16.mxu0 %v5385_v13 }
  0x4d   :  { %813 = vmatprep.subr.bf16.mxu1 %v5426_v20  ;;  %552 = vmatprep.mubr.bf16.mxu0 %v5066_v4  ;;  %v4150_v4 = vcombine.high %v115_v62, %v115_v62  ;;  %v5076_v62 = vld [vmem:[%s7744_s0 + $0x70] ss:$16 sps:$4 sm:$0xff]  }
  0x4e   :  { %4216 = vmatprep.mubr.msk.bf16.mxu1 %vm487_vm0, %v4152_v59  ;;  %v5078_v59 = vld [vmem:[%s7744_s0 + $0x74] ss:$16 sps:$4 sm:$0xff]  }
  0x4f   :  { %881 = vmatpush1.bf16.msra.mxu0 %v5397_v15 }
  0x50   :  { %814 = vmatpush1.bf16.msra.mxu1 %v5438_v22  ;;  %882 = vmatprep.subr.bf16.mxu0 %v5409_v17 }
  0x51   :  { %815 = vmatprep.subr.bf16.mxu1 %v5450_v24 }
  0x52   :  { %553 = vmatmul.mubr.bf16.gmra.mxu0 %v5070_v16  ;;  %v5081_v16 = vld [vmem:[%s7744_s0 + $0x7c] ss:$16 sps:$4 sm:$0xff]  }
  0x53   :  { %634 = vmatmul.mubr.bf16.gmra.mxu1 %v4151_v42  ;;  %883 = vmatpush1.bf16.msra.mxu0 %v5419_v19  ;;  %v5079_v42 = vld [vmem:[%s7744_s0 + $0x78] ss:$16 sps:$4 sm:$0xff]  }
  0x54   :  { %816 = vmatpush1.bf16.msra.mxu1 %v5462_v26  ;;  %884 = vmatprep.subr.bf16.mxu0 %v5433_v21 }
  0x55   :  { %817 = vmatprep.subr.bf16.mxu1 %v5474_v28  ;;  %562 = vmatprep.mubr.bf16.mxu0 %v4150_v4  ;;  %v5082_v4 = vld [vmem:[%s7744_s0 + $0x94] ss:$16 sps:$4 sm:$0xff]  }
  0x56   :  { %835 = vmatprep.mubr.bf16.mxu1 %v5078_v59  ;;  %v5084_v59 = vld [vmem:[%s7744_s0 + $0x9c] ss:$16 sps:$4 sm:$0xff]  }
  0x57   :  { %885 = vmatpush1.bf16.msra.mxu0 %v5445_v23 }
  0x58   :  { %818 = vmatpush1.bf16.msra.mxu1 %v5486_v30  ;;  %886 = vmatprep.subr.bf16.mxu0 %v5457_v25 }
  0x59   :  { %819 = vmatprep.subr.bf16.mxu1 %v5498_v32 }
  0x5a   :  { %563 = vmatmul.mubr.bf16.gmra.mxu0 %v4149_v47  ;;  %v7787_v47 = vld [vmem:[#allocation2_spill] sm:$0xff] }
  0x5b   :  { %887 = vmatpush1.bf16.msra.mxu0 %v5467_v27  ;;  %4247 = vmatprep.mubr.msk.bf16.mxu0 %vm487_vm0, %v5081_v16  ;;  %v5086_v16 = vld [vmem:[%s7744_s0 + $0x90] ss:$16 sps:$4 sm:$0xff]  }
  0x5c   :  { %820 = vmatpush2.bf16.msra.mxu1 %v5510_v34  ;;  %888 = vmatprep.subr.bf16.mxu0 %v5481_v29 }
  0x5d   :  { %821 = vmatprep.subr.bf16.mxu1 %v5522_v36 }
  0x5f   :  { %889 = vmatpush1.bf16.msra.mxu0 %v5493_v31 }
  0x60   :  { %822 = vmatpush2.bf16.msra.mxu1 %v5534_v38  ;;  %894 = vmatprep.subr.bf16.mxu0 %v5505_v33 }
  0x61   :  { %823 = vmatprep.subr.bf16.mxu1 %v5546_v40 }
  0x63   :  { %895 = vmatpush2.bf16.msra.mxu0 %v5515_v35 }
  0x64   :  { %824 = vmatpush2.bf16.msra.mxu1 %v5561_v43  ;;  %896 = vmatprep.subr.bf16.mxu0 %v5529_v37 }
  0x65   :  { %825 = vmatprep.subr.bf16.mxu1 %v5573_v45 }
  0x67   :  { %897 = vmatpush2.bf16.msra.mxu0 %v5541_v39 }
  0x68   :  { %826 = vmatpush2.bf16.msra.mxu1 %v5589_v48  ;;  %898 = vmatprep.subr.bf16.mxu0 %v5553_v41 }
  0x69   :  { %827 = vmatprep.subr.bf16.mxu1 %v5601_v50 }
  0x6b   :  { %899 = vmatpush2.bf16.msra.mxu0 %v5566_v44 }
  0x6c   :  { %828 = vmatpush2.bf16.msra.mxu1 %v5615_v52  ;;  %900 = vmatprep.subr.bf16.mxu0 %v5580_v46 }
  0x6d   :  { %829 = vmatprep.subr.bf16.mxu1 %v5627_v54 }
  0x6f   :  { %901 = vmatpush2.bf16.msra.mxu0 %v5596_v49 }
  0x70   :  { %830 = vmatpush2.bf16.msra.mxu1 %v5637_v56  ;;  %902 = vmatprep.subr.bf16.mxu0 %v5608_v51 }
  0x71   :  { %831 = vmatprep.subr.bf16.mxu1 %v5651_v58 }
  0x73   :  { %903 = vmatpush2.bf16.msra.mxu0 %v5620_v53 }
  0x74   :  { %832 = vmatpush2.bf16.msra.mxu1 %v5661_v60  ;;  %904 = vmatprep.subr.bf16.mxu0 %v5632_v55 }
  0x75   :  { %833 = vmatprep.subr.bf16.mxu1 %v5668_v61 }
  0x77   :  { %905 = vmatpush2.bf16.msra.mxu0 %v5644_v57 }
  0x78   :  { %834 = vmatpush2.bf16.msra.mxu1 %v5676_v63  ;;  %1112 = vmatprep.subr.bf16.mxu0 %v5310_v0 }
  0x79   :  { %1183 = vmatprep.subr.bf16.mxu1 %v5315_v1 }
  0x7a   :  { %907 = vmatmul.mubr.bf16.vlgmr.msra.gmra.mxu0 %v5079_v42  ;;  %v5088_v42 = vld [vmem:[%s7744_s0 + $0xb4] ss:$16 sps:$4 sm:$0xff]  }
  0x7b   :  { %836 = vmatmul.mubr.bf16.vlgmr.msra.gmra.mxu1 %v5076_v62  ;;  %1113 = vmatpush1.bf16.msra.mxu0 %v5321_v2  ;;  %v5087_v62 = vld [vmem:[%s7744_s0 + $0x98] ss:$16 sps:$4 sm:$0xff]  }
  0x7c   :  { %1184 = vmatpush1.bf16.msra.mxu1 %v5326_v3  ;;  %1114 = vmatprep.subr.bf16.mxu0 %v7787_v47 }
  0x7d   :  { %1185 = vmatprep.subr.bf16.mxu1 %v5339_v5  ;;  %845 = vmatprep.mubr.bf16.mxu1 %v5082_v4  ;;  %v5090_v4 = vld [vmem:[%s7744_s0 + $0xbc] ss:$16 sps:$4 sm:$0xff]  }
  0x7e   :  { %4248 = vmatprep.mubr.msk.bf16.mxu0 %vm487_vm0, %v5084_v59  ;;  %v5092_v59 = vld [vmem:[%s7744_s0 + $0xb0] ss:$16 sps:$4 sm:$0xff]  }
  0x7f   :  { %1115 = vmatpush1.bf16.msra.mxu0 %v5344_v6 }
  0x80   :  { %1186 = vmatpush1.bf16.msra.mxu1 %v5350_v7  ;;  %1116 = vmatprep.subr.bf16.mxu0 %v5356_v8 }
  0x81   :  { %1187 = vmatprep.subr.bf16.mxu1 %v5361_v9 }
  0x82   :  { %917 = vmatmul.mubr.bf16.gmra.mxu0 %v5087_v62  ;;  %v4229_v62 = vld [vmem:[%s7744_s0 + $0xd0] sm:$0xff] }
  0x83   :  { %846 = vmatmul.mubr.bf16.gmra.mxu1 %v5086_v16  ;;  %1117 = vmatpush1.bf16.msra.mxu0 %v5366_v10  ;;  %v5093_v16 = vld [vmem:[%s7744_s0 + $0xb8] ss:$16 sps:$4 sm:$0xff]  }
  0x84   :  { %1188 = vmatpush1.bf16.msra.mxu1 %v5371_v11  ;;  %1118 = vmatprep.subr.bf16.mxu0 %v5378_v12  ;;  %v4230_v11 = vld [vmem:[%s7744_s0 + $0xd8] sm:$0xff] }
  0x85   :  { %1189 = vmatprep.subr.bf16.mxu1 %v5385_v13  ;;  %855 = vmatprep.mubr.bf16.mxu1 %v5088_v42  ;;  %v7788_v42 = vld [vmem:[#allocation7_spill] sm:$0xff]  ;;  %v4246_v13 = vcombine.high %v4230_v11, %v4230_v11  ;;  %v4245_v9 = vcombine.low %v4230_v11, %v4230_v11 }
  0x86   :  { %4249 = vmatprep.mubr.msk.bf16.mxu0 %vm487_vm0, %v5090_v4  ;;  %v4244_v4 = vcombine.high %v4229_v62, %v4229_v62  ;;  %v5106_v11 = vld [vmem:[%s7744_s0 + $0x10c] ss:$16 sps:$4 sm:$0xff]  }
  0x87   :  { %1119 = vmatpush1.bf16.msra.mxu0 %v5390_v14 }
  0x88   :  { %1190 = vmatpush1.bf16.msra.mxu1 %v5397_v15  ;;  %1120 = vmatprep.subr.bf16.mxu0 %v7788_v42  ;;  %v4243_v15 = vcombine.low %v4229_v62, %v4229_v62 }
  0x89   :  { %1191 = vmatprep.subr.bf16.mxu1 %v5409_v17 }
  0x8a   :  { %927 = vmatmul.mubr.bf16.gmra.mxu0 %v5093_v16  ;;  %v5103_v16 = vld [vmem:[%s7744_s0 + $0xe4] ss:$16 sps:$4 sm:$0xff]  }
  0x8b   :  { %856 = vmatmul.mubr.bf16.gmra.mxu1 %v5092_v59  ;;  %1121 = vmatpush1.bf16.msra.mxu0 %v5414_v18  ;;  %v5100_v59 = vld [vmem:[%s7744_s0 + $0xec] ss:$16 sps:$4 sm:$0xff]  }
  0x8c   :  { %1192 = vmatpush1.bf16.msra.mxu1 %v5419_v19  ;;  %1122 = vmatprep.subr.bf16.mxu0 %v5426_v20 }
  0x8d   :  { %1193 = vmatprep.subr.bf16.mxu1 %v5433_v21  ;;  %865 = vmatprep.mubr.bf16.mxu1 %v4244_v4 }
  0x8e   :  { %4250 = vmatprep.mubr.msk.bf16.mxu0 %vm487_vm0, %v4246_v13  ;;  %v5101_v13 = vld [vmem:[%s7744_s0 + $0xe0] ss:$16 sps:$4 sm:$0xff]  }
  0x8f   :  { %1123 = vmatpush1.bf16.msra.mxu0 %v5438_v22 }
  0x90   :  { %1194 = vmatpush1.bf16.msra.mxu1 %v5445_v23  ;;  %1124 = vmatprep.subr.bf16.mxu0 %v5450_v24 }
  0x91   :  { %1195 = vmatprep.subr.bf16.mxu1 %v5457_v25 }
  0x92   :  { %937 = vmatmul.mubr.bf16.gmra.mxu0 %v4245_v9  ;;  %v5098_v9 = vld [vmem:[%s7744_s0 + $0xe8] ss:$16 sps:$4 sm:$0xff]  }
  0x93   :  { %866 = vmatmul.mubr.bf16.gmra.mxu1 %v4243_v15  ;;  %1125 = vmatpush1.bf16.msra.mxu0 %v5462_v26  ;;  %v5112_v15 = vld [vmem:[%s7744_s0 + $0x12c] ss:$16 sps:$4 sm:$0xff]  }
  0x94   :  { %1196 = vmatpush1.bf16.msra.mxu1 %v5467_v27  ;;  %1126 = vmatprep.subr.bf16.mxu0 %v5474_v28 }
  0x95   :  { %1197 = vmatprep.subr.bf16.mxu1 %v5481_v29  ;;  %4281 = vmatprep.mubr.msk.bf16.mxu1 %vm487_vm0, %v5100_v59 }
  0x96   :  { %1144 = vmatprep.mubr.bf16.mxu0 %v5103_v16 }
  0x97   :  { %1127 = vmatpush1.bf16.msra.mxu0 %v5486_v30 }
  0x98   :  { %1198 = vmatpush1.bf16.msra.mxu1 %v5493_v31  ;;  %1128 = vmatprep.subr.bf16.mxu0 %v5498_v32 }
  0x99   :  { %1203 = vmatprep.subr.bf16.mxu1 %v5505_v33 }
  0x9b   :  { %1129 = vmatpush2.bf16.msra.mxu0 %v5510_v34 }
  0x9c   :  { %1204 = vmatpush2.bf16.msra.mxu1 %v5515_v35  ;;  %1130 = vmatprep.subr.bf16.mxu0 %v5522_v36 }
  0x9d   :  { %1205 = vmatprep.subr.bf16.mxu1 %v5529_v37 }
  0x9f   :  { %1131 = vmatpush2.bf16.msra.mxu0 %v5534_v38 }
  0xa0   :  { %1206 = vmatpush2.bf16.msra.mxu1 %v5541_v39  ;;  %1132 = vmatprep.subr.bf16.mxu0 %v5546_v40 }
  0xa1   :  { %1207 = vmatprep.subr.bf16.mxu1 %v5553_v41 }
  0xa3   :  { %1133 = vmatpush2.bf16.msra.mxu0 %v5561_v43 }
  0xa4   :  { %1208 = vmatpush2.bf16.msra.mxu1 %v5566_v44  ;;  %1134 = vmatprep.subr.bf16.mxu0 %v5573_v45 }
  0xa5   :  { %1209 = vmatprep.subr.bf16.mxu1 %v5580_v46 }
  0xa7   :  { %1135 = vmatpush2.bf16.msra.mxu0 %v5589_v48 }
  0xa8   :  { %1210 = vmatpush2.bf16.msra.mxu1 %v5596_v49  ;;  %1136 = vmatprep.subr.bf16.mxu0 %v5601_v50 }
  0xa9   :  { %1211 = vmatprep.subr.bf16.mxu1 %v5608_v51 }
  0xab   :  { %1137 = vmatpush2.bf16.msra.mxu0 %v5615_v52 }
  0xac   :  { %1212 = vmatpush2.bf16.msra.mxu1 %v5620_v53  ;;  %1138 = vmatprep.subr.bf16.mxu0 %v5627_v54 }
  0xad   :  { %1213 = vmatprep.subr.bf16.mxu1 %v5632_v55 }
  0xaf   :  { %1139 = vmatpush2.bf16.msra.mxu0 %v5637_v56 }
  0xb0   :  { %1214 = vmatpush2.bf16.msra.mxu1 %v5644_v57  ;;  %1140 = vmatprep.subr.bf16.mxu0 %v5651_v58 }
  0xb1   :  { %1414 = vmatprep.subr.bf16.mxu1 %v5310_v0  ;;  %v5109_v0 = vld [vmem:[%s7744_s0 + $0x108] ss:$16 sps:$4 sm:$0xff]  }
  0xb3   :  { %1216 = vmatmul.mubr.bf16.vlgmr.msra.gmra.mxu1 %v5098_v9  ;;  %1141 = vmatpush2.bf16.msra.mxu0 %v5661_v60 }
  0xb4   :  { %1415 = vmatpush1.bf16.msra.mxu1 %v5321_v2  ;;  %1142 = vmatprep.subr.bf16.mxu0 %v5668_v61  ;;  %v5104_v2 = vld [vmem:[%s7744_s0 + $0x104] ss:$16 sps:$4 sm:$0xff]  }
  0xb5   :  { %1416 = vmatprep.subr.bf16.mxu1 %v7787_v47  ;;  %4282 = vmatprep.mubr.msk.bf16.mxu1 %vm487_vm0, %v5106_v11  ;;  %v4263_v47 = vld [vmem:[%s7744_s0 + $0x140] sm:$0xff] }
  0xb7   :  { %1143 = vmatpush2.bf16.msra.mxu0 %v5676_v63 }
  0xb8   :  { %1417 = vmatpush1.bf16.msra.mxu1 %v5344_v6  ;;  %1485 = vmatprep.subr.bf16.mxu0 %v5315_v1  ;;  %v5108_v1 = vld [vmem:[%s7744_s0 + $0x100] ss:$16 sps:$4 sm:$0xff]   ;;  %v5115_v6 = vld [vmem:[%s7744_s0 + $0x128] ss:$16 sps:$4 sm:$0xff]  }
  0xb9   :  { %1418 = vmatprep.subr.bf16.mxu1 %v5356_v8  ;;  %v4264_v8 = vld [vmem:[%s7744_s0 + $0x148] sm:$0xff] }
  0xba   :  { %1145 = vmatmul.mubr.bf16.vlgmr.msra.gmra.mxu0 %v5101_v13  ;;  %v4279_v62 = vcombine.low %v4264_v8, %v4264_v8 }
  0xbb   :  { %1226 = vmatmul.mubr.bf16.gmra.mxu1 %v5109_v0  ;;  %1486 = vmatpush1.bf16.msra.mxu0 %v5326_v3  ;;  %v7789_v3 = vld [vmem:[#allocation3_spill] sm:$0xff] }
  0xbc   :  { %1419 = vmatpush1.bf16.msra.mxu1 %v5366_v10  ;;  %1487 = vmatprep.subr.bf16.mxu0 %v5339_v5  ;;  %v5110_v5 = vld [vmem:[%s7744_s0 + $0x124] ss:$16 sps:$4 sm:$0xff]   ;;  %v4280_v10 = vcombine.high %v4264_v8, %v4264_v8 }
  0xbd   :  { %1420 = vmatprep.subr.bf16.mxu1 %v5378_v12  ;;  %1154 = vmatprep.mubr.bf16.mxu0 %v5104_v2  ;;  %v7790_v12 = vld [vmem:[#allocation4_spill] sm:$0xff] }
  0xbe   :  { %4283 = vmatprep.mubr.msk.bf16.mxu1 %vm487_vm0, %v5112_v15 }
  0xbf   :  { %1488 = vmatpush1.bf16.msra.mxu0 %v5350_v7  ;;  %v5114_v7 = vld [vmem:[%s7744_s0 + $0x120] ss:$16 sps:$4 sm:$0xff]  }
  0xc0   :  { %1421 = vmatpush1.bf16.msra.mxu1 %v5390_v14  ;;  %1489 = vmatprep.subr.bf16.mxu0 %v7789_v3  ;;  %v7791_v14 = vld [vmem:[#allocation5_spill] sm:$0xff] }
  0xc1   :  { %1422 = vmatprep.subr.bf16.mxu1 %v7788_v42  ;;  %v5122_v42 = vld [vmem:[%s7744_s0 + $0x154] ss:$16 sps:$4 sm:$0xff]  }
  0xc2   :  { %1155 = vmatmul.mubr.bf16.gmra.mxu0 %v5108_v1 }
  0xc3   :  { %1236 = vmatmul.mubr.bf16.gmra.mxu1 %v5115_v6  ;;  %1490 = vmatpush1.bf16.msra.mxu0 %v7790_v12 }
  0xc4   :  { %1423 = vmatpush1.bf16.msra.mxu1 %v5414_v18  ;;  %1491 = vmatprep.subr.bf16.mxu0 %v7791_v14  ;;  %v7792_v18 = vld [vmem:[#allocation6_spill] sm:$0xff] }
  0xc5   :  { %1424 = vmatprep.subr.bf16.mxu1 %v5426_v20  ;;  %1164 = vmatprep.mubr.bf16.mxu0 %v5110_v5  ;;  %v4278_v20 = vcombine.high %v4263_v47, %v4263_v47 }
  0xc6   :  { %4284 = vmatprep.mubr.msk.bf16.mxu1 %vm487_vm0, %v4280_v10 }
  0xc7   :  { %1492 = vmatpush1.bf16.msra.mxu0 %v7792_v18 }
  0xc8   :  { %1425 = vmatpush1.bf16.msra.mxu1 %v5438_v22  ;;  %1493 = vmatprep.subr.bf16.mxu0 %v5409_v17  ;;  %v4277_v22 = vcombine.low %v4263_v47, %v4263_v47  ;;  %v5125_v17 = vld [vmem:[%s7744_s0 + $0x15c] ss:$16 sps:$4 sm:$0xff]   ;;  %v1678_v47 = vld [vmem:[%s7745_s4 + $0x50] sm:$0x33] }
  0xc9   :  { %1426 = vmatprep.subr.bf16.mxu1 %v5450_v24  ;;  %v5128_v24 = vld [vmem:[%s7744_s0 + $0x17c] ss:$16 sps:$4 sm:$0xff]   ;;  %v6066_v18 = vcombine.high %v1678_v47, %v1678_v47 }
  0xca   :  { %1165 = vmatmul.mubr.bf16.gmra.mxu0 %v5114_v7 }
  0xcb   :  { %1246 = vmatmul.mubr.bf16.gmra.mxu1 %v4279_v62  ;;  %1494 = vmatpush1.bf16.msra.mxu0 %v5419_v19  ;;  %v5120_v19 = vld [vmem:[%s7744_s0 + $0x150] ss:$16 sps:$4 sm:$0xff]  }
  0xcc   :  { %1427 = vmatpush1.bf16.msra.mxu1 %v5462_v26  ;;  %1495 = vmatprep.subr.bf16.mxu0 %v5433_v21  ;;  %v5123_v21 = vld [vmem:[%s7744_s0 + $0x158] ss:$16 sps:$4 sm:$0xff]  }
  0xcd   :  { %1428 = vmatprep.subr.bf16.mxu1 %v5474_v28  ;;  %1174 = vmatprep.mubr.bf16.mxu0 %v4278_v20  ;;  %v5131_v26 = vld [vmem:[%s7744_s0 + $0x178] ss:$16 sps:$4 sm:$0xff]   ;;  %v5134_v28 = vld [vmem:[%s7744_s0 + $0x19c] ss:$16 sps:$4 sm:$0xff]   ;;  %v4358_v20 = vcombine.low %v1678_v47, %v1678_v47 }
  0xce   :  { %1446 = vmatprep.mubr.bf16.mxu1 %v5122_v42  ;;  %v5146_v42 = vld [vmem:[%s7745_s4 + $0x44] ss:$8 sps:$4 sm:$0xff]  }
  0xcf   :  { %1496 = vmatpush1.bf16.msra.mxu0 %v5445_v23  ;;  %v5126_v23 = vld [vmem:[%s7744_s0 + $0x174] ss:$16 sps:$4 sm:$0xff]  }
  0xd0   :  { %1429 = vmatpush1.bf16.msra.mxu1 %v5486_v30  ;;  %1497 = vmatprep.subr.bf16.mxu0 %v5457_v25  ;;  %v5130_v25 = vld [vmem:[%s7744_s0 + $0x170] ss:$16 sps:$4 sm:$0xff]  }
  0xd1   :  { %1430 = vmatprep.subr.bf16.mxu1 %v5498_v32  ;;  %v4298_v32 = vld [vmem:[%s7744_s0 + $0x1b8] sm:$0xff] }
  0xd2   :  { %1175 = vmatmul.mubr.bf16.gmra.mxu0 %v4277_v22 }
  0xd3   :  { %1498 = vmatpush1.bf16.msra.mxu0 %v5467_v27  ;;  %4315 = vmatprep.mubr.msk.bf16.mxu0 %vm487_vm0, %v5125_v17  ;;  %v5132_v27 = vld [vmem:[%s7744_s0 + $0x194] ss:$16 sps:$4 sm:$0xff]   ;;  %v5144_v17 = vld [vmem:[%s7745_s4 + $0x40] ss:$8 sps:$4 sm:$0xff]  }
  0xd4   :  { %1431 = vmatpush2.bf16.msra.mxu1 %v5510_v34  ;;  %1499 = vmatprep.subr.bf16.mxu0 %v5481_v29  ;;  %v5136_v34 = vld [vmem:[%s7744_s0 + $0x190] ss:$16 sps:$4 sm:$0xff]  }
  0xd5   :  { %1432 = vmatprep.subr.bf16.mxu1 %v5522_v36 }
  0xd7   :  { %1500 = vmatpush1.bf16.msra.mxu0 %v5493_v31  ;;  %v4297_v31 = vld [vmem:[%s7744_s0 + $0x1b0] sm:$0xff] }
  0xd8   :  { %1433 = vmatpush2.bf16.msra.mxu1 %v5534_v38  ;;  %1505 = vmatprep.subr.bf16.mxu0 %v5505_v33  ;;  %v4312_v36 = vcombine.high %v4297_v31, %v4297_v31 }
  0xd9   :  { %1434 = vmatprep.subr.bf16.mxu1 %v5546_v40 }
  0xdb   :  { %1506 = vmatpush2.bf16.msra.mxu0 %v5515_v35  ;;  %v5137_v35 = vld [vmem:[%s7744_s0 + $0x198] ss:$16 sps:$4 sm:$0xff]  }
  0xdc   :  { %1435 = vmatpush2.bf16.msra.mxu1 %v5561_v43  ;;  %1507 = vmatprep.subr.bf16.mxu0 %v5529_v37  ;;  %v4314_v37 = vcombine.high %v4298_v32, %v4298_v32 }
  0xdd   :  { %1436 = vmatprep.subr.bf16.mxu1 %v5573_v45 }
  0xdf   :  { %1508 = vmatpush2.bf16.msra.mxu0 %v5541_v39 }
  0xe0   :  { %1437 = vmatpush2.bf16.msra.mxu1 %v5589_v48  ;;  %1509 = vmatprep.subr.bf16.mxu0 %v5553_v41  ;;  %v4311_v48 = vcombine.low %v4297_v31, %v4297_v31 }
  0xe1   :  { %1438 = vmatprep.subr.bf16.mxu1 %v5601_v50 }
  0xe3   :  { %1510 = vmatpush2.bf16.msra.mxu0 %v5566_v44 }
  0xe4   :  { %1439 = vmatpush2.bf16.msra.mxu1 %v5615_v52  ;;  %1511 = vmatprep.subr.bf16.mxu0 %v5580_v46 }
  0xe5   :  { %1440 = vmatprep.subr.bf16.mxu1 %v5627_v54 }
  0xe7   :  { %1512 = vmatpush2.bf16.msra.mxu0 %v5596_v49  ;;  %v4313_v49 = vcombine.low %v4298_v32, %v4298_v32 }
  0xe8   :  { %1441 = vmatpush2.bf16.msra.mxu1 %v5637_v56  ;;  %1513 = vmatprep.subr.bf16.mxu0 %v5608_v51 }
  0xe9   :  { %1442 = vmatprep.subr.bf16.mxu1 %v5651_v58 }
  0xeb   :  { %1514 = vmatpush2.bf16.msra.mxu0 %v5620_v53 }
  0xec   :  { %1443 = vmatpush2.bf16.msra.mxu1 %v5661_v60  ;;  %1515 = vmatprep.subr.bf16.mxu0 %v5632_v55 }
  0xed   :  { %1444 = vmatprep.subr.bf16.mxu1 %v5668_v61 }
  0xef   :  { %1516 = vmatpush2.bf16.msra.mxu0 %v5644_v57 }
  0xf0   :  { %1445 = vmatpush2.bf16.msra.mxu1 %v5676_v63 }
  0xf1   :  { %4360 = vmatprep.subr.msk.bf16.mxu1 %vm1759_vm1, %v6066_v18 }
  0xf2   :  { %1518 = vmatmul.mubr.bf16.vlgmr.msra.gmra.mxu0 %v5123_v21  ;;  %v6079_v21 = vsel %vm1759_vm1, %v4358_v20, 0 }
  0xf3   :  { %1447 = vmatmul.mubr.bf16.vlgmr.msra.gmra.mxu1 %v5120_v19  ;;  %4316 = vmatprep.mubr.msk.bf16.mxu0 %vm487_vm0, %v5128_v24  ;;  %7793 = vst [vmem:[#allocation2_spill] sm:$0xff] %v6079_v21 }
  0xf4   :  { %1456 = vmatprep.mubr.bf16.mxu1 %v5126_v23  ;;  %1915 = vmatpush1.bf16.msra.mxu1 %v6079_v21 }
  0xf5   :  { %1916 = vmatprep.subr.bf16.mxu1 %v5146_v42 }
  0xf8   :  { %1917 = vmatpush1.bf16.msra.mxu1 %v5144_v17 }
  0xfa   :  { %1528 = vmatmul.mubr.bf16.gmra.mxu0 %v5131_v26  ;;  %v5149_v26 = vld [vmem:[%s7745_s4 + $0x34] ss:$8 sps:$4 sm:$0xff]  }
  0xfb   :  { %v605_v29 = vpop.f32.mrf.mxu1  ;;  %1457 = vmatmul.mubr.bf16.gmra.mxu1 %v5130_v25  ;;  %4317 = vmatprep.mubr.msk.bf16.mxu0 %vm487_vm0, %v5134_v28  ;;  %v5147_v25 = vld [vmem:[%s7745_s4 + $0x30] ss:$8 sps:$4 sm:$0xff]   ;;  %v5150_v28 = vld [vmem:[%s7745_s4 + $0x20] ss:$8 sps:$4 sm:$0xff]  }
  0xfc   :  { %1466 = vmatprep.mubr.bf16.mxu1 %v5132_v27  ;;  %1918 = vmatprep.subr.bf16.mxu1 %v5149_v26  ;;  %v5152_v27 = vld [vmem:[%s7745_s4 + $0x24] ss:$8 sps:$4 sm:$0xff]  }
  0xfd   :  { %v607_v30 = vpop.f32.mrf.mxu1  ;;  %1919 = vmatpush1.bf16.msra.mxu1 %v5147_v25 }
  0xfe   :  { %1920 = vmatprep.subr.bf16.mxu1 %v5152_v27 }
  0xff   :  { %v609_v33 = vpop.f32.mrf.mxu1 }
 0x101   :  { %v611_v38 = vpop.f32.mrf.mxu1  ;;  %1921 = vmatpush1.bf16.msra.mxu1 %v5150_v28 }
 0x102   :  { %v534_v39 = vpop.f32.mrf.mxu0  ;;  %1538 = vmatmul.mubr.bf16.gmra.mxu0 %v5137_v35 }
 0x103   :  { %1467 = vmatmul.mubr.bf16.gmra.mxu1 %v5136_v34  ;;  %v615_v40 = vpop.f32.mrf.mxu1  ;;  %v6030_v41 = vadd.f32 %v605_v29, %v534_v39  ;;  %4318 = vmatprep.mubr.msk.bf16.mxu0 %vm487_vm0, %v4314_v37  ;;  %v5155_v29 = vld [vmem:[%s7745_s4 + $0x14] ss:$8 sps:$4 sm:$0xff]   ;;  %v5158_v34 = vld [vmem:[%s7745_s4 + $0x4] ss:$8 sps:$4 sm:$0xff]   ;;  %v5156_v37 = vld [vmem:[%s7745_s4] ss:$8 sps:$4 sm:$0xff]  }
 0x104   :  { %1476 = vmatprep.mubr.bf16.mxu1 %v4312_v36  ;;  %v536_v43 = vpop.f32.mrf.mxu0  ;;  %1922 = vmatprep.subr.bf16.mxu1 %v5155_v29 }
 0x105   :  { %v617_v44 = vpop.f32.mrf.mxu1  ;;  %v608_v45 = vadd.f32 %v607_v30, %v536_v43  ;;  %656 = vrot.lane.b32.xlu0 %v6030_v41, %s5237_s13  ;;  %v5153_v30 = vld [vmem:[%s7745_s4 + $0x10] ss:$8 sps:$4 sm:$0xff]  }
 0x106   :  { %v538_v46 = vpop.f32.mrf.mxu0  ;;  %1923 = vmatpush1.bf16.msra.mxu1 %v5153_v30 }
 0x107   :  { %v619_v50 = vpop.f32.mrf.mxu1  ;;  %v6035_v51 = vadd.f32 %v609_v33, %v538_v46  ;;  %658 = vrot.lane.b32.xlu1 %v608_v45, %s5237_s13  ;;  %1924 = vmatprep.subr.bf16.mxu1 %v5158_v34  ;;  %v7765_v46 = vmov 0  }
 0x108   :  { %v540_v52 = vpop.f32.mrf.mxu0 }
 0x109   :  { %v621_v53 = vpop.f32.mrf.mxu1  ;;  %v612_v54 = vadd.f32 %v611_v38, %v540_v52  ;;  %660 = vrot.lane.b32.xlu0 %v6035_v51, %s5237_s13 }
 0x10a   :  { %v544_v55 = vpop.f32.mrf.mxu0  ;;  %1548 = vmatmul.mubr.bf16.gmra.mxu0 %v4313_v49  ;;  %1925 = vmatpush1.bf16.msra.mxu1 %v5156_v37 }
 0x10b   :  { %1477 = vmatmul.mubr.bf16.gmra.mxu1 %v4311_v48  ;;  %v625_v56 = vpop.f32.mrf.mxu1  ;;  %v6040_v57 = vadd.f32 %v615_v40, %v544_v55  ;;  %662 = vrot.lane.b32.xlu1 %v612_v54, %s5237_s13 }
 0x10c   :  { %v546_v58 = vpop.f32.mrf.mxu0  ;;  %1942 = vmatprep.mubr.bf16.mxu1 %v7765_v46  ;;  %1798 = vmatprep.mubr.bf16.mxu0 %v7765_v46 }
 0x10d   :  { %v627_v60 = vpop.f32.mrf.mxu1  ;;  %v618_v61 = vadd.f32 %v617_v44, %v546_v58  ;;  %664 = vrot.lane.b32.xlu0 %v6040_v57, %s5237_s13 }
 0x10e   :  { %v548_v63 = vpop.f32.mrf.mxu0 }
 0x10f   :  { %v629_v4 = vpop.f32.mrf.mxu1  ;;  %v6045_v59 = vadd.f32 %v619_v50, %v548_v63  ;;  %666 = vrot.lane.b32.xlu1 %v618_v61, %s5237_s13 }
 0x110   :  { %v550_v16 = vpop.f32.mrf.mxu0 }
 0x111   :  { %v631_v9 = vpop.f32.mrf.mxu1  ;;  %v622_v11 = vadd.f32 %v621_v53, %v550_v16  ;;  %668 = vrot.lane.b32.xlu0 %v6045_v59, %s5237_s13 }
 0x112   :  { %v554_v13 = vpop.f32.mrf.mxu0 }
 0x113   :  { %v635_v0 = vpop.f32.mrf.mxu1  ;;  %v6050_v2 = vadd.f32 %v625_v56, %v554_v13  ;;  %670 = vrot.lane.b32.xlu1 %v622_v11, %s5237_s13 }
 0x114   :  { %v556_v15 = vpop.f32.mrf.mxu0 }
 0x115   :  { %v637_v1 = vpop.f32.mrf.mxu1  ;;  %v628_v6 = vadd.f32 %v627_v60, %v556_v15  ;;  %672 = vrot.lane.b32.xlu0 %v6050_v2, %s5237_s13 }
 0x116   :  { %v558_v8 = vpop.f32.mrf.mxu0 }
 0x117   :  { %v639_v3 = vpop.f32.mrf.mxu1  ;;  %v6055_v5 = vadd.f32 %v629_v4, %v558_v8  ;;  %674 = vrot.lane.b32.xlu1 %v628_v6, %s5237_s13 }
 0x118   :  { %v560_v10 = vpop.f32.mrf.mxu0 }
 0x119   :  { %v640_v12 = vpop.f32.mrf.mxu1  ;;  %v632_v14 = vadd.f32 %v631_v9, %v560_v10  ;;  %676 = vrot.lane.b32.xlu0 %v6055_v5, %s5237_s13 }
 0x11a   :  { %v564_v7 = vpop.f32.mrf.mxu0 }
 0x11b   :  { %678 = vrot.lane.b32.xlu1 %v632_v14, %s5237_s13  ;;  %v6064_v62 = vadd.f32 %v635_v0, %v564_v7 }
 0x11c   :  { %v566_v22 = vpop.f32.mrf.mxu0 }
 0x11d   :  { %v6074_v19 = vadd.f32 %v637_v1, %v566_v22 }
 0x11e   :  { %v568_v23 = vpop.f32.mrf.mxu0 }
 0x120   :  { %v569_v24 = vpop.f32.mrf.mxu0 }
 0x13a   :  { %v908_v32 = vpop.f32.mrf.mxu0 }
 0x13b   :  { %v837_v31 = vpop.f32.mrf.mxu1 }
 0x13c   :  { %v6100_v33 = vadd.f32 %v908_v32, %v837_v31  ;;  %v910_v36 = vpop.f32.mrf.mxu0 }
 0x13d   :  { %v839_v35 = vpop.f32.mrf.mxu1 }
 0x13e   :  { %v911_v38 = vadd.f32 %v910_v36, %v839_v35  ;;  %959 = vrot.lane.b32.xlu0 %v6100_v33, %s5237_s13  ;;  %v912_v40 = vpop.f32.mrf.mxu0 }
 0x13f   :  { %v841_v39 = vpop.f32.mrf.mxu1 }
 0x140   :  { %v6110_v43 = vadd.f32 %v912_v40, %v841_v39  ;;  %961 = vrot.lane.b32.xlu1 %v911_v38, %s5237_s13  ;;  %v914_v45 = vpop.f32.mrf.mxu0 }
 0x141   :  { %v843_v44 = vpop.f32.mrf.mxu1 }
 0x142   :  { %v915_v48 = vadd.f32 %v914_v45, %v843_v44  ;;  %963 = vrot.lane.b32.xlu0 %v6110_v43, %s5237_s13  ;;  %v918_v50 = vpop.f32.mrf.mxu0 }
 0x143   :  { %v847_v49 = vpop.f32.mrf.mxu1 }
 0x144   :  { %v6117_v52 = vadd.f32 %v918_v50, %v847_v49  ;;  %965 = vrot.lane.b32.xlu1 %v915_v48, %s5237_s13  ;;  %v920_v54 = vpop.f32.mrf.mxu0 }
 0x145   :  { %v849_v53 = vpop.f32.mrf.mxu1 }
 0x146   :  { %v921_v55 = vadd.f32 %v920_v54, %v849_v53  ;;  %967 = vrot.lane.b32.xlu0 %v6117_v52, %s5237_s13  ;;  %v922_v58 = vpop.f32.mrf.mxu0 }
 0x147   :  { %v851_v56 = vpop.f32.mrf.mxu1 }
 0x148   :  { %v6122_v60 = vadd.f32 %v922_v58, %v851_v56  ;;  %969 = vrot.lane.b32.xlu1 %v921_v55, %s5237_s13  ;;  %v924_v63 = vpop.f32.mrf.mxu0 }
 0x149   :  { %v853_v61 = vpop.f32.mrf.mxu1 }
 0x14a   :  { %v925_v4 = vadd.f32 %v924_v63, %v853_v61  ;;  %971 = vrot.lane.b32.xlu0 %v6122_v60, %s5237_s13  ;;  %v928_v9 = vpop.f32.mrf.mxu0 }
 0x14b   :  { %v857_v16 = vpop.f32.mrf.mxu1 }
 0x14c   :  { %v6127_v11 = vadd.f32 %v928_v9, %v857_v16  ;;  %973 = vrot.lane.b32.xlu1 %v925_v4, %s5237_s13  ;;  %v930_v0 = vpop.f32.mrf.mxu0 }
 0x14d   :  { %v859_v13 = vpop.f32.mrf.mxu1 }
 0x14e   :  { %v931_v15 = vadd.f32 %v930_v0, %v859_v13  ;;  %975 = vrot.lane.b32.xlu0 %v6127_v11, %s5237_s13  ;;  %v932_v6 = vpop.f32.mrf.mxu0 }
 0x14f   :  { %v861_v1 = vpop.f32.mrf.mxu1 }
 0x150   :  { %v6132_v8 = vadd.f32 %v932_v6, %v861_v1  ;;  %977 = vrot.lane.b32.xlu1 %v931_v15, %s5237_s13  ;;  %v934_v10 = vpop.f32.mrf.mxu0 }
 0x151   :  { %v863_v3 = vpop.f32.mrf.mxu1 }
 0x152   :  { %v935_v12 = vadd.f32 %v934_v10, %v863_v3  ;;  %979 = vrot.lane.b32.xlu0 %v6132_v8, %s5237_s13  ;;  %v938_v7 = vpop.f32.mrf.mxu0  ;;  %v4330_v3 = vld [vmem:[%s7745_s4 + $0xa8] sm:$0x33] }
 0x153   :  { %v867_v14 = vpop.f32.mrf.mxu1 }
 0x154   :  { %981 = vrot.lane.b32.xlu1 %v935_v12, %s5237_s13  ;;  %v6138_v47 = vadd.f32 %v938_v7, %v867_v14  ;;  %v940_v42 = vpop.f32.mrf.mxu0  ;;  %v6169_v14 = vcombine.high %v4330_v3, %v4330_v3  ;;  %v4341_v7 = vcombine.low %v4330_v3, %v4330_v3 }
 0x155   :  { %v869_v20 = vpop.f32.mrf.mxu1 }
 0x156   :  { %v6140_v22 = vadd.f32 %v940_v42, %v869_v20  ;;  %v942_v23 = vpop.f32.mrf.mxu0  ;;  %4343 = vmatprep.subr.msk.bf16.mxu0 %vm1759_vm1, %v6169_v14 }
 0x157   :  { %v871_v17 = vpop.f32.mrf.mxu1  ;;  %v6176_v23 = vld [vmem:[%s7745_s4 + $0x9c] ss:$8 sps:$4 sm:$0xff]  }
 0x158   :  { %v943_v25 = vpop.f32.mrf.mxu0 }
 0x159   :  { %v872_v24 = vpop.f32.mrf.mxu1 }
 0x173   :  { %v1217_v26 = vpop.f32.mrf.mxu1 }
 0x175   :  { %v1219_v27 = vpop.f32.mrf.mxu1 }
 0x177   :  { %v1221_v28 = vpop.f32.mrf.mxu1  ;;  %v657_v20 = vpop.permute.xlu0 %656 }
 0x179   :  { %v1223_v29 = vpop.f32.mrf.mxu1  ;;  %v659_v42 = vpop.permute.xlu1 %658 }
 0x17a   :  { %v1146_v30 = vpop.f32.mrf.mxu0 }
 0x17b   :  { %v1227_v31 = vpop.f32.mrf.mxu1  ;;  %v6142_v32 = vadd.f32 %v1217_v26, %v1146_v30  ;;  %v6181_v26 = vsel %vm1759_vm1, %v4341_v7, 0 }
 0x17c   :  { %v1148_v34 = vpop.f32.mrf.mxu0  ;;  %1771 = vmatpush1.bf16.msra.mxu0 %v6181_v26 }
 0x17d   :  { %v1229_v35 = vpop.f32.mrf.mxu1  ;;  %1268 = vrot.lane.b32.xlu0 %v6142_v32, %s5237_s13  ;;  %v1220_v38 = vadd.f32 %v1219_v27, %v1148_v34  ;;  %1772 = vmatprep.subr.bf16.mxu0 %v6176_v23  ;;  %v661_v34 = vpop.permute.xlu0 %660 }
 0x17e   :  { %v1150_v36 = vpop.f32.mrf.mxu0 }
 0x17f   :  { %v1231_v37 = vpop.f32.mrf.mxu1  ;;  %v6146_v39 = vadd.f32 %v1221_v28, %v1150_v36 }
 0x180   :  { %v1152_v40 = vpop.f32.mrf.mxu0 }
 0x181   :  { %v1233_v44 = vpop.f32.mrf.mxu1  ;;  %1272 = vrot.lane.b32.xlu1 %v6146_v39, %s5237_s13  ;;  %1270 = vrot.lane.b32.xlu0 %v1220_v38, %s5237_s13  ;;  %v1224_v49 = vadd.f32 %v1223_v29, %v1152_v40  ;;  %v6190_v29 = vld [vmem:[%s7745_s4 + $0x98] ss:$8 sps:$4 sm:$0xff]   ;;  %v665_v40 = vpop.permute.xlu0 %664 }
 0x182   :  { %v1156_v45 = vpop.f32.mrf.mxu0  ;;  %1773 = vmatpush1.bf16.msra.mxu0 %v6190_v29 }
 0x183   :  { %v1237_v48 = vpop.f32.mrf.mxu1  ;;  %v6151_v50 = vadd.f32 %v1227_v31, %v1156_v45 }
 0x184   :  { %v1158_v53 = vpop.f32.mrf.mxu0 }
 0x185   :  { %v1239_v54 = vpop.f32.mrf.mxu1  ;;  %1274 = vrot.lane.b32.xlu1 %v1224_v49, %s5237_s13  ;;  %v1230_v55 = vadd.f32 %v1229_v35, %v1158_v53  ;;  %1276 = vrot.lane.b32.xlu0 %v6151_v50, %s5237_s13  ;;  %v663_v35 = vpop.permute.xlu1 %662 }
 0x186   :  { %v1160_v56 = vpop.f32.mrf.mxu0  ;;  %v6200_v45 = vpop.permute.xlu0 %668 }
 0x187   :  { %v1241_v58 = vpop.f32.mrf.mxu1  ;;  %v6156_v61 = vadd.f32 %v1231_v37, %v1160_v56 }
 0x188   :  { %v1162_v63 = vpop.f32.mrf.mxu0 }
 0x189   :  { %v1243_v4 = vpop.f32.mrf.mxu1  ;;  %1278 = vrot.lane.b32.xlu1 %v1230_v55, %s5237_s13  ;;  %v1234_v16 = vadd.f32 %v1233_v44, %v1162_v63  ;;  %1280 = vrot.lane.b32.xlu0 %v6156_v61, %s5237_s13  ;;  %v667_v44 = vpop.permute.xlu1 %666  ;;  %v6214_v55 = vld [vmem:[%s7745_s4 + $0x8c] ss:$8 sps:$4 sm:$0xff]   ;;  %v6228_v63 = vld [vmem:[%s7745_s4 + $0x78] ss:$8 sps:$4 sm:$0xff]  }
 0x18a   :  { %v1166_v9 = vpop.f32.mrf.mxu0  ;;  %v6202_v49 = vpop.permute.xlu0 %672  ;;  %1774 = vmatprep.subr.bf16.mxu0 %v6214_v55 }
 0x18b   :  { %v1247_v13 = vpop.f32.mrf.mxu1  ;;  %v6161_v0 = vadd.f32 %v1237_v48, %v1166_v9  ;;  %v6237_v9 = vld [vmem:[%s7745_s4 + $0x6c] ss:$8 sps:$4 sm:$0xff]  }
 0x18c   :  { %v1168_v15 = vpop.f32.mrf.mxu0 }
 0x18d   :  { %v1249_v1 = vpop.f32.mrf.mxu1  ;;  %1282 = vrot.lane.b32.xlu1 %v1234_v16, %s5237_s13  ;;  %v1240_v6 = vadd.f32 %v1239_v54, %v1168_v15  ;;  %1284 = vrot.lane.b32.xlu0 %v6161_v0, %s5237_s13  ;;  %v671_v48 = vpop.permute.xlu1 %670  ;;  %v6209_v54 = vld [vmem:[%s7745_s4 + $0x88] ss:$8 sps:$4 sm:$0xff]  }
 0x18e   :  { %v1170_v10 = vpop.f32.mrf.mxu0  ;;  %1775 = vmatpush1.bf16.msra.mxu0 %v6209_v54  ;;  %v6218_v56 = vpop.permute.xlu0 %676  ;;  %v6243_v15 = vld [vmem:[%s7745_s4 + $0x68] ss:$8 sps:$4 sm:$0xff]  }
 0x18f   :  { %v1251_v12 = vpop.f32.mrf.mxu1  ;;  %v6171_v17 = vadd.f32 %v1241_v58, %v1170_v10  ;;  %v6223_v58 = vld [vmem:[%s7745_s4 + $0x7c] ss:$8 sps:$4 sm:$0xff]  }
 0x190   :  { %v1172_v24 = vpop.f32.mrf.mxu0  ;;  %1776 = vmatprep.subr.bf16.mxu0 %v6223_v58 }
 0x191   :  { %v1252_v25 = vpop.f32.mrf.mxu1  ;;  %1286 = vrot.lane.b32.xlu1 %v1240_v6, %s5237_s13  ;;  %v1244_v27 = vadd.f32 %v1243_v4, %v1172_v24  ;;  %1288 = vrot.lane.b32.xlu0 %v6171_v17, %s5237_s13  ;;  %v6204_v53 = vpop.permute.xlu1 %674 }
 0x192   :  { %v1176_v28 = vpop.f32.mrf.mxu0  ;;  %1777 = vmatpush1.bf16.msra.mxu0 %v6228_v63  ;;  %v686_v25 = vsel %vm684_vm2, %v661_v34, %v663_v35 }
 0x193   :  { %v6192_v30 = vadd.f32 %v1247_v13, %v1176_v28  ;;  %v685_v13 = vsel %vm684_vm2, %v657_v20, %v659_v42  ;;  %1778 = vmatprep.subr.bf16.mxu0 %v6237_v9  ;;  %v6255_v42 = vld [vmem:[%s7745_s4 + $0x5c] ss:$8 sps:$4 sm:$0xff]  }
 0x194   :  { %v1178_v31 = vpop.f32.mrf.mxu0  ;;  %v699_v12 = vmax.f32 %v6030_v41, %v685_v13  ;;  %v687_v13 = vsel %vm684_vm2, %v665_v40, %v667_v44 }
 0x195   :  { %1290 = vrot.lane.b32.xlu1 %v1244_v27, %s5237_s13  ;;  %v1250_v36 = vadd.f32 %v1249_v1, %v1178_v31  ;;  %1292 = vrot.lane.b32.xlu0 %v6192_v30, %s5237_s13  ;;  %v6230_v4 = vpop.permute.xlu1 %678  ;;  %v6261_v31 = vld [vmem:[%s7745_s4 + $0x58] ss:$8 sps:$4 sm:$0xff]  }
 0x196   :  { %v1180_v37 = vpop.f32.mrf.mxu0  ;;  %1779 = vmatpush1.bf16.msra.mxu0 %v6243_v15 }
 0x197   :  { %1780 = vmatprep.subr.bf16.mxu0 %v6255_v42  ;;  %v6269_v37 = vld [vmem:[%s7746_s3] ss:$0 sm:$0xff] }
 0x198   :  { %v1181_v38 = vpop.f32.mrf.mxu0 }
 0x199   :  { %1294 = vrot.lane.b32.xlu1 %v1250_v36, %s5237_s13 }
 0x19a   :  { %1781 = vmatpush1.bf16.msra.mxu0 %v6261_v31 }
 0x1b0   :  { %v960_v16 = vpop.permute.xlu0 %959 }
 0x1b2   :  { %v962_v1 = vpop.permute.xlu1 %961  ;;  %v1519_v10 = vpop.f32.mrf.mxu0 }
 0x1b3   :  { %v987_v6 = vsel %vm684_vm2, %v960_v16, %v962_v1  ;;  %v1448_v3 = vpop.f32.mrf.mxu1  ;;  %v700_v16 = vmax.f32 %v6035_v51, %v686_v25  ;;  %v701_v51 = vmax.f32 %v6040_v57, %v687_v13  ;;  %v688_v25 = vsel %vm684_vm2, %v6200_v45, %v671_v48 }
 0x1b4   :  { %v1001_v7 = vmax.f32 %v6100_v33, %v987_v6  ;;  %v6250_v24 = vadd.f32 %v1519_v10, %v1448_v3  ;;  %v964_v20 = vpop.permute.xlu0 %963  ;;  %v1521_v28 = vpop.f32.mrf.mxu0  ;;  %v702_v45 = vmax.f32 %v6045_v59, %v688_v25 }
 0x1b5   :  { %v1450_v27 = vpop.f32.mrf.mxu1 }
 0x1b6   :  { %v1008_v41 = vmax.f32 %v699_v12, %v1001_v7  ;;  %v1522_v36 = vadd.f32 %v1521_v28, %v1450_v27  ;;  %v966_v33 = vpop.permute.xlu1 %965  ;;  %1570 = vrot.lane.b32.xlu0 %v6250_v24, %s5237_s13  ;;  %v1523_v38 = vpop.f32.mrf.mxu0 }
 0x1b7   :  { %v988_v34 = vsel %vm684_vm2, %v964_v20, %v966_v33  ;;  %v1452_v35 = vpop.f32.mrf.mxu1 }
 0x1b8   :  { %v1002_v1 = vmax.f32 %v6110_v43, %v988_v34  ;;  %v6276_v6 = vadd.f32 %v1523_v38, %v1452_v35  ;;  %1572 = vrot.lane.b32.xlu1 %v1522_v36, %s5237_s13  ;;  %v968_v3 = vpop.permute.xlu0 %967  ;;  %v1525_v12 = vpop.f32.mrf.mxu0  ;;  %v1632_v7 = vadd.f32 %v6269_v37, %v1008_v41 }
 0x1b9   :  { %v1454_v10 = vpop.f32.mrf.mxu1 }
 0x1ba   :  { %v1009_v20 = vmax.f32 %v700_v16, %v1002_v1  ;;  %v1526_v27 = vadd.f32 %v1525_v12, %v1454_v10  ;;  %v970_v28 = vpop.permute.xlu1 %969  ;;  %1574 = vrot.lane.b32.xlu0 %v6276_v6, %s5237_s13  ;;  %v1529_v44 = vpop.f32.mrf.mxu0  ;;  %v1639_v16 = vmax.f32 %v1632_v7, 0.0  ;;  %v6298_v12 = vld [vmem:[%s7745_s4 + $0x100] sm:$0x33]  ;;  %v689_v7 = vsel %vm684_vm2, %v6202_v49, %v6204_v53 }
 0x1bb   :  { %v989_v40 = vsel %vm684_vm2, %v968_v3, %v970_v28  ;;  %v1458_v43 = vpop.f32.mrf.mxu1  ;;  %v690_v53 = vsel %vm684_vm2, %v6218_v56, %v6230_v4 }
 0x1bc   :  { %v1633_v36 = vadd.f32 %v6269_v37, %v1009_v20  ;;  %v1003_v33 = vmax.f32 %v6117_v52, %v989_v40  ;;  %v6288_v41 = vadd.f32 %v1529_v44, %v1458_v43  ;;  %1576 = vrot.lane.b32.xlu1 %v1526_v27, %s5237_s13  ;;  %v972_v34 = vpop.permute.xlu0 %971  ;;  %v1531_v38 = vpop.f32.mrf.mxu0  ;;  %v6311_v43 = vcombine.high %v6298_v12, %v6298_v12 }
 0x1bd   :  { %v1460_v35 = vpop.f32.mrf.mxu1 }
 0x1be   :  { %v1640_v57 = vmax.f32 %v1633_v36, 0.0  ;;  %v1010_v13 = vmax.f32 %v701_v51, %v1003_v33  ;;  %v1532_v1 = vadd.f32 %v1531_v38, %v1460_v35  ;;  %v974_v3 = vpop.permute.xlu1 %973  ;;  %1578 = vrot.lane.b32.xlu0 %v6288_v41, %s5237_s13  ;;  %v1533_v10 = vpop.f32.mrf.mxu0  ;;  %4388 = vmatprep.subr.msk.bf16.mxu0 %vm1759_vm1, %v6311_v43  ;;  %v4403_v38 = vld [vmem:[%s7745_s4 + $0x158] sm:$0x33] }
 0x1bf   :  { %v990_v48 = vsel %vm684_vm2, %v972_v34, %v974_v3  ;;  %v1462_v52 = vpop.f32.mrf.mxu1 }
 0x1c0   :  { %v6303_v20 = vpack.c.bf16 %v1640_v57, %v1639_v16  ;;  %v1004_v27 = vmax.f32 %v6122_v60, %v990_v48  ;;  %v6306_v28 = vadd.f32 %v1533_v10, %v1462_v52  ;;  %1580 = vrot.lane.b32.xlu1 %v1532_v1, %s5237_s13  ;;  %v976_v59 = vpop.permute.xlu0 %975  ;;  %v1535_v40 = vpop.f32.mrf.mxu0  ;;  %v1634_v44 = vadd.f32 %v6269_v37, %v1010_v13 }
 0x1c1   :  { %v1464_v51 = vpop.f32.mrf.mxu1  ;;  %v703_v60 = vmax.f32 %v6050_v2, %v689_v7  ;;  %v6335_v13 = vcombine.high %v4403_v38, %v4403_v38 }
 0x1c2   :  { %v1011_v25 = vmax.f32 %v702_v45, %v1004_v27  ;;  %v1536_v36 = vadd.f32 %v1535_v40, %v1464_v51  ;;  %v978_v49 = vpop.permute.xlu1 %977  ;;  %1582 = vrot.lane.b32.xlu0 %v6306_v28, %s5237_s13  ;;  %4361 = vmatmul.mubr.msk.bf16.vlgmr.msra.gmra.mxu1 %vm1746_vm3, %v6303_v20  ;;  %v1539_v35 = vpop.f32.mrf.mxu0  ;;  %v1996_v16 = vshll.u32 %v6303_v20, 16  ;;  %v4414_v45 = vcombine.low %v4403_v38, %v4403_v38 }
 0x1c3   :  { %v991_v33 = vsel %vm684_vm2, %v976_v59, %v978_v49  ;;  %v1468_v34 = vpop.f32.mrf.mxu1  ;;  %1952 = vmatprep.mubr.bf16.mxu1 %v7765_v46  ;;  %7794 = vst [vmem:[#allocation7_spill] sm:$0xff] %v6335_v13  ;;  %v1641_v48 = vmax.f32 %v1634_v44, 0.0  ;;  %4416 = vmatprep.subr.msk.bf16.mxu1 %vm1759_vm1, %v6335_v13 }
 0x1c4   :  { %v1635_v2 = vadd.f32 %v6269_v37, %v1011_v25  ;;  %v1005_v57 = vmax.f32 %v6127_v11, %v991_v33  ;;  %v6332_v56 = vadd.f32 %v1539_v35, %v1468_v34  ;;  %1584 = vrot.lane.b32.xlu1 %v1536_v36, %s5237_s13  ;;  %v980_v4 = vpop.permute.xlu0 %979  ;;  %v1541_v3 = vpop.f32.mrf.mxu0  ;;  %v704_v11 = vmax.f32 %v6055_v5, %v690_v53  ;;  %v6359_v34 = vld [vmem:[%s7745_s4 + $0x148] ss:$8 sps:$4 sm:$0xff]  }
 0x1c5   :  { %v1470_v1 = vpop.f32.mrf.mxu1  ;;  %v6344_v25 = vsel %vm1759_vm1, %v4414_v45, 0  ;;  %v1998_v5 = vrot.slane %v1996_v16, 1  ;;  %7797 = vst [vmem:[#allocation5_spill] sm:$0xff] %v6359_v34 }
 0x1c6   :  { %v1642_v52 = vmax.f32 %v1635_v2, 0.0  ;;  %v1012_v10 = vmax.f32 %v703_v60, %v1005_v57  ;;  %v1542_v7 = vadd.f32 %v1541_v3, %v1470_v1  ;;  %v982_v27 = vpop.permute.xlu1 %981  ;;  %1586 = vrot.lane.b32.xlu0 %v6332_v56, %s5237_s13  ;;  %v1543_v40 = vpop.f32.mrf.mxu0  ;;  %7795 = vst [vmem:[#allocation3_spill] sm:$0xff] %v6344_v25  ;;  %v6353_v60 = vld [vmem:[%s7745_s4 + $0x14c] ss:$8 sps:$4 sm:$0xff]   ;;  %2296 = vmatpush1.bf16.msra.mxu1 %v6344_v25  ;;  %v2393_v1 = vrot.slane %v6303_v20, 1 }
 0x1c7   :  { %v992_v59 = vsel %vm684_vm2, %v980_v4, %v982_v27  ;;  %v1472_v51 = vpop.f32.mrf.mxu1  ;;  %7796 = vst [vmem:[#allocation4_spill] sm:$0xff] %v6353_v60  ;;  %2297 = vmatprep.subr.bf16.mxu1 %v6353_v60 }
 0x1c8   :  { %v1006_v44 = vmax.f32 %v6132_v8, %v992_v59  ;;  %v6347_v36 = vadd.f32 %v1543_v40, %v1472_v51  ;;  %1588 = vrot.lane.b32.xlu1 %v1542_v7, %s5237_s13  ;;  %v1647_v49 = vpack.c.bf16 %v1642_v52, %v1641_v48  ;;  %v1545_v33 = vpop.f32.mrf.mxu0  ;;  %v1994_v8 = vshrl.u32 %v6303_v20, 16  ;;  %v6374_v48 = vld [vmem:[%s7745_s4 + $0x13c] ss:$8 sps:$4 sm:$0xff]   ;;  %v6380_v20 = vld [vmem:[%s7745_s4 + $0x138] ss:$8 sps:$4 sm:$0xff]  }
 0x1c9   :  { %v1474_v53 = vpop.f32.mrf.mxu1  ;;  %v1636_v35 = vadd.f32 %v6269_v37, %v1012_v10  ;;  %7798 = vst [vmem:[#allocation6_spill] sm:$0xff] %v6374_v48  ;;  %7799 = vst [vmem:[#allocation8_spill] sm:$0xff] %v6380_v20 }
 0x1ca   :  { %v1013_v38 = vmax.f32 %v704_v11, %v1006_v44  ;;  %v1546_v2 = vadd.f32 %v1545_v33, %v1474_v53  ;;  %1590 = vrot.lane.b32.xlu0 %v6347_v36, %s5237_s13  ;;  %4362 = vmatmul.mubr.msk.bf16.gmra.mxu1 %vm1746_vm3, %v1647_v49  ;;  %v2000_v16 = vshll.u32 %v1647_v49, 16  ;;  %v1549_v4 = vpop.f32.mrf.mxu0  ;;  %v2394_v3 = vrot.slane %v1647_v49, 1 }
 0x1cb   :  { %v1478_v57 = vpop.f32.mrf.mxu1  ;;  %1962 = vmatprep.mubr.bf16.mxu1 %v7765_v46  ;;  %v1999_v52 = vor.u32 %v1998_v5, %v1994_v8  ;;  %2298 = vmatpush1.bf16.msra.mxu1 %v6359_v34  ;;  %v1643_v59 = vmax.f32 %v1636_v35, 0.0  ;;  %v6400_v8 = vld [vmem:[%s7745_s4 + $0x12c] ss:$8 sps:$4 sm:$0xff]  }
 0x1cc   :  { %v1637_v45 = vadd.f32 %v6269_v37, %v1013_v38  ;;  %1592 = vrot.lane.b32.xlu1 %v1546_v2, %s5237_s13  ;;  %v2002_v10 = vrot.slane %v2000_v16, 1  ;;  %v1551_v27 = vpop.f32.mrf.mxu0  ;;  %v6383_v11 = vsel %vm2392_vm4, %v2393_v1, %v2394_v3  ;;  %v6385_v40 = vadd.f32 %v1549_v4, %v1478_v57  ;;  %2299 = vmatprep.subr.bf16.mxu1 %v6374_v48  ;;  %v6406_v2 = vld [vmem:[%s7745_s4 + $0x128] ss:$8 sps:$4 sm:$0xff]   ;;  %v6420_v1 = vld [vmem:[%s7745_s4 + $0x11c] ss:$8 sps:$4 sm:$0xff]  }
 0x1cd   :  { %v1480_v7 = vpop.f32.mrf.mxu1  ;;  %7800 = vst [vmem:[#allocation9_spill] sm:$0xff] %v6400_v8  ;;  %7801 = vst [vmem:[#allocation10_spill] sm:$0xff] %v6406_v2 }
 0x1ce   :  { %v1644_v51 = vmax.f32 %v1637_v45, 0.0  ;;  %680 = vrot.lane.b32.xlu0 %v6064_v62, %s5237_s13  ;;  %v6391_v44 = vsel %vm1993_vm5, %v1999_v52, %v2002_v10  ;;  %v1553_v53 = vpop.f32.mrf.mxu0  ;;  %v1552_v16 = vadd.f32 %v1551_v27, %v1480_v7  ;;  %7802 = vst [vmem:[#allocation11_spill] sm:$0xff] %v6420_v1  ;;  %v6433_v7 = vld [vmem:[%s7745_s4 + $0x118] ss:$8 sps:$4 sm:$0xff]   ;;  %v6453_v27 = vld [vmem:[%s7745_s4 + $0x108] ss:$8 sps:$4 sm:$0xff]  }
 0x1cf   :  { %v1482_v5 = vpop.f32.mrf.mxu1  ;;  %2300 = vmatpush1.bf16.msra.mxu1 %v6380_v20  ;;  %7804 = vst [vmem:[#allocation13_spill] sm:$0xff] %v6433_v7  ;;  %7806 = vst [vmem:[#allocation15_spill] sm:$0xff] %v6453_v27 }
 0x1d0   :  { %682 = vrot.lane.b32.xlu1 %v6074_v19, %s5237_s13  ;;  %v6395_v33 = vpack.c.bf16 %v1644_v51, %v1643_v59  ;;  %v1554_v38 = vpop.f32.mrf.mxu0  ;;  %v2004_v19 = vshrl.u32 %v1647_v49, 16  ;;  %2301 = vmatprep.subr.bf16.mxu1 %v6400_v8 }
 0x1d1   :  { %v1483_v35 = vpop.f32.mrf.mxu1 }
 0x1d2   :  { %1594 = vrot.lane.b32.xlu0 %v6385_v40, %s5237_s13  ;;  %4363 = vmatmul.mubr.msk.bf16.gmra.mxu1 %vm1746_vm3, %v6395_v33  ;;  %v2007_v57 = vshll.u32 %v6395_v33, 16  ;;  %v7764_v4 = vrot.slane %v6395_v33, 1  ;;  %v2006_v45 = vor.u32 %v2004_v19, %v2002_v10 }
 0x1d3   :  { %1972 = vmatprep.mubr.bf16.mxu1 %v7765_v46  ;;  %2302 = vmatpush1.bf16.msra.mxu1 %v6406_v2 }
 0x1d4   :  { %1596 = vrot.lane.b32.xlu1 %v1552_v16, %s5237_s13  ;;  %v6422_v52 = vrot.slane %v2007_v57, 1  ;;  %v6427_v49 = vsel %vm2392_vm4, %v2394_v3, %v7764_v4  ;;  %2303 = vmatprep.subr.bf16.mxu1 %v6420_v1  ;;  %v6448_v3 = vld [vmem:[%s7745_s4 + $0x10c] ss:$8 sps:$4 sm:$0xff]  }
 0x1d5   :  { %7803 = vst [vmem:[#allocation12_spill] sm:$0xff] %v6427_v49  ;;  %7805 = vst [vmem:[#allocation14_spill] sm:$0xff] %v6448_v3 }
 0x1d6   :  { %983 = vrot.lane.b32.xlu0 %v6138_v47, %s5237_s13  ;;  %v6440_v10 = vsel %vm1993_vm5, %v2006_v45, %v6422_v52 }
 0x1d7   :  { %2304 = vmatpush1.bf16.msra.mxu1 %v6433_v7 }
 0x1d8   :  { %985 = vrot.lane.b32.xlu1 %v6140_v22, %s5237_s13  ;;  %2305 = vmatprep.subr.bf16.mxu1 %v6448_v3 }
 0x1db   :  { %2306 = vmatpush1.bf16.msra.mxu1 %v6453_v27 }
 0x1dc   :  { %4449 = vmatprep.subr.msk.bf16.mxu1 %vm1759_vm1, %v6169_v14 }
 0x1ef   :  { %v1269_v22 = vpop.permute.xlu0 %1268 }
 0x1f3   :  { %v1273_v59 = vpop.permute.xlu1 %1272  ;;  %v1271_v51 = vpop.permute.xlu0 %1270 }
 0x1f4   :  { %v1296_v7 = vsel %vm684_vm2, %v1269_v22, %v1271_v51 }
 0x1f5   :  { %v1310_v2 = vmax.f32 %v6142_v32, %v1296_v7 }
 0x1f7   :  { %v1275_v5 = vpop.permute.xlu1 %1274  ;;  %v1277_v53 = vpop.permute.xlu0 %1276 }
 0x1f8   :  { %v1297_v48 = vsel %vm684_vm2, %v1273_v59, %v1275_v5 }
 0x1f9   :  { %v1311_v13 = vmax.f32 %v6146_v39, %v1297_v48  ;;  %v4386_v39 = vcombine.low %v6298_v12, %v6298_v12  ;;  %v6491_v12 = vld [vmem:[%s7745_s4 + $0xf4] ss:$8 sps:$4 sm:$0xff]  }
 0x1fb   :  { %v1279_v35 = vpop.permute.xlu1 %1278  ;;  %v1281_v38 = vpop.permute.xlu0 %1280 }
 0x1fc   :  { %v1298_v22 = vsel %vm684_vm2, %v1277_v53, %v1279_v35 }
 0x1ff   :  { %v1283_v16 = vpop.permute.xlu1 %1282  ;;  %v1285_v19 = vpop.permute.xlu0 %1284 }
 0x203   :  { %v1287_v57 = vpop.permute.xlu1 %1286  ;;  %v1289_v45 = vpop.permute.xlu0 %1288 }
 0x204   :  { %v1300_v59 = vsel %vm684_vm2, %v1285_v19, %v1287_v57 }
 0x207   :  { %v1291_v4 = vpop.permute.xlu1 %1290  ;;  %v6459_v46 = vpop.permute.xlu0 %1292 }
 0x20b   :  { %v6461_v3 = vpop.permute.xlu1 %1294 }
 0x228   :  { %v1571_v27 = vpop.permute.xlu0 %1570 }
 0x22a   :  { %v1573_v14 = vpop.permute.xlu1 %1572 }
 0x22b   :  { %v1598_v1 = vsel %vm684_vm2, %v1571_v27, %v1573_v14 }
 0x22c   :  { %v1612_v8 = vmax.f32 %v6250_v24, %v1598_v1  ;;  %v1575_v20 = vpop.permute.xlu0 %1574  ;;  %v1312_v1 = vmax.f32 %v6151_v50, %v1298_v22  ;;  %v6512_v22 = vld [vmem:[%s7745_s4 + $0xe4] ss:$8 sps:$4 sm:$0xff]  }
 0x22e   :  { %v1619_v34 = vmax.f32 %v1310_v2, %v1612_v8  ;;  %v1577_v60 = vpop.permute.xlu1 %1576 }
 0x22f   :  { %v1599_v25 = vsel %vm684_vm2, %v1575_v20, %v1577_v60 }
 0x230   :  { %v1613_v49 = vmax.f32 %v6276_v6, %v1599_v25  ;;  %v1579_v21 = vpop.permute.xlu0 %1578  ;;  %v1650_v27 = vadd.f32 %v6269_v37, %v1619_v34  ;;  %v1299_v6 = vsel %vm684_vm2, %v1281_v38, %v1283_v16  ;;  %v6503_v38 = vld [vmem:[%s7745_s4 + $0xf0] ss:$8 sps:$4 sm:$0xff]   ;;  %v1314_v16 = vmax.f32 %v6161_v0, %v1300_v59  ;;  %v6557_v59 = vld [vmem:[%s7745_s4 + $0xc0] ss:$8 sps:$4 sm:$0xff]  }
 0x232   :  { %v1620_v51 = vmax.f32 %v1311_v13, %v1613_v49  ;;  %v1581_v32 = vpop.permute.xlu1 %1580  ;;  %v1657_v25 = vmax.f32 %v1650_v27, 0.0  ;;  %v1301_v27 = vsel %vm684_vm2, %v1289_v45, %v1291_v4  ;;  %v6530_v45 = vld [vmem:[%s7745_s4 + $0xd4] ss:$8 sps:$4 sm:$0xff]  }
 0x233   :  { %v1600_v24 = vsel %vm684_vm2, %v1579_v21, %v1581_v32  ;;  %v1313_v21 = vmax.f32 %v6156_v61, %v1299_v6 }
 0x234   :  { %v1651_v8 = vadd.f32 %v6269_v37, %v1620_v51  ;;  %v1614_v2 = vmax.f32 %v6288_v41, %v1600_v24  ;;  %v1583_v60 = vpop.permute.xlu0 %1582  ;;  %v6486_v41 = vsel %vm1759_vm1, %v4386_v39, 0 }
 0x236   :  { %v1658_v48 = vmax.f32 %v1651_v8, 0.0  ;;  %v1621_v20 = vmax.f32 %v1312_v1, %v1614_v2  ;;  %v1585_v34 = vpop.permute.xlu1 %1584  ;;  %v1315_v8 = vmax.f32 %v6171_v17, %v1301_v27  ;;  %v6540_v17 = vld [vmem:[%s7745_s4 + $0xd0] ss:$8 sps:$4 sm:$0xff]  }
 0x237   :  { %v1601_v13 = vsel %vm684_vm2, %v1583_v60, %v1585_v34  ;;  %v1302_v34 = vsel %vm684_vm2, %v6459_v46, %v6461_v3  ;;  %v6567_v46 = vld [vmem:[%s7745_s4 + $0xb4] ss:$8 sps:$4 sm:$0xff]  }
 0x238   :  { %v6482_v49 = vpack.c.bf16 %v1658_v48, %v1657_v25  ;;  %v1615_v50 = vmax.f32 %v6306_v28, %v1601_v13  ;;  %v1587_v7 = vpop.permute.xlu0 %1586  ;;  %v1652_v5 = vadd.f32 %v6269_v37, %v1621_v20  ;;  %v7807_v28 = vmov 0   ;;  %v6547_v20 = vld [vmem:[%s7745_s4 + $0xc4] ss:$8 sps:$4 sm:$0xff]  }
 0x23a   :  { %v1622_v53 = vmax.f32 %v1313_v21, %v1615_v50  ;;  %v1589_v35 = vpop.permute.xlu1 %1588  ;;  %4344 = vmatmul.mubr.msk.bf16.vlgmr.msra.gmra.mxu0 %vm1746_vm3, %v6482_v49  ;;  %v1659_v51 = vmax.f32 %v1652_v5, 0.0  ;;  %v1316_v5 = vmax.f32 %v6192_v30, %v1302_v34 }
 0x23b   :  { %v1602_v61 = vsel %vm684_vm2, %v1587_v7, %v1589_v35  ;;  %1808 = vmatprep.mubr.bf16.mxu0 %v7807_v28  ;;  %2099 = vmatpush1.bf16.msra.mxu0 %v6486_v41 }
 0x23c   :  { %v1653_v19 = vadd.f32 %v6269_v37, %v1622_v53  ;;  %v1616_v57 = vmax.f32 %v6332_v56, %v1602_v61  ;;  %v1591_v14 = vpop.permute.xlu0 %1590  ;;  %2100 = vmatprep.subr.bf16.mxu0 %v6491_v12  ;;  %v6520_v56 = vld [vmem:[%s7745_s4 + $0xe0] ss:$8 sps:$4 sm:$0xff]   ;;  %v4431_v61 = vld [vmem:[%s7745_s4 + $0x1b0] sm:$0x33] }
 0x23e   :  { %v1660_v32 = vmax.f32 %v1653_v19, 0.0  ;;  %v1623_v24 = vmax.f32 %v1314_v16, %v1616_v57  ;;  %v1593_v1 = vpop.permute.xlu1 %1592  ;;  %v6581_v57 = vld [vmem:[%s7745_s4 + $0xb0] ss:$8 sps:$4 sm:$0xff]  }
 0x23f   :  { %v1603_v0 = vsel %vm684_vm2, %v1591_v14, %v1593_v1  ;;  %2101 = vmatpush1.bf16.msra.mxu0 %v6503_v38 }
 0x240   :  { %v6523_v2 = vpack.c.bf16 %v1660_v32, %v1659_v51  ;;  %v1617_v60 = vmax.f32 %v6347_v36, %v1603_v0  ;;  %v681_v4 = vpop.permute.xlu0 %680  ;;  %2102 = vmatprep.subr.bf16.mxu0 %v6512_v22  ;;  %v1654_v39 = vadd.f32 %v6269_v37, %v1623_v24  ;;  %v6587_v32 = vcombine.high %v4431_v61, %v4431_v61 }
 0x242   :  { %v1624_v6 = vmax.f32 %v1315_v8, %v1617_v60  ;;  %v683_v25 = vpop.permute.xlu1 %682  ;;  %4345 = vmatmul.mubr.msk.bf16.gmra.mxu0 %vm1746_vm3, %v6523_v2  ;;  %v1661_v13 = vmax.f32 %v1654_v39, 0.0  ;;  %v2197_v39 = vshll.u32 %v6523_v2, 16 }
 0x243   :  { %1818 = vmatprep.mubr.bf16.mxu0 %v7807_v28  ;;  %2103 = vmatpush1.bf16.msra.mxu0 %v6520_v56  ;;  %v691_v3 = vsel %vm684_vm2, %v681_v4, %v683_v25  ;;  %v4442_v4 = vcombine.low %v4431_v61, %v4431_v61  ;;  %v6611_v25 = vld [vmem:[%s7745_s4 + $0x1a4] ss:$8 sps:$4 sm:$0xff]  }
 0x244   :  { %v1655_v36 = vadd.f32 %v6269_v37, %v1624_v6  ;;  %v1595_v48 = vpop.permute.xlu0 %1594  ;;  %2104 = vmatprep.subr.bf16.mxu0 %v6530_v45  ;;  %v705_v14 = vmax.f32 %v6064_v62, %v691_v3  ;;  %v2201_v3 = vshrl.u32 %v6523_v2, 16 }
 0x245   :  { %v6606_v6 = vsel %vm1759_vm1, %v4442_v4, 0 }
 0x246   :  { %v1662_v21 = vmax.f32 %v1655_v36, 0.0  ;;  %v1597_v50 = vpop.permute.xlu1 %1596  ;;  %v2191_v36 = vshrl.u32 %v6482_v49, 16 }
 0x247   :  { %v1604_v7 = vsel %vm684_vm2, %v1595_v48, %v1597_v50  ;;  %2105 = vmatpush1.bf16.msra.mxu0 %v6540_v17  ;;  %v2199_v48 = vrot.slane %v2197_v39, 1  ;;  %v7818_v39 = vld [vmem:[#allocation10_spill] sm:$0xff] }
 0x248   :  { %v6560_v53 = vpack.c.bf16 %v1662_v21, %v1661_v13  ;;  %v1618_v35 = vmax.f32 %v6385_v40, %v1604_v7  ;;  %2106 = vmatprep.subr.bf16.mxu0 %v6547_v20  ;;  %v984_v19 = vpop.permute.xlu0 %983  ;;  %v6621_v13 = vld [vmem:[%s7745_s4 + $0x1a0] ss:$8 sps:$4 sm:$0xff]   ;;  %v6627_v21 = vld [vmem:[%s7745_s4 + $0x194] ss:$8 sps:$4 sm:$0xff]  }
 0x24a   :  { %v1625_v16 = vmax.f32 %v1316_v5, %v1618_v35  ;;  %v986_v30 = vpop.permute.xlu1 %985  ;;  %4346 = vmatmul.mubr.msk.bf16.gmra.mxu0 %vm1746_vm3, %v6560_v53  ;;  %v2204_v7 = vshll.u32 %v6560_v53, 16  ;;  %v6640_v5 = vld [vmem:[%s7745_s4 + $0x190] ss:$8 sps:$4 sm:$0xff]   ;;  %v6647_v35 = vld [vmem:[%s7745_s4 + $0x184] ss:$8 sps:$4 sm:$0xff]  }
 0x24b   :  { %v993_v40 = vsel %vm684_vm2, %v984_v19, %v986_v30  ;;  %1828 = vmatprep.mubr.bf16.mxu0 %v7807_v28  ;;  %2107 = vmatpush1.bf16.msra.mxu0 %v6557_v59  ;;  %v2203_v19 = vor.u32 %v2201_v3, %v2199_v48 }
 0x24c   :  { %v1656_v27 = vadd.f32 %v6269_v37, %v1625_v16  ;;  %v1007_v51 = vmax.f32 %v6138_v47, %v993_v40  ;;  %2108 = vmatprep.subr.bf16.mxu0 %v6567_v46  ;;  %v2193_v47 = vshll.u32 %v6482_v49, 16  ;;  %v2206_v61 = vrot.slane %v2204_v7, 1 }
 0x24d   :  { %v2011_v40 = vshrl.u32 %v6395_v33, 16 }
 0x24e   :  { %v1663_v24 = vmax.f32 %v1656_v27, 0.0  ;;  %v1014_v1 = vmax.f32 %v705_v14, %v1007_v51  ;;  %v6669_v30 = vsel %vm1993_vm5, %v2203_v19, %v2206_v61  ;;  %v6682_v51 = vld [vmem:[%s7745_s4 + $0x170] ss:$8 sps:$4 sm:$0xff]  }
 0x24f   :  { %2109 = vmatpush1.bf16.msra.mxu0 %v6581_v57 }
 0x250   :  { %v6590_v0 = vpack.c.bf16 %v1663_v24, %v1663_v24  ;;  %v1638_v8 = vadd.f32 %v6269_v37, %v1014_v1  ;;  %4444 = vmatprep.subr.msk.bf16.mxu0 %vm1759_vm1, %v6587_v32  ;;  %v2195_v37 = vrot.slane %v2193_v47, 1  ;;  %v2208_v24 = vshrl.u32 %v6560_v53, 16 }
 0x252   :  { %v1645_v62 = vmax.f32 %v1638_v8, 0.0  ;;  %4347 = vmatmul.mubr.msk.bf16.gmra.mxu0 %vm1746_vm3, %v6590_v0  ;;  %v2196_v34 = vor.u32 %v2195_v37, %v2191_v36  ;;  %v2211_v27 = vshll.u32 %v6590_v0, 16  ;;  %v2210_v8 = vor.u32 %v2208_v24, %v2206_v61  ;;  %v7819_v37 = vld [vmem:[#allocation11_spill] sm:$0xff] }
 0x253   :  { %2126 = vmatprep.mubr.bf16.mxu0 %v7807_v28  ;;  %v7822_v36 = vld [vmem:[#allocation15_spill] sm:$0xff] }
 0x254   :  { %v6599_v60 = vpack.c.bf16 %v1645_v62, %v1645_v62  ;;  %v6630_v50 = vsel %vm1993_vm5, %v2196_v34, %v2199_v48  ;;  %v2213_v1 = vrot.slane %v2211_v27, 1  ;;  %v2875_v48 = vrot.slane %v6523_v2, 1 }
 0x255   :  { %v2874_v34 = vrot.slane %v6482_v49, 1 }
 0x256   :  { %4364 = vmatmul.mubr.msk.bf16.gmra.mxu1 %vm1746_vm3, %v6599_v60  ;;  %v2014_v16 = vshll.u32 %v6599_v60, 16  ;;  %v6708_v62 = vsel %vm1993_vm5, %v2210_v8, %v2213_v1  ;;  %v6760_v4 = vrot.slane %v6599_v60, 1 }
 0x257   :  { %2323 = vmatprep.mubr.bf16.mxu1 %v7807_v28 }
 0x258   :  { %v2016_v14 = vrot.slane %v2014_v16, 1 }
 0x25a   :  { %4389 = vmatmul.mubr.msk.bf16.vlgmr.msra.gmra.mxu0 %vm1746_vm3, %v6391_v44 }
 0x25b   :  { %2136 = vmatprep.mubr.bf16.mxu0 %v7807_v28  ;;  %2478 = vmatpush1.bf16.msra.mxu0 %v6606_v6 }
 0x25c   :  { %2479 = vmatprep.subr.bf16.mxu0 %v6611_v25 }
 0x25e   :  { %4417 = vmatmul.mubr.msk.bf16.vlgmr.msra.gmra.mxu1 %vm1746_vm3, %v6630_v50 }
 0x25f   :  { %2333 = vmatprep.mubr.bf16.mxu1 %v7807_v28  ;;  %2480 = vmatpush1.bf16.msra.mxu0 %v6621_v13 }
 0x260   :  { %2563 = vmatpush1.bf16.msra.mxu1 %v6181_v26  ;;  %2481 = vmatprep.subr.bf16.mxu0 %v6627_v21  ;;  %v6659_v26 = vld [vmem:[%s7745_s4 + $0x180] ss:$8 sps:$4 sm:$0xff]  }
 0x261   :  { %2564 = vmatprep.subr.bf16.mxu1 %v6176_v23  ;;  %v6666_v23 = vld [vmem:[%s7745_s4 + $0x174] ss:$8 sps:$4 sm:$0xff]  }
 0x262   :  { %4390 = vmatmul.mubr.msk.bf16.gmra.mxu0 %vm1746_vm3, %v6440_v10 }
 0x263   :  { %2146 = vmatprep.mubr.bf16.mxu0 %v7807_v28  ;;  %2482 = vmatpush1.bf16.msra.mxu0 %v6640_v5 }
 0x264   :  { %2565 = vmatpush1.bf16.msra.mxu1 %v6190_v29  ;;  %2483 = vmatprep.subr.bf16.mxu0 %v6647_v35  ;;  %v2013_v29 = vor.u32 %v2011_v40, %v6422_v52 }
 0x265   :  { %2566 = vmatprep.subr.bf16.mxu1 %v6214_v55  ;;  %v6689_v55 = vld [vmem:[%s7745_s4 + $0x164] ss:$8 sps:$4 sm:$0xff]  }
 0x266   :  { %4418 = vmatmul.mubr.msk.bf16.gmra.mxu1 %vm1746_vm3, %v6669_v30  ;;  %v6692_v52 = vsel %vm1993_vm5, %v2013_v29, %v2016_v14 }
 0x267   :  { %2343 = vmatprep.mubr.bf16.mxu1 %v7807_v28  ;;  %2484 = vmatpush1.bf16.msra.mxu0 %v6659_v26 }
 0x268   :  { %2567 = vmatpush1.bf16.msra.mxu1 %v6209_v54  ;;  %2485 = vmatprep.subr.bf16.mxu0 %v6666_v23  ;;  %v6703_v54 = vld [vmem:[%s7745_s4 + $0x160] ss:$8 sps:$4 sm:$0xff]  }
 0x269   :  { %2568 = vmatprep.subr.bf16.mxu1 %v6223_v58  ;;  %v2018_v58 = vshrl.u32 %v6599_v60, 16 }
 0x26a   :  { %4391 = vmatmul.mubr.msk.bf16.gmra.mxu0 %vm1746_vm3, %v6692_v52 }
 0x26b   :  { %2156 = vmatprep.mubr.bf16.mxu0 %v7807_v28  ;;  %2486 = vmatpush1.bf16.msra.mxu0 %v6682_v51  ;;  %v2020_v47 = vor.u32 %v2018_v58, %v2016_v14 }
 0x26c   :  { %2569 = vmatpush1.bf16.msra.mxu1 %v6228_v63  ;;  %2487 = vmatprep.subr.bf16.mxu0 %v6689_v55  ;;  %v2215_v63 = vshrl.u32 %v6590_v0, 16 }
 0x26d   :  { %2570 = vmatprep.subr.bf16.mxu1 %v6237_v9 }
 0x26e   :  { %4419 = vmatmul.mubr.msk.bf16.gmra.mxu1 %vm1746_vm3, %v6708_v62  ;;  %v6723_v9 = vor.u32 %v2215_v63, %v2213_v1 }
 0x26f   :  { %2353 = vmatprep.mubr.bf16.mxu1 %v7807_v28  ;;  %2488 = vmatpush1.bf16.msra.mxu0 %v6703_v54 }
 0x270   :  { %2571 = vmatpush1.bf16.msra.mxu1 %v6243_v15  ;;  %4454 = vmatprep.subr.msk.bf16.mxu0 %vm1759_vm1, %v6066_v18  ;;  %v7808_v18 = vld [vmem:[#allocation2_spill] sm:$0xff] }
 0x271   :  { %2572 = vmatprep.subr.bf16.mxu1 %v6255_v42  ;;  %v5227_v15 = vld [vmem:[%s7745_s4 + $0x44] ss:$8 sps:$4 sm:$0xff]   ;;  %v5228_v42 = vld [vmem:[%s7745_s4 + $0x40] ss:$8 sps:$4 sm:$0xff]  }
 0x272   :  { %4392 = vmatmul.mubr.msk.bf16.gmra.mxu0 %vm1746_vm3, %v2020_v47 }
 0x273   :  { %2505 = vmatprep.mubr.bf16.mxu0 %v7807_v28 }
 0x274   :  { %2573 = vmatpush1.bf16.msra.mxu1 %v6261_v31  ;;  %v5229_v31 = vld [vmem:[%s7745_s4 + $0x34] ss:$8 sps:$4 sm:$0xff]  }
 0x275   :  { %4459 = vmatprep.subr.msk.bf16.mxu1 %vm1759_vm1, %v6311_v43  ;;  %v7809_v43 = vld [vmem:[#allocation12_spill] sm:$0xff] }
 0x276   :  { %4420 = vmatmul.mubr.msk.bf16.gmra.mxu1 %vm1746_vm3, %v6723_v9 }
 0x277   :  { %2590 = vmatprep.mubr.bf16.mxu1 %v7807_v28 }
 0x27a   :  { %4445 = vmatmul.mubr.msk.bf16.vlgmr.msra.gmra.mxu0 %vm1746_vm3, %v6383_v11 }
 0x27b   :  { %2515 = vmatprep.mubr.bf16.mxu0 %v7807_v28  ;;  %2634 = vmatpush1.bf16.msra.mxu0 %v7808_v18 }
 0x27c   :  { %2635 = vmatprep.subr.bf16.mxu0 %v5227_v15 }
 0x27e   :  { %4450 = vmatmul.mubr.msk.bf16.vlgmr.msra.gmra.mxu1 %vm1746_vm3, %v6391_v44  ;;  %v5230_v44 = vld [vmem:[%s7745_s4 + $0x30] ss:$8 sps:$4 sm:$0xff]  }
 0x27f   :  { %2600 = vmatprep.mubr.bf16.mxu1 %v7807_v28  ;;  %2636 = vmatpush1.bf16.msra.mxu0 %v5228_v42 }
 0x280   :  { %2705 = vmatpush1.bf16.msra.mxu1 %v6486_v41  ;;  %2637 = vmatprep.subr.bf16.mxu0 %v5229_v31  ;;  %v5231_v41 = vld [vmem:[%s7745_s4 + $0x24] ss:$8 sps:$4 sm:$0xff]  }
 0x281   :  { %2706 = vmatprep.subr.bf16.mxu1 %v6491_v12  ;;  %v5232_v12 = vld [vmem:[%s7745_s4 + $0x20] ss:$8 sps:$4 sm:$0xff]  }
 0x282   :  { %4446 = vmatmul.mubr.msk.bf16.gmra.mxu0 %vm1746_vm3, %v7809_v43 }
 0x283   :  { %2525 = vmatprep.mubr.bf16.mxu0 %v7807_v28  ;;  %2638 = vmatpush1.bf16.msra.mxu0 %v5230_v44 }
 0x284   :  { %2707 = vmatpush1.bf16.msra.mxu1 %v6503_v38  ;;  %2639 = vmatprep.subr.bf16.mxu0 %v5231_v41  ;;  %v5233_v38 = vld [vmem:[%s7745_s4 + $0x14] ss:$8 sps:$4 sm:$0xff]  }
 0x285   :  { %2708 = vmatprep.subr.bf16.mxu1 %v6512_v22  ;;  %v7810_v22 = vrot.slane %v6395_v33, 1  ;;  %v5235_v33 = vld [vmem:[%s7745_s4 + $0x4] ss:$8 sps:$4 sm:$0xff]  }
 0x286   :  { %4451 = vmatmul.mubr.msk.bf16.gmra.mxu1 %vm1746_vm3, %v6440_v10  ;;  %v5234_v10 = vld [vmem:[%s7745_s4 + $0x10] ss:$8 sps:$4 sm:$0xff]  }
 0x287   :  { %2610 = vmatprep.mubr.bf16.mxu1 %v7807_v28  ;;  %2640 = vmatpush1.bf16.msra.mxu0 %v5232_v12  ;;  %v6777_v60 = vsel %vm2392_vm4, %v7810_v22, %v6760_v4 }
 0x288   :  { %2709 = vmatpush1.bf16.msra.mxu1 %v6520_v56  ;;  %2641 = vmatprep.subr.bf16.mxu0 %v5233_v38  ;;  %v5236_v56 = vld [vmem:[%s7745_s4] ss:$8 sps:$4 sm:$0xff]   ;;  %s5239_s4 = smov 48  }
 0x289   :  { %2710 = vmatprep.subr.bf16.mxu1 %v6530_v45  ;;  %v7811_v45 = vld [vmem:[#allocation7_spill] sm:$0xff] }
 0x28a   :  { %4447 = vmatmul.mubr.msk.bf16.gmra.mxu0 %vm1746_vm3, %v6777_v60 }
 0x28b   :  { %2535 = vmatprep.mubr.bf16.mxu0 %v7807_v28  ;;  %2642 = vmatpush1.bf16.msra.mxu0 %v5234_v10 }
 0x28c   :  { %2711 = vmatpush1.bf16.msra.mxu1 %v6540_v17  ;;  %2643 = vmatprep.subr.bf16.mxu0 %v5235_v33  ;;  %v7812_v17 = vld [vmem:[#allocation3_spill] sm:$0xff] }
 0x28d   :  { %2712 = vmatprep.subr.bf16.mxu1 %v6547_v20  ;;  %v7813_v20 = vld [vmem:[#allocation4_spill] sm:$0xff] }
 0x28e   :  { %4452 = vmatmul.mubr.msk.bf16.gmra.mxu1 %vm1746_vm3, %v6692_v52 }
 0x28f   :  { %2620 = vmatprep.mubr.bf16.mxu1 %v7807_v28  ;;  %2644 = vmatpush1.bf16.msra.mxu0 %v5236_v56 }
 0x290   :  { %2713 = vmatpush1.bf16.msra.mxu1 %v6557_v59  ;;  %4464 = vmatprep.subr.msk.bf16.mxu0 %vm1759_vm1, %v7811_v45  ;;  %v7814_v59 = vld [vmem:[#allocation5_spill] sm:$0xff] }
 0x291   :  { %2714 = vmatprep.subr.bf16.mxu1 %v6567_v46  ;;  %v7815_v46 = vld [vmem:[#allocation6_spill] sm:$0xff] }
 0x292   :  { %4448 = vmatmul.mubr.msk.bf16.gmra.mxu0 %vm1746_vm3, %v6760_v4 }
 0x293   :  { %2661 = vmatprep.mubr.bf16.mxu0 %v7807_v28 }
 0x294   :  { %2715 = vmatpush1.bf16.msra.mxu1 %v6581_v57  ;;  %v7816_v57 = vld [vmem:[#allocation8_spill] sm:$0xff] }
 0x295   :  { %4469 = vmatprep.subr.msk.bf16.mxu1 %vm1759_vm1, %v6587_v32  ;;  %v7817_v32 = vld [vmem:[#allocation9_spill] sm:$0xff] }
 0x296   :  { %4453 = vmatmul.mubr.msk.bf16.gmra.mxu1 %vm1746_vm3, %v2020_v47 }
 0x297   :  { %2732 = vmatprep.mubr.bf16.mxu1 %v7807_v28 }
 0x29a   :  { %4455 = vmatmul.mubr.msk.bf16.vlgmr.msra.gmra.mxu0 %vm1746_vm3, %v6482_v49 }
 0x29b   :  { %2671 = vmatprep.mubr.bf16.mxu0 %v7807_v28  ;;  %2790 = vmatpush1.bf16.msra.mxu0 %v7812_v17 }
 0x29c   :  { %2791 = vmatprep.subr.bf16.mxu0 %v7813_v20 }
 0x29e   :  { %4460 = vmatmul.mubr.msk.bf16.vlgmr.msra.gmra.mxu1 %vm1746_vm3, %v6630_v50 }
 0x29f   :  { %2742 = vmatprep.mubr.bf16.mxu1 %v7807_v28  ;;  %2792 = vmatpush1.bf16.msra.mxu0 %v7814_v59 }
 0x2a0   :  { %2898 = vmatpush1.bf16.msra.mxu1 %v6606_v6  ;;  %2793 = vmatprep.subr.bf16.mxu0 %v7815_v46  ;;  %v7820_v6 = vld [vmem:[#allocation13_spill] sm:$0xff] }
 0x2a1   :  { %2899 = vmatprep.subr.bf16.mxu1 %v6611_v25  ;;  %v7821_v25 = vld [vmem:[#allocation14_spill] sm:$0xff] }
 0x2a2   :  { %4456 = vmatmul.mubr.msk.bf16.gmra.mxu0 %vm1746_vm3, %v6523_v2 }
 0x2a3   :  { %2681 = vmatprep.mubr.bf16.mxu0 %v7807_v28  ;;  %2794 = vmatpush1.bf16.msra.mxu0 %v7816_v57 }
 0x2a4   :  { %2900 = vmatpush1.bf16.msra.mxu1 %v6621_v13  ;;  %2795 = vmatprep.subr.bf16.mxu0 %v7817_v32  ;;  %v2876_v13 = vsel %vm2392_vm4, %v2874_v34, %v2875_v48 }
 0x2a5   :  { %2901 = vmatprep.subr.bf16.mxu1 %v6627_v21  ;;  %v2877_v21 = vrot.slane %v6560_v53, 1 }
 0x2a6   :  { %4461 = vmatmul.mubr.msk.bf16.gmra.mxu1 %vm1746_vm3, %v6669_v30 }
 0x2a7   :  { %2752 = vmatprep.mubr.bf16.mxu1 %v7807_v28  ;;  %2796 = vmatpush1.bf16.msra.mxu0 %v7818_v39  ;;  %v2878_v2 = vsel %vm2392_vm4, %v2875_v48, %v2877_v21 }
 0x2a8   :  { %2902 = vmatpush1.bf16.msra.mxu1 %v6640_v5  ;;  %2797 = vmatprep.subr.bf16.mxu0 %v7819_v37 }
 0x2a9   :  { %2903 = vmatprep.subr.bf16.mxu1 %v6647_v35 }
 0x2aa   :  { %4457 = vmatmul.mubr.msk.bf16.gmra.mxu0 %vm1746_vm3, %v6560_v53  ;;  %v1944_v53 = vpop.f32.mrf.mxu1 }
 0x2ab   :  { %2691 = vmatprep.mubr.bf16.mxu0 %v7807_v28  ;;  %2798 = vmatpush1.bf16.msra.mxu0 %v7820_v6 }
 0x2ac   :  { %2904 = vmatpush1.bf16.msra.mxu1 %v6659_v26  ;;  %2799 = vmatprep.subr.bf16.mxu0 %v7821_v25  ;;  %v1946_v50 = vpop.f32.mrf.mxu1 }
 0x2ad   :  { %2905 = vmatprep.subr.bf16.mxu1 %v6666_v23 }
 0x2ae   :  { %4462 = vmatmul.mubr.msk.bf16.gmra.mxu1 %vm1746_vm3, %v6708_v62  ;;  %v6880_v7 = vpop.f32.mrf.mxu1 }
 0x2af   :  { %2762 = vmatprep.mubr.bf16.mxu1 %v7807_v28  ;;  %2800 = vmatpush1.bf16.msra.mxu0 %v7822_v36 }
 0x2b0   :  { %2906 = vmatpush1.bf16.msra.mxu1 %v6682_v51 }
 0x2b1   :  { %2907 = vmatprep.subr.bf16.mxu1 %v6689_v55 }
 0x2b2   :  { %4458 = vmatmul.mubr.msk.bf16.gmra.mxu0 %vm1746_vm3, %v6590_v0 }
 0x2b3   :  { %2817 = vmatprep.mubr.bf16.mxu0 %v7807_v28 }
 0x2b4   :  { %2908 = vmatpush1.bf16.msra.mxu1 %v6703_v54 }
 0x2b6   :  { %4463 = vmatmul.mubr.msk.bf16.gmra.mxu1 %vm1746_vm3, %v6723_v9 }
 0x2b7   :  { %2925 = vmatprep.mubr.bf16.mxu1 %v7807_v28 }
 0x2ba   :  { %4465 = vmatmul.mubr.msk.bf16.vlgmr.msra.gmra.mxu0 %vm1746_vm3, %v6383_v11  ;;  %v2879_v11 = vrot.slane %v6590_v0, 1  ;;  %v6882_v0 = vpop.f32.mrf.mxu1 }
 0x2bb   :  { %2827 = vmatprep.mubr.bf16.mxu0 %v7807_v28 }
 0x2bc   :  { %v2880_v49 = vsel %vm2392_vm4, %v2877_v21, %v2879_v11  ;;  %v6884_v5 = vpop.f32.mrf.mxu1 }
 0x2be   :  { %4470 = vmatmul.mubr.msk.bf16.vlgmr.msra.gmra.mxu1 %vm1746_vm3, %v2876_v13  ;;  %v6886_v3 = vpop.f32.mrf.mxu1 }
 0x2bf   :  { %2935 = vmatprep.mubr.bf16.mxu1 %v7807_v28 }
 0x2c0   :  { %v6888_v19 = vpop.f32.mrf.mxu1 }
 0x2c2   :  { %4466 = vmatmul.mubr.msk.bf16.gmra.mxu0 %vm1746_vm3, %v7809_v43  ;;  %v6892_v23 = vpop.f32.mrf.mxu1 }
 0x2c3   :  { %2837 = vmatprep.mubr.bf16.mxu0 %v7807_v28 }
 0x2c4   :  { %v6898_v14 = vpop.f32.mrf.mxu1 }
 0x2c6   :  { %4471 = vmatmul.mubr.msk.bf16.gmra.mxu1 %vm1746_vm3, %v2878_v2  ;;  %v6904_v51 = vpop.f32.mrf.mxu1 }
 0x2c7   :  { %2945 = vmatprep.mubr.bf16.mxu1 %v7807_v28 }
 0x2c8   :  { %v6910_v24 = vpop.f32.mrf.mxu1 }
 0x2ca   :  { %4467 = vmatmul.mubr.msk.bf16.gmra.mxu0 %vm1746_vm3, %v6777_v60  ;;  %v6916_v54 = vpop.f32.mrf.mxu1 }
 0x2cb   :  { %2847 = vmatprep.mubr.bf16.mxu0 %v7807_v28 }
 0x2ce   :  { %4472 = vmatmul.mubr.msk.bf16.gmra.mxu1 %vm1746_vm3, %v2880_v49 }
 0x2cf   :  { %2955 = vmatprep.mubr.bf16.mxu1 %v7807_v28 }
 0x2d2   :  { %4468 = vmatmul.mubr.msk.bf16.gmra.mxu0 %vm1746_vm3, %v6760_v4 }
 0x2d6   :  { %4473 = vmatmul.mubr.msk.bf16.gmra.mxu1 %vm1746_vm3, %v2879_v11 }
 0x2fa   :  { %v1800_v35 = vpop.f32.mrf.mxu0 }
 0x2fb   :  { %v1945_v34 = vadd.f32 %v1944_v53, %v1800_v35 }
 0x2fc   :  { %v1802_v61 = vpop.f32.mrf.mxu0 }
 0x2fd   :  { %v1947_v2 = vadd.f32 %v1946_v50, %v1802_v61 }
 0x2fe   :  { %v1804_v16 = vpop.f32.mrf.mxu0 }
 0x300   :  { %v1806_v28 = vpop.f32.mrf.mxu0 }
 0x302   :  { %v6890_v26 = vpop.f32.mrf.mxu0 }
 0x303   :  { %v1955_v50 = vadd.f32 %v6884_v5, %v6890_v26 }
 0x304   :  { %v6894_v30 = vpop.f32.mrf.mxu0 }
 0x306   :  { %v6896_v40 = vpop.f32.mrf.mxu0 }
 0x308   :  { %v6900_v27 = vpop.f32.mrf.mxu0 }
 0x30a   :  { %v6902_v29 = vpop.f32.mrf.mxu0 }
 0x30c   :  { %v6906_v55 = vpop.f32.mrf.mxu0 }
 0x30e   :  { %v6908_v52 = vpop.f32.mrf.mxu0 }
 0x310   :  { %v6912_v1 = vpop.f32.mrf.mxu0 }
 0x312   :  { %v6914_v8 = vpop.f32.mrf.mxu0 }
 0x314   :  { %v6918_v62 = vpop.f32.mrf.mxu0 }
 0x315   :  { %7823 = vst [vmem:[#allocation2_spill] sm:$0xff] %v6918_v62  ;;  %v1951_v62 = vadd.f32 %v6882_v0, %v1806_v28  ;;  %v1957_v0 = vadd.f32 %v6886_v3, %v6894_v30  ;;  %v1961_v30 = vadd.f32 %v6892_v23, %v6900_v27  ;;  %v1967_v27 = vadd.f32 %v6904_v51, %v6906_v55 }
 0x316   :  { %v1834_v58 = vpop.f32.mrf.mxu0  ;;  %v6920_v47 = vpop.f32.mrf.mxu1  ;;  %v1971_v51 = vadd.f32 %v6916_v54, %v6912_v1  ;;  %v3142_v1 = vld [vmem:[%s7747_s6 + $0x48] sm:$0xff]  ;;  %v3141_v54 = vld [vmem:[%s7747_s6 + $0x40] sm:$0xff] }
 0x318   :  { %v1835_v63 = vpop.f32.mrf.mxu0  ;;  %v6922_v9 = vpop.f32.mrf.mxu1 }
 0x319   :  { %7824 = vst [vmem:[#allocation12_spill] sm:$0xff] %v6922_v9  ;;  %v1949_v63 = vadd.f32 %v6880_v7, %v1804_v16 }
 0x31a   :  { %v1978_v18 = vpop.f32.mrf.mxu1  ;;  %v2128_v15 = vpop.f32.mrf.mxu0 }
 0x31b   :  { %v2165_v11 = vadd.f32 %v2128_v15, %v1945_v34 }
 0x31c   :  { %v1979_v42 = vpop.f32.mrf.mxu1  ;;  %v2130_v31 = vpop.f32.mrf.mxu0 }
 0x31d   :  { %v2166_v18 = vadd.f32 %v2130_v31, %v1947_v2 }
 0x31e   :  { %v2132_v43 = vpop.f32.mrf.mxu0  ;;  %v2325_v44 = vpop.f32.mrf.mxu1 }
 0x31f   :  { %v2362_v42 = vadd.f32 %v2325_v44, %v2165_v11 }
 0x320   :  { %v2134_v41 = vpop.f32.mrf.mxu0  ;;  %v2327_v4 = vpop.f32.mrf.mxu1 }
 0x321   :  { %v2168_v61 = vadd.f32 %v2134_v41, %v1951_v62  ;;  %v1959_v62 = vadd.f32 %v6888_v19, %v6896_v40  ;;  %v1965_v40 = vadd.f32 %v6898_v14, %v6902_v29 }
 0x322   :  { %v2138_v12 = vpop.f32.mrf.mxu0  ;;  %v2329_v38 = vpop.f32.mrf.mxu1 }
 0x323   :  { %v2169_v28 = vadd.f32 %v2138_v12, %v1955_v50 }
 0x324   :  { %v2140_v22 = vpop.f32.mrf.mxu0  ;;  %v2331_v60 = vpop.f32.mrf.mxu1 }
 0x326   :  { %v2142_v10 = vpop.f32.mrf.mxu0  ;;  %v2335_v33 = vpop.f32.mrf.mxu1 }
 0x327   :  { %v2366_v44 = vadd.f32 %v2335_v33, %v2169_v28  ;;  %v2171_v12 = vadd.f32 %v2142_v10, %v1959_v62  ;;  %v3139_v62 = vld [vmem:[%s7747_s6 + $0x30] sm:$0xff] }
 0x328   :  { %v2144_v56 = vpop.f32.mrf.mxu0  ;;  %v2337_v45 = vpop.f32.mrf.mxu1 }
 0x32a   :  { %v6924_v17 = vpop.f32.mrf.mxu0  ;;  %v2339_v20 = vpop.f32.mrf.mxu1 }
 0x32b   :  { %v2368_v33 = vadd.f32 %v2339_v20, %v2171_v12  ;;  %v2173_v10 = vadd.f32 %v6924_v17, %v1965_v40 }
 0x32c   :  { %v6926_v59 = vpop.f32.mrf.mxu0  ;;  %v6928_v46 = vpop.f32.mrf.mxu1 }
 0x32d   :  { %v2174_v20 = vadd.f32 %v6926_v59, %v1967_v27 }
 0x32e   :  { %v6930_v57 = vpop.f32.mrf.mxu0  ;;  %v6932_v32 = vpop.f32.mrf.mxu1 }
 0x32f   :  { %v2370_v2 = vadd.f32 %v6932_v32, %v2173_v10  ;;  %v5240_v32 = vmov 0.0  }
 0x330   :  { %v6934_v39 = vpop.f32.mrf.mxu0  ;;  %v6936_v37 = vpop.f32.mrf.mxu1  ;;  %4720 = vmatprep.subr.mxu1 %v5240_v32  ;;  %4679 = vmatprep.subr.mxu0 %v5240_v32 }
 0x331   :  { %4721 = vmatpush3.msra.mxu1 %v3142_v1  ;;  %4740 = vmatprep.mubr.msk.f32.mxu1 %vm5241_vm6, %v5240_v32 }
 0x332   :  { %v6938_v6 = vpop.f32.mrf.mxu0  ;;  %v6940_v25 = vpop.f32.mrf.mxu1  ;;  %4722 = vmatprep.subr.mxu1 %v5240_v32  ;;  %4699 = vmatprep.mubr.msk.f32.mxu0 %vm5241_vm6, %v5240_v32 }
 0x333   :  { %7825 = vst [vmem:[#allocation7_spill] sm:$0xff] %v6938_v6  ;;  %7826 = vst [vmem:[#allocation3_spill] sm:$0xff] %v6940_v25  ;;  %v2363_v25 = vadd.f32 %v2327_v4, %v2166_v18  ;;  %v4484_v18 = vld [vmem:[%s7747_s6 + $0x98] sm:$0xff]  ;;  %4723 = vmatpush3.msra.mxu1 %v3141_v54 }
 0x334   :  { %v6942_v36 = vpop.f32.mrf.mxu0  ;;  %v6944_v48 = vpop.f32.mrf.mxu1  ;;  %4680 = vmatpush3.msra.mxu0 %v4484_v18  ;;  %4724 = vmatprep.subr.mxu1 %v5240_v32 }
 0x335   :  { %7827 = vst [vmem:[#allocation4_spill] sm:$0xff] %v6942_v36  ;;  %7828 = vst [vmem:[#allocation5_spill] sm:$0xff] %v6944_v48  ;;  %v2167_v36 = vadd.f32 %v2132_v43, %v1949_v63  ;;  %v2170_v43 = vadd.f32 %v2140_v22, %v1957_v0  ;;  %v2172_v22 = vadd.f32 %v2144_v56, %v1961_v30  ;;  %4681 = vmatprep.subr.mxu0 %v5240_v32 }
 0x336   :  { %v2162_v13 = vpop.f32.mrf.mxu0  ;;  %v6946_v21 = vpop.f32.mrf.mxu1  ;;  %v1969_v56 = vadd.f32 %v6910_v24, %v6908_v52  ;;  %v1975_v52 = vadd.f32 %v6920_v47, %v6914_v8 }
 0x337   :  { %v2364_v15 = vadd.f32 %v2329_v38, %v2167_v36  ;;  %v2367_v38 = vadd.f32 %v2337_v45, %v2170_v43  ;;  %v2369_v45 = vadd.f32 %v6928_v46, %v2172_v22 }
 0x338   :  { %v2163_v49 = vpop.f32.mrf.mxu0  ;;  %v6948_v58 = vpop.f32.mrf.mxu1  ;;  %v2175_v46 = vadd.f32 %v6930_v57, %v1969_v56  ;;  %v2176_v57 = vadd.f32 %v6934_v39, %v1971_v51  ;;  %v3140_v39 = vld [vmem:[%s7747_s6 + $0x38] sm:$0xff] }
 0x339   :  { %v2371_v49 = vadd.f32 %v6936_v37, %v2174_v20  ;;  %4725 = vmatpush3.msra.mxu1 %v3140_v39 }
 0x33a   :  { %v2359_v6 = vpop.f32.mrf.mxu1  ;;  %v2507_v9 = vpop.f32.mrf.mxu0  ;;  %v7829_v37 = vld [vmem:[#allocation3_spill] sm:$0xff]  ;;  %4726 = vmatprep.subr.mxu1 %v5240_v32 }
 0x33b   :  { %v6952_v48 = vadd.f32 %v2507_v9, %v2362_v42  ;;  %v2365_v9 = vadd.f32 %v2331_v60, %v2168_v61  ;;  %v2372_v8 = vadd.f32 %v7829_v37, %v2175_v46  ;;  %v7830_v42 = vld [vmem:[#allocation2_spill] sm:$0xff]  ;;  %4727 = vmatpush3.msra.mxu1 %v3139_v62 }
 0x33c   :  { %v2360_v53 = vpop.f32.mrf.mxu1  ;;  %v2509_v35 = vpop.f32.mrf.mxu0  ;;  %v7834_v43 = vld [vmem:[#allocation4_spill] sm:$0xff]  ;;  %4728 = vmatprep.subr.mxu1 %v5240_v32 }
 0x33d   :  { %v2545_v34 = vadd.f32 %v2509_v35, %v2363_v25  ;;  %2992 = vrot.lane.b32.xlu0 %v6952_v48, %s5239_s4  ;;  %v7831_v53 = vld [vmem:[#allocation12_spill] sm:$0xff] }
 0x33e   :  { %v2511_v7 = vpop.f32.mrf.mxu0  ;;  %v6958_v16 = vpop.f32.mrf.mxu1  ;;  %v1977_v35 = vadd.f32 %v7831_v53, %v7830_v42 }
 0x33f   :  { %v6962_v31 = vadd.f32 %v2511_v7, %v2364_v15  ;;  %2994 = vrot.lane.b32.xlu1 %v2545_v34, %s5239_s4  ;;  %v7832_v15 = vld [vmem:[#allocation7_spill] sm:$0xff]  ;;  %v7833_v7 = vld [vmem:[#allocation5_spill] sm:$0xff] }
 0x340   :  { %v2513_v5 = vpop.f32.mrf.mxu0  ;;  %v6965_v26 = vpop.f32.mrf.mxu1  ;;  %v2177_v34 = vadd.f32 %v7832_v15, %v1975_v52  ;;  %v2373_v0 = vadd.f32 %v7833_v7, %v2176_v57  ;;  %v3138_v15 = vld [vmem:[%s7747_s6 + $0x28] sm:$0xff] }
 0x341   :  { %v2547_v41 = vadd.f32 %v2513_v5, %v2365_v9  ;;  %2996 = vrot.lane.b32.xlu0 %v6962_v31, %s5239_s4  ;;  %4729 = vmatpush3.msra.mxu1 %v3138_v15 }
 0x342   :  { %v2517_v4 = vpop.f32.mrf.mxu0  ;;  %v6971_v3 = vpop.f32.mrf.mxu1  ;;  %4730 = vmatprep.subr.mxu1 %v5240_v32 }
 0x343   :  { %v6975_v60 = vadd.f32 %v2517_v4, %v2366_v44  ;;  %2998 = vrot.lane.b32.xlu1 %v2547_v41, %s5239_s4  ;;  %v2178_v44 = vadd.f32 %v7834_v43, %v1977_v35  ;;  %v2374_v41 = vadd.f32 %v6946_v21, %v2177_v34  ;;  %v4483_v34 = vld [vmem:[%s7747_s6 + $0x90] sm:$0xff]  ;;  %v3137_v43 = vld [vmem:[%s7747_s6 + $0x20] sm:$0xff] }
 0x344   :  { %v2519_v6 = vpop.f32.mrf.mxu0  ;;  %v6978_v19 = vpop.f32.mrf.mxu1  ;;  %4682 = vmatpush3.msra.mxu0 %v4483_v34  ;;  %4731 = vmatpush3.msra.mxu1 %v3137_v43  ;;  %v3134_v34 = vld [vmem:[%s7747_s6 + $0x8] sm:$0xff] }
 0x345   :  { %v2549_v25 = vadd.f32 %v2519_v6, %v2367_v38  ;;  %3000 = vrot.lane.b32.xlu0 %v6975_v60, %s5239_s4  ;;  %v2375_v38 = vadd.f32 %v6948_v58, %v2178_v44  ;;  %4683 = vmatprep.subr.mxu0 %v5240_v32  ;;  %v4482_v44 = vld [vmem:[%s7747_s6 + $0x88] sm:$0xff] }
 0x346   :  { %v2521_v36 = vpop.f32.mrf.mxu0  ;;  %v6984_v23 = vpop.f32.mrf.mxu1  ;;  %4684 = vmatpush3.msra.mxu0 %v4482_v44  ;;  %4732 = vmatprep.subr.mxu1 %v5240_v32 }
 0x347   :  { %v6990_v13 = vadd.f32 %v2521_v36, %v2368_v33  ;;  %3002 = vrot.lane.b32.xlu1 %v2549_v25, %s5239_s4  ;;  %4685 = vmatprep.subr.mxu0 %v5240_v32 }
 0x348   :  { %v2523_v14 = vpop.f32.mrf.mxu0  ;;  %v6993_v29 = vpop.f32.mrf.mxu1 }
 0x349   :  { %v2551_v11 = vadd.f32 %v2523_v14, %v2369_v45  ;;  %3004 = vrot.lane.b32.xlu0 %v6990_v13, %s5239_s4 }
 0x34a   :  { %v2527_v55 = vpop.f32.mrf.mxu0  ;;  %v7003_v17 = vpop.f32.mrf.mxu1 }
 0x34b   :  { %v7007_v63 = vadd.f32 %v2527_v55, %v2370_v2  ;;  %3006 = vrot.lane.b32.xlu1 %v2551_v11, %s5239_s4 }
 0x34c   :  { %v2529_v24 = vpop.f32.mrf.mxu0  ;;  %v7012_v59 = vpop.f32.mrf.mxu1 }
 0x34d   :  { %v2553_v47 = vadd.f32 %v2529_v24, %v2371_v49  ;;  %3008 = vrot.lane.b32.xlu0 %v7007_v63, %s5239_s4 }
 0x34e   :  { %v2531_v50 = vpop.f32.mrf.mxu0  ;;  %v7031_v61 = vpop.f32.mrf.mxu1 }
 0x34f   :  { %v7039_v28 = vadd.f32 %v2531_v50, %v2372_v8  ;;  %3010 = vrot.lane.b32.xlu1 %v2553_v47, %s5239_s4 }
 0x350   :  { %v2533_v9 = vpop.f32.mrf.mxu0  ;;  %v7042_v5 = vpop.f32.mrf.mxu1 }
 0x351   :  { %v2555_v4 = vadd.f32 %v2533_v9, %v2373_v0  ;;  %3012 = vrot.lane.b32.xlu0 %v7039_v28, %s5239_s4 }
 0x352   :  { %v2537_v30 = vpop.f32.mrf.mxu0  ;;  %v7053_v12 = vpop.f32.mrf.mxu1 }
 0x353   :  { %v7057_v6 = vadd.f32 %v2537_v30, %v2374_v41  ;;  %3014 = vrot.lane.b32.xlu1 %v2555_v4, %s5239_s4  ;;  %v3136_v30 = vld [vmem:[%s7747_s6 + $0x18] sm:$0xff] }
 0x354   :  { %v2539_v40 = vpop.f32.mrf.mxu0  ;;  %v7060_v22 = vpop.f32.mrf.mxu1  ;;  %4733 = vmatpush3.msra.mxu1 %v3136_v30 }
 0x355   :  { %v2557_v21 = vadd.f32 %v2539_v40, %v2375_v38  ;;  %3016 = vrot.lane.b32.xlu0 %v7057_v6, %s5239_s4  ;;  %v4481_v40 = vld [vmem:[%s7747_s6 + $0x80] sm:$0xff]  ;;  %4734 = vmatprep.subr.mxu1 %v5240_v32 }
 0x356   :  { %v2541_v33 = vpop.f32.mrf.mxu0  ;;  %v7065_v25 = vpop.f32.mrf.mxu1  ;;  %4686 = vmatpush3.msra.mxu0 %v4481_v40 }
 0x357   :  { %3018 = vrot.lane.b32.xlu1 %v2557_v21, %s5239_s4  ;;  %4687 = vmatprep.subr.mxu0 %v5240_v32 }
 0x358   :  { %v2542_v58 = vpop.f32.mrf.mxu0  ;;  %v7068_v36 = vpop.f32.mrf.mxu1 }
 0x359   :  { %v3135_v58 = vld [vmem:[%s7747_s6 + $0x10] sm:$0xff] }
 0x35a   :  { %v2626_v27 = vpop.f32.mrf.mxu1  ;;  %v2663_v10 = vpop.f32.mrf.mxu0  ;;  %4735 = vmatpush3.msra.mxu1 %v3135_v58 }
 0x35b   :  { %v2664_v38 = vadd.f32 %v2663_v10, %v6958_v16  ;;  %v4480_v16 = vld [vmem:[%s7747_s6 + $0x78] sm:$0xff]  ;;  %4736 = vmatprep.subr.mxu1 %v5240_v32 }
 0x35c   :  { %v2627_v45 = vpop.f32.mrf.mxu1  ;;  %v2665_v14 = vpop.f32.mrf.mxu0  ;;  %4688 = vmatpush3.msra.mxu0 %v4480_v16  ;;  %4737 = vmatpush3.msra.mxu1 %v3134_v34 }
 0x35d   :  { %v2666_v27 = vadd.f32 %v2665_v14, %v6965_v26  ;;  %4689 = vmatprep.subr.mxu0 %v5240_v32  ;;  %4738 = vmatprep.subr.mxu1 %v5240_v32 }
 0x35e   :  { %v2667_v56 = vpop.f32.mrf.mxu0  ;;  %v2734_v20 = vpop.f32.mrf.mxu1 }
 0x35f   :  { %v2771_v45 = vadd.f32 %v2734_v20, %v2664_v38  ;;  %v4479_v20 = vld [vmem:[%s7747_s6 + $0x70] sm:$0xff] }
 0x360   :  { %v7070_v2 = vpop.f32.mrf.mxu0  ;;  %v2736_v11 = vpop.f32.mrf.mxu1  ;;  %4690 = vmatpush3.msra.mxu0 %v4479_v20 }
 0x361   :  { %v2772_v26 = vadd.f32 %v2736_v11, %v2666_v27  ;;  %v2670_v43 = vadd.f32 %v7070_v2, %v6978_v19  ;;  %4691 = vmatprep.subr.mxu0 %v5240_v32  ;;  %v4478_v19 = vld [vmem:[%s7747_s6 + $0x68] sm:$0xff] }
 0x362   :  { %v7072_v51 = vpop.f32.mrf.mxu0  ;;  %v7074_v55 = vpop.f32.mrf.mxu1  ;;  %4692 = vmatpush3.msra.mxu0 %v4478_v19 }
 0x363   :  { %v2674_v2 = vadd.f32 %v7072_v51, %v6984_v23  ;;  %4693 = vmatprep.subr.mxu0 %v5240_v32  ;;  %v4477_v23 = vld [vmem:[%s7747_s6 + $0x60] sm:$0xff] }
 0x364   :  { %v7076_v46 = vpop.f32.mrf.mxu0  ;;  %v7078_v49 = vpop.f32.mrf.mxu1  ;;  %4694 = vmatpush3.msra.mxu0 %v4477_v23 }
 0x365   :  { %v2676_v51 = vadd.f32 %v7076_v46, %v6993_v29  ;;  %4695 = vmatprep.subr.mxu0 %v5240_v32 }
 0x366   :  { %v7080_v52 = vpop.f32.mrf.mxu0  ;;  %v7082_v24 = vpop.f32.mrf.mxu1 }
 0x367   :  { %v2678_v29 = vadd.f32 %v7080_v52, %v7003_v17 }
 0x368   :  { %v7084_v1 = vpop.f32.mrf.mxu0  ;;  %v7086_v54 = vpop.f32.mrf.mxu1 }
 0x369   :  { %v2680_v17 = vadd.f32 %v7084_v1, %v7012_v59 }
 0x36a   :  { %v7088_v57 = vpop.f32.mrf.mxu0  ;;  %v7090_v37 = vpop.f32.mrf.mxu1 }
 0x36b   :  { %v2777_v20 = vadd.f32 %v7090_v37, %v2678_v29 }
 0x36c   :  { %v7092_v8 = vpop.f32.mrf.mxu0  ;;  %v7094_v47 = vpop.f32.mrf.mxu1 }
 0x36d   :  { %v2686_v19 = vadd.f32 %v7092_v8, %v7042_v5 }
 0x36e   :  { %v7096_v18 = vpop.f32.mrf.mxu0  ;;  %v7098_v42 = vpop.f32.mrf.mxu1 }
 0x370   :  { %v7100_v53 = vpop.f32.mrf.mxu0  ;;  %v7102_v35 = vpop.f32.mrf.mxu1 }
 0x372   :  { %v7104_v50 = vpop.f32.mrf.mxu0  ;;  %v7106_v39 = vpop.f32.mrf.mxu1 }
 0x374   :  { %v7114_v7 = vpop.f32.mrf.mxu0  ;;  %v7116_v0 = vpop.f32.mrf.mxu1 }
 0x376   :  { %v2697_v9 = vpop.f32.mrf.mxu0  ;;  %v7120_v62 = vpop.f32.mrf.mxu1 }
 0x377   :  { %v2668_v9 = vadd.f32 %v2667_v56, %v6971_v3  ;;  %v3133_v3 = vld [vmem:[%s7747_s6] sm:$0xff] }
 0x378   :  { %v2698_v41 = vpop.f32.mrf.mxu0  ;;  %v7128_v4 = vpop.f32.mrf.mxu1  ;;  %4739 = vmatpush3.msra.mxu1 %v3133_v3  ;;  %v2684_v3 = vadd.f32 %v7088_v57, %v7031_v61 }
 0x379   :  { %v2773_v56 = vadd.f32 %v7074_v55, %v2668_v9  ;;  %v2774_v55 = vadd.f32 %v7078_v49, %v2670_v43  ;;  %v2775_v49 = vadd.f32 %v7082_v24, %v2674_v2  ;;  %4802 = vmatprep.subr.mxu1 %v5240_v32  ;;  %v2776_v24 = vadd.f32 %v7086_v54, %v2676_v51 }
 0x37a   :  { %v2768_v21 = vpop.f32.mrf.mxu1  ;;  %v2819_v33 = vpop.f32.mrf.mxu0  ;;  %v2779_v2 = vadd.f32 %v7098_v42, %v2684_v3  ;;  %v2690_v42 = vadd.f32 %v7100_v53, %v7060_v22 }
 0x37b   :  { %v2856_v14 = vadd.f32 %v2819_v33, %v2771_v45 }
 0x37c   :  { %v2769_v10 = vpop.f32.mrf.mxu1  ;;  %v2821_v15 = vpop.f32.mrf.mxu0 }
 0x37d   :  { %v2857_v11 = vadd.f32 %v2821_v15, %v2772_v26  ;;  %v4476_v10 = vld [vmem:[%s7747_s6 + $0x58] sm:$0xff]  ;;  %v4475_v26 = vld [vmem:[%s7747_s6 + $0x50] sm:$0xff] }
 0x37e   :  { %v2823_v44 = vpop.f32.mrf.mxu0  ;;  %v2927_v41 = vpop.f32.mrf.mxu1  ;;  %4696 = vmatpush3.msra.mxu0 %v4476_v10 }
 0x37f   :  { %v7164_v30 = vadd.f32 %v2927_v41, %v2856_v14  ;;  %v2858_v21 = vadd.f32 %v2823_v44, %v2773_v56  ;;  %4697 = vmatprep.subr.mxu0 %v5240_v32  ;;  %v2778_v56 = vadd.f32 %v7094_v47, %v2680_v17  ;;  %v2688_v47 = vadd.f32 %v7096_v18, %v7053_v12 }
 0x380   :  { %v2825_v38 = vpop.f32.mrf.mxu0  ;;  %v2929_v40 = vpop.f32.mrf.mxu1  ;;  %4698 = vmatpush3.msra.mxu0 %v4475_v26 }
 0x381   :  { %v2965_v33 = vadd.f32 %v2929_v40, %v2857_v11  ;;  %3056 = vrot.lane.b32.xlu0 %v7164_v30, %s5239_s4  ;;  %v2859_v45 = vadd.f32 %v2825_v38, %v2774_v55  ;;  %4761 = vmatprep.subr.mxu0 %v5240_v32  ;;  %v2780_v55 = vadd.f32 %v7102_v35, %v2686_v19 }
 0x382   :  { %v2829_v58 = vpop.f32.mrf.mxu0  ;;  %v2931_v27 = vpop.f32.mrf.mxu1  ;;  %v2781_v23 = vadd.f32 %v7106_v39, %v2688_v47  ;;  %v2694_v35 = vadd.f32 %v7104_v50, %v7065_v25  ;;  %v2696_v39 = vadd.f32 %v7114_v7, %v7068_v36 }
 0x383   :  { %v7186_v16 = vadd.f32 %v2931_v27, %v2858_v21  ;;  %3058 = vrot.lane.b32.xlu1 %v2965_v33, %s5239_s4  ;;  %v2860_v34 = vadd.f32 %v2829_v58, %v2775_v49  ;;  %v2782_v27 = vadd.f32 %v7116_v0, %v2690_v42  ;;  %v7268_v42 = vld [vmem:[%s7748_s5] ss:$0 sm:$0xff] }
 0x384   :  { %v2831_v46 = vpop.f32.mrf.mxu0  ;;  %v2933_v15 = vpop.f32.mrf.mxu1  ;;  %v2783_v10 = vadd.f32 %v7120_v62, %v2694_v35  ;;  %v2784_v0 = vadd.f32 %v7128_v4, %v2696_v39 }
 0x385   :  { %v2967_v9 = vadd.f32 %v2933_v15, %v2859_v45  ;;  %3060 = vrot.lane.b32.xlu0 %v7186_v16, %s5239_s4  ;;  %v2861_v54 = vadd.f32 %v2831_v46, %v2776_v24 }
 0x386   :  { %v2833_v52 = vpop.f32.mrf.mxu0  ;;  %v2937_v14 = vpop.f32.mrf.mxu1 }
 0x387   :  { %v7206_v43 = vadd.f32 %v2937_v14, %v2860_v34  ;;  %3062 = vrot.lane.b32.xlu1 %v2967_v9, %s5239_s4  ;;  %v2862_v59 = vadd.f32 %v2833_v52, %v2777_v20 }
 0x388   :  { %v2835_v44 = vpop.f32.mrf.mxu0  ;;  %v2939_v41 = vpop.f32.mrf.mxu1 }
 0x389   :  { %v2969_v1 = vadd.f32 %v2939_v41, %v2861_v54  ;;  %3064 = vrot.lane.b32.xlu0 %v7206_v43, %s5239_s4  ;;  %v2863_v38 = vadd.f32 %v2835_v44, %v2778_v56 }
 0x38a   :  { %v2839_v37 = vpop.f32.mrf.mxu0  ;;  %v2941_v11 = vpop.f32.mrf.mxu1 }
 0x38b   :  { %v7218_v40 = vadd.f32 %v2941_v11, %v2862_v59  ;;  %3066 = vrot.lane.b32.xlu1 %v2969_v1, %s5239_s4  ;;  %v2864_v21 = vadd.f32 %v2839_v37, %v2779_v2 }
 0x38c   :  { %v2841_v61 = vpop.f32.mrf.mxu0  ;;  %v2943_v57 = vpop.f32.mrf.mxu1 }
 0x38d   :  { %v2971_v33 = vadd.f32 %v2943_v57, %v2863_v38  ;;  %3068 = vrot.lane.b32.xlu0 %v7218_v40, %s5239_s4  ;;  %v2865_v51 = vadd.f32 %v2841_v61, %v2780_v55 }
 0x38e   :  { %v2843_v5 = vpop.f32.mrf.mxu0  ;;  %v2947_v8 = vpop.f32.mrf.mxu1 }
 0x38f   :  { %v7229_v58 = vadd.f32 %v2947_v8, %v2864_v21  ;;  %3070 = vrot.lane.b32.xlu1 %v2971_v33, %s5239_s4  ;;  %v2866_v49 = vadd.f32 %v2843_v5, %v2781_v23 }
 0x390   :  { %v2845_v12 = vpop.f32.mrf.mxu0  ;;  %v2949_v18 = vpop.f32.mrf.mxu1 }
 0x391   :  { %v2973_v45 = vadd.f32 %v2949_v18, %v2865_v51  ;;  %3072 = vrot.lane.b32.xlu0 %v7229_v58, %s5239_s4  ;;  %v2867_v29 = vadd.f32 %v2845_v12, %v2782_v27 }
 0x392   :  { %v2849_v22 = vpop.f32.mrf.mxu0  ;;  %v2951_v53 = vpop.f32.mrf.mxu1 }
 0x393   :  { %v7240_v46 = vadd.f32 %v2951_v53, %v2866_v49  ;;  %3074 = vrot.lane.b32.xlu1 %v2973_v45, %s5239_s4  ;;  %v2868_v15 = vadd.f32 %v2849_v22, %v2783_v10  ;;  %v4525_v53 = vld [vmem:[%s7747_s6 + $0x138] sm:$0xff] }
 0x394   :  { %v2851_v25 = vpop.f32.mrf.mxu0  ;;  %v2953_v50 = vpop.f32.mrf.mxu1 }
 0x395   :  { %v2975_v24 = vadd.f32 %v2953_v50, %v2867_v29  ;;  %3076 = vrot.lane.b32.xlu0 %v7240_v46, %s5239_s4  ;;  %v2869_v26 = vadd.f32 %v2851_v25, %v2784_v0  ;;  %v4524_v50 = vld [vmem:[%s7747_s6 + $0x130] sm:$0xff] }
 0x396   :  { %v2853_v34 = vpop.f32.mrf.mxu0  ;;  %v2957_v9 = vpop.f32.mrf.mxu1 }
 0x397   :  { %v7246_v36 = vadd.f32 %v2957_v9, %v2868_v15  ;;  %3078 = vrot.lane.b32.xlu1 %v2975_v24, %s5239_s4 }
 0x398   :  { %v2854_v7 = vpop.f32.mrf.mxu0  ;;  %v2959_v62 = vpop.f32.mrf.mxu1 }
 0x399   :  { %v2977_v17 = vadd.f32 %v2959_v62, %v2869_v26  ;;  %3080 = vrot.lane.b32.xlu0 %v7246_v36, %s5239_s4 }
 0x39a   :  { %v2961_v52 = vpop.f32.mrf.mxu1 }
 0x39b   :  { %3082 = vrot.lane.b32.xlu1 %v2977_v17, %s5239_s4 }
 0x39c   :  { %v2962_v4 = vpop.f32.mrf.mxu1 }
 0x3af   :  { %v2993_v14 = vpop.permute.xlu0 %2992 }
 0x3b1   :  { %v2995_v20 = vpop.permute.xlu1 %2994 }
 0x3b2   :  { %v3021_v57 = vsel %vm3020_vm7, %v2993_v14, %v2995_v20 }
 0x3b3   :  { %v2997_v54 = vpop.permute.xlu0 %2996  ;;  %v3035_v21 = vmax.f32 %v6952_v48, %v3021_v57 }
 0x3b5   :  { %v2999_v44 = vpop.permute.xlu1 %2998 }
 0x3b6   :  { %v3022_v8 = vsel %vm3020_vm7, %v2997_v54, %v2999_v44  ;;  %v4508_v54 = vld [vmem:[%s7747_s6 + $0xe8] sm:$0xff] }
 0x3b7   :  { %v3001_v41 = vpop.permute.xlu0 %3000  ;;  %v3036_v18 = vmax.f32 %v6962_v31, %v3022_v8  ;;  %v4520_v8 = vld [vmem:[%s7747_s6 + $0x110] sm:$0xff] }
 0x3b9   :  { %v3003_v3 = vpop.permute.xlu1 %3002 }
 0x3bb   :  { %v3005_v56 = vpop.permute.xlu0 %3004 }
 0x3bd   :  { %v3007_v59 = vpop.permute.xlu1 %3006 }
 0x3be   :  { %v3024_v10 = vsel %vm3020_vm7, %v3005_v56, %v3007_v59 }
 0x3bf   :  { %v3009_v1 = vpop.permute.xlu0 %3008  ;;  %v3038_v24 = vmax.f32 %v6990_v13, %v3024_v10  ;;  %v4522_v13 = vld [vmem:[%s7747_s6 + $0x120] sm:$0xff] }
 0x3c0   :  { %v4518_v10 = vld [vmem:[%s7747_s6 + $0x100] sm:$0xff] }
 0x3c1   :  { %v3011_v37 = vpop.permute.xlu1 %3010 }
 0x3c2   :  { %v3025_v52 = vsel %vm3020_vm7, %v3009_v1, %v3011_v37  ;;  %v4521_v37 = vld [vmem:[%s7747_s6 + $0x118] sm:$0xff] }
 0x3c3   :  { %v7252_v11 = vpop.permute.xlu0 %3012 }
 0x3c5   :  { %v7254_v19 = vpop.permute.xlu1 %3014 }
 0x3c7   :  { %v7256_v2 = vpop.permute.xlu0 %3016 }
 0x3c9   :  { %v7258_v38 = vpop.permute.xlu1 %3018 }
 0x3f3   :  { %v3057_v61 = vpop.permute.xlu0 %3056 }
 0x3f5   :  { %v3059_v47 = vpop.permute.xlu1 %3058 }
 0x3f6   :  { %v3084_v55 = vsel %vm3020_vm7, %v3057_v61, %v3059_v47 }
 0x3f7   :  { %v3098_v33 = vmax.f32 %v7164_v30, %v3084_v55  ;;  %v3061_v5 = vpop.permute.xlu0 %3060  ;;  %v3023_v30 = vsel %vm3020_vm7, %v3001_v41, %v3003_v3  ;;  %v3039_v41 = vmax.f32 %v7007_v63, %v3025_v52  ;;  %v3026_v63 = vsel %vm3020_vm7, %v7252_v11, %v7254_v19  ;;  %v4507_v55 = vld [vmem:[%s7747_s6 + $0xe0] sm:$0xff] }
 0x3f8   :  { %v3037_v31 = vmax.f32 %v6975_v60, %v3023_v30  ;;  %v3040_v19 = vmax.f32 %v7039_v28, %v3026_v63  ;;  %v3027_v28 = vsel %vm3020_vm7, %v7256_v2, %v7258_v38 }
 0x3f9   :  { %v3105_v23 = vmax.f32 %v3035_v21, %v3098_v33  ;;  %v3063_v51 = vpop.permute.xlu1 %3062  ;;  %v3041_v38 = vmax.f32 %v7057_v6, %v3027_v28  ;;  %v4538_v28 = vld [vmem:[%s7747_s6 + $0x168] sm:$0xff] }
 0x3fa   :  { %v3085_v12 = vsel %vm3020_vm7, %v3061_v5, %v3063_v51 }
 0x3fb   :  { %v3119_v35 = vadd.f32 %v7268_v42, %v3105_v23  ;;  %v3099_v48 = vmax.f32 %v7186_v16, %v3085_v12  ;;  %v3065_v27 = vpop.permute.xlu0 %3064 }
 0x3fd   :  { %v7275_v49 = vmax.f32 %v3119_v35, 0.0  ;;  %v3106_v45 = vmax.f32 %v3036_v18, %v3099_v48  ;;  %v3067_v22 = vpop.permute.xlu1 %3066  ;;  %v4506_v35 = vld [vmem:[%s7747_s6 + $0xd8] sm:$0xff] }
 0x3fe   :  { %v3086_v39 = vsel %vm3020_vm7, %v3065_v27, %v3067_v22 }
 0x3ff   :  { %v3120_v16 = vadd.f32 %v7268_v42, %v3106_v45  ;;  %v3100_v29 = vmax.f32 %v7206_v43, %v3086_v39  ;;  %4741 = vmatmul.mubr.msk.f32.vlgmr.msra.gmra.mxu1 %vm3175_vm8, %v7275_v49  ;;  %v3069_v25 = vpop.permute.xlu0 %3068  ;;  %v4523_v43 = vld [vmem:[%s7747_s6 + $0x128] sm:$0xff]  ;;  %v3162_v62 = vrot.slane %v7275_v49, 1 }
 0x400   :  { %4743 = vmatprep.mubr.msk.f32.mxu1 %vm5241_vm6, %v5240_v32  ;;  %4803 = vmatpush3.msra.mxu1 %v4525_v53  ;;  %v4519_v45 = vld [vmem:[%s7747_s6 + $0x108] sm:$0xff]  ;;  %v4505_v53 = vld [vmem:[%s7747_s6 + $0xd0] sm:$0xff] }
 0x401   :  { %v7292_v0 = vmax.f32 %v3120_v16, 0.0  ;;  %v3107_v60 = vmax.f32 %v3037_v31, %v3100_v29  ;;  %v3071_v15 = vpop.permute.xlu1 %3070  ;;  %4804 = vmatprep.subr.mxu1 %v5240_v32  ;;  %v4504_v16 = vld [vmem:[%s7747_s6 + $0xc8] sm:$0xff] }
 0x402   :  { %v3087_v34 = vsel %vm3020_vm7, %v3069_v25, %v3071_v15  ;;  %4805 = vmatpush3.msra.mxu1 %v4524_v50  ;;  %v4517_v25 = vld [vmem:[%s7747_s6 + $0xf8] sm:$0xff]  ;;  %v4503_v50 = vld [vmem:[%s7747_s6 + $0xc0] sm:$0xff] }
 0x403   :  { %v3121_v9 = vadd.f32 %v7268_v42, %v3107_v60  ;;  %v3101_v26 = vmax.f32 %v7218_v40, %v3087_v34  ;;  %4744 = vmatmul.mubr.msk.f32.gmra.mxu1 %vm3175_vm8, %v7292_v0  ;;  %v3073_v7 = vpop.permute.xlu0 %3072  ;;  %v3163_v17 = vrot.slane %v7292_v0, 1  ;;  %4806 = vmatprep.subr.mxu1 %v5240_v32  ;;  %v3563_v15 = vrot.slane %v7292_v0, 3  ;;  %v4502_v34 = vld [vmem:[%s7747_s6 + $0xb8] sm:$0xff] }
 0x404   :  { %4746 = vmatprep.mubr.msk.f32.mxu1 %vm5241_vm6, %v5240_v32  ;;  %4807 = vmatpush3.msra.mxu1 %v4523_v43 }
 0x405   :  { %v7313_v40 = vmax.f32 %v3121_v9, 0.0  ;;  %v3108_v4 = vmax.f32 %v3038_v24, %v3101_v26  ;;  %v3075_v14 = vpop.permute.xlu1 %3074  ;;  %v3164_v20 = vsel %vm2392_vm4, %v3162_v62, %v3163_v17  ;;  %4808 = vmatprep.subr.mxu1 %v5240_v32  ;;  %v4516_v24 = vld [vmem:[%s7747_s6 + $0xf0] sm:$0xff]  ;;  %v3562_v9 = vrot.slane %v7275_v49, 3 }
 0x406   :  { %v3088_v44 = vsel %vm3020_vm7, %v3073_v7, %v3075_v14  ;;  %4700 = vmatmul.mubr.msk.f32.vlgmr.msra.gmra.mxu0 %vm3175_vm8, %v3164_v20  ;;  %4809 = vmatpush3.msra.mxu1 %v4522_v13  ;;  %v4501_v7 = vld [vmem:[%s7747_s6 + $0xb0] sm:$0xff]  ;;  %v3417_v13 = vrot.slane %v7292_v0, 2  ;;  %v3416_v20 = vrot.slane %v7275_v49, 2 }
 0x407   :  { %v3122_v3 = vadd.f32 %v7268_v42, %v3108_v4  ;;  %v3102_v56 = vmax.f32 %v7229_v58, %v3088_v44  ;;  %4747 = vmatmul.mubr.msk.f32.gmra.mxu1 %vm3175_vm8, %v7313_v40  ;;  %v3077_v59 = vpop.permute.xlu0 %3076  ;;  %4702 = vmatprep.mubr.msk.f32.mxu0 %vm5241_vm6, %v5240_v32  ;;  %v3165_v1 = vrot.slane %v7313_v40, 1  ;;  %v3564_v26 = vsel %vm3561_vm9, %v3562_v9, %v3563_v15  ;;  %v4499_v4 = vld [vmem:[%s7747_s6 + $0xa0] sm:$0xff] }
 0x408   :  { %4749 = vmatprep.mubr.msk.f32.mxu1 %vm5241_vm6, %v5240_v32  ;;  %4762 = vmatpush3.msra.mxu0 %v4508_v54  ;;  %v3565_v62 = vrot.slane %v7313_v40, 3  ;;  %v3418_v54 = vsel %vm3415_vm10, %v3416_v20, %v3417_v13  ;;  %v3419_v44 = vrot.slane %v7313_v40, 2 }
 0x409   :  { %v7338_v58 = vmax.f32 %v3122_v3, 0.0  ;;  %v3109_v61 = vmax.f32 %v3039_v41, %v3102_v56  ;;  %v3079_v57 = vpop.permute.xlu1 %3078  ;;  %v3166_v47 = vsel %vm2392_vm4, %v3163_v17, %v3165_v1  ;;  %4810 = vmatprep.subr.mxu1 %v5240_v32  ;;  %4763 = vmatprep.subr.mxu0 %v5240_v32  ;;  %v4500_v17 = vld [vmem:[%s7747_s6 + $0xa8] sm:$0xff] }
 0x40a   :  { %v3089_v11 = vsel %vm3020_vm7, %v3077_v59, %v3079_v57  ;;  %4703 = vmatmul.mubr.msk.f32.gmra.mxu0 %vm3175_vm8, %v3166_v47  ;;  %4811 = vmatpush3.msra.mxu1 %v4521_v37  ;;  %v3566_v52 = vsel %vm3561_vm9, %v3563_v15, %v3565_v62  ;;  %v4542_v41 = vld [vmem:[%s7747_s6 + $0x188] sm:$0xff]  ;;  %v3420_v59 = vsel %vm3415_vm10, %v3417_v13, %v3419_v44  ;;  %v4541_v37 = vld [vmem:[%s7747_s6 + $0x180] sm:$0xff]  ;;  %v3947_v15 = vld [vmem:[%s7749_s8 + $0x30] sm:$0xff] }
 0x40b   :  { %v3123_v21 = vadd.f32 %v7268_v42, %v3109_v61  ;;  %v3103_v33 = vmax.f32 %v7240_v46, %v3089_v11  ;;  %4750 = vmatmul.mubr.msk.f32.gmra.mxu1 %vm3175_vm8, %v7338_v58  ;;  %4705 = vmatprep.mubr.msk.f32.mxu0 %vm5241_vm6, %v5240_v32  ;;  %v3167_v5 = vrot.slane %v7338_v58, 1  ;;  %v3081_v51 = vpop.permute.xlu0 %3080  ;;  %v3567_v14 = vrot.slane %v7338_v58, 3  ;;  %v3942_v13 = vld [vmem:[%s7749_s8 + $0x8] sm:$0xff] }
 0x40c   :  { %4752 = vmatprep.mubr.msk.f32.mxu1 %vm5241_vm6, %v5240_v32  ;;  %4764 = vmatpush3.msra.mxu0 %v4507_v55  ;;  %v4540_v55 = vld [vmem:[%s7747_s6 + $0x178] sm:$0xff] }
 0x40d   :  { %v7364_v46 = vmax.f32 %v3123_v21, 0.0  ;;  %v3110_v23 = vmax.f32 %v3040_v19, %v3103_v33  ;;  %v3083_v12 = vpop.permute.xlu1 %3082  ;;  %v3168_v18 = vsel %vm2392_vm4, %v3165_v1, %v3167_v5  ;;  %4812 = vmatprep.subr.mxu1 %v5240_v32  ;;  %4765 = vmatprep.subr.mxu0 %v5240_v32  ;;  %v3568_v3 = vsel %vm3561_vm9, %v3565_v62, %v3567_v14  ;;  %v4539_v33 = vld [vmem:[%s7747_s6 + $0x170] sm:$0xff] }
 0x40e   :  { %v3090_v2 = vsel %vm3020_vm7, %v3081_v51, %v3083_v12  ;;  %4706 = vmatmul.mubr.msk.f32.gmra.mxu0 %vm3175_vm8, %v3168_v18  ;;  %4813 = vmatpush3.msra.mxu1 %v4520_v8  ;;  %v3421_v1 = vrot.slane %v7338_v58, 2  ;;  %v4537_v12 = vld [vmem:[%s7747_s6 + $0x160] sm:$0xff]  ;;  %v4536_v18 = vld [vmem:[%s7747_s6 + $0x158] sm:$0xff]  ;;  %v3943_v62 = vld [vmem:[%s7749_s8 + $0x10] sm:$0xff] }
 0x40f   :  { %v3124_v48 = vadd.f32 %v7268_v42, %v3110_v23  ;;  %v3104_v27 = vmax.f32 %v7246_v36, %v3090_v2  ;;  %4753 = vmatmul.mubr.msk.f32.gmra.mxu1 %vm3175_vm8, %v7364_v46  ;;  %4708 = vmatprep.mubr.msk.f32.mxu0 %vm5241_vm6, %v5240_v32  ;;  %v3169_v30 = vrot.slane %v7364_v46, 1  ;;  %v3569_v56 = vrot.slane %v7364_v46, 3  ;;  %v4535_v2 = vld [vmem:[%s7747_s6 + $0x150] sm:$0xff] }
 0x410   :  { %4755 = vmatprep.mubr.msk.f32.mxu1 %vm5241_vm6, %v5240_v32  ;;  %4766 = vmatpush3.msra.mxu0 %v4506_v35  ;;  %v3422_v57 = vsel %vm3415_vm10, %v3419_v44, %v3421_v1  ;;  %v3423_v47 = vrot.slane %v7364_v46, 2 }
 0x411   :  { %v7387_v6 = vmax.f32 %v3124_v48, 0.0  ;;  %v3111_v22 = vmax.f32 %v3041_v38, %v3104_v27  ;;  %v3170_v36 = vsel %vm2392_vm4, %v3167_v5, %v3169_v30  ;;  %4814 = vmatprep.subr.mxu1 %v5240_v32  ;;  %4767 = vmatprep.subr.mxu0 %v5240_v32  ;;  %v3570_v63 = vsel %vm3561_vm9, %v3567_v14, %v3569_v56  ;;  %v4534_v38 = vld [vmem:[%s7747_s6 + $0x148] sm:$0xff]  ;;  %v4533_v27 = vld [vmem:[%s7747_s6 + $0x140] sm:$0xff] }
 0x412   :  { %4709 = vmatmul.mubr.msk.f32.gmra.mxu0 %vm3175_vm8, %v3170_v36  ;;  %4815 = vmatpush3.msra.mxu1 %v4519_v45  ;;  %v3424_v21 = vsel %vm3415_vm10, %v3421_v1, %v3423_v47  ;;  %v3709_v48 = vrot.slane %v7292_v0, 4  ;;  %v3711_v45 = vrot.slane %v7313_v40, 4  ;;  %v3713_v36 = vrot.slane %v7338_v58, 4 }
 0x413   :  { %v3125_v39 = vadd.f32 %v7268_v42, %v3111_v22  ;;  %4756 = vmatmul.mubr.msk.f32.gmra.mxu1 %vm3175_vm8, %v7387_v6  ;;  %4711 = vmatprep.mubr.msk.f32.mxu0 %vm5241_vm6, %v5240_v32  ;;  %v3171_v31 = vrot.slane %v7387_v6, 1  ;;  %v3571_v61 = vrot.slane %v7387_v6, 3  ;;  %v3425_v5 = vrot.slane %v7387_v6, 2 }
 0x414   :  { %4768 = vmatpush3.msra.mxu0 %v4505_v53  ;;  %4816 = vmatprep.subr.mxu1 %v5240_v32  ;;  %v3712_v22 = vsel %vm3707_vm11, %v3709_v48, %v3711_v45  ;;  %v3715_v40 = vrot.slane %v7364_v46, 4 }
 0x415   :  { %v7409_v42 = vmax.f32 %v3125_v39, 0.0  ;;  %v3172_v29 = vsel %vm2392_vm4, %v3169_v30, %v3171_v31  ;;  %4758 = vmatprep.mubr.msk.f32.mxu1 %vm5241_vm6, %v5240_v32  ;;  %4769 = vmatprep.subr.mxu0 %v5240_v32  ;;  %v3572_v11 = vsel %vm3561_vm9, %v3569_v56, %v3571_v61  ;;  %v3426_v23 = vsel %vm3415_vm10, %v3423_v47, %v3425_v5 }
 0x416   :  { %4712 = vmatmul.mubr.msk.f32.gmra.mxu0 %vm3175_vm8, %v3172_v29  ;;  %4817 = vmatpush3.msra.mxu1 %v4518_v10  ;;  %v3708_v30 = vrot.slane %v7275_v49, 4  ;;  %v3714_v49 = vsel %vm3707_vm11, %v3711_v45, %v3713_v36  ;;  %v3716_v53 = vsel %vm3707_vm11, %v3713_v36, %v3715_v40  ;;  %v3717_v39 = vrot.slane %v7387_v6, 4  ;;  %v3955_v6 = vld [vmem:[%s7749_s8 + $0x70] sm:$0xff]  ;;  %v3954_v10 = vld [vmem:[%s7749_s8 + $0x68] sm:$0xff] }
 0x417   :  { %4759 = vmatmul.mubr.msk.f32.gmra.mxu1 %vm3175_vm8, %v7409_v42  ;;  %4770 = vmatpush3.msra.mxu0 %v4504_v16  ;;  %v3173_v60 = vrot.slane %v7409_v42, 1  ;;  %v3573_v19 = vrot.slane %v7409_v42, 3  ;;  %v3427_v51 = vrot.slane %v7409_v42, 2  ;;  %v3953_v16 = vld [vmem:[%s7749_s8 + $0x60] sm:$0xff]  ;;  %v3951_v29 = vld [vmem:[%s7749_s8 + $0x50] sm:$0xff] }
 0x418   :  { %4818 = vmatprep.subr.mxu1 %v5240_v32  ;;  %4771 = vmatprep.subr.mxu0 %v5240_v32  ;;  %v3710_v0 = vsel %vm3707_vm11, %v3708_v30, %v3709_v48  ;;  %v3718_v58 = vsel %vm3707_vm11, %v3715_v40, %v3717_v39 }
 0x419   :  { %4819 = vmatpush3.msra.mxu1 %v4517_v25  ;;  %4714 = vmatprep.mubr.msk.f32.mxu0 %vm5241_vm6, %v5240_v32  ;;  %v3174_v43 = vsel %vm2392_vm4, %v3171_v31, %v3173_v60  ;;  %v3574_v8 = vsel %vm3561_vm9, %v3571_v61, %v3573_v19  ;;  %v3428_v35 = vsel %vm3415_vm10, %v3425_v5, %v3427_v51  ;;  %v3719_v31 = vrot.slane %v7409_v42, 4  ;;  %v3952_v42 = vld [vmem:[%s7749_s8 + $0x58] sm:$0xff]  ;;  %v3950_v25 = vld [vmem:[%s7749_s8 + $0x48] sm:$0xff] }
 0x41a   :  { %4772 = vmatpush3.msra.mxu0 %v4503_v50  ;;  %4820 = vmatprep.subr.mxu1 %v5240_v32  ;;  %v3949_v50 = vld [vmem:[%s7749_s8 + $0x40] sm:$0xff] }
 0x41b   :  { %4715 = vmatmul.mubr.msk.f32.gmra.mxu0 %vm3175_vm8, %v3174_v43  ;;  %4773 = vmatprep.subr.mxu0 %v5240_v32  ;;  %v3720_v46 = vsel %vm3707_vm11, %v3717_v39, %v3719_v31  ;;  %v3946_v43 = vld [vmem:[%s7749_s8 + $0x28] sm:$0xff] }
 0x41c   :  { %4821 = vmatpush3.msra.mxu1 %v4516_v24  ;;  %4822 = vmatprep.mubr.msk.f32.mxu1 %vm5241_vm6, %v5240_v32 }
 0x41d   :  { %4774 = vmatpush3.msra.mxu0 %v4502_v34  ;;  %4823 = vmatmul.mubr.msk.f32.vlgmr.msra.gmra.mxu1 %vm3175_vm8, %v3564_v26  ;;  %v3945_v34 = vld [vmem:[%s7749_s8 + $0x20] sm:$0xff]  ;;  %v3944_v26 = vld [vmem:[%s7749_s8 + $0x18] sm:$0xff] }
 0x41e   :  { %4775 = vmatprep.subr.mxu0 %v5240_v32  ;;  %4717 = vmatprep.mubr.msk.f32.mxu0 %vm5241_vm6, %v5240_v32 }
 0x41f   :  { %4776 = vmatpush3.msra.mxu0 %v4501_v7  ;;  %4825 = vmatprep.mubr.msk.f32.mxu1 %vm5241_vm6, %v5240_v32 }
 0x420   :  { %4718 = vmatmul.mubr.msk.f32.gmra.mxu0 %vm3175_vm8, %v3173_v60  ;;  %4777 = vmatprep.subr.mxu0 %v5240_v32  ;;  %v3948_v60 = vld [vmem:[%s7749_s8 + $0x38] sm:$0xff] }
 0x421   :  { %4778 = vmatpush3.msra.mxu0 %v4500_v17  ;;  %4826 = vmatmul.mubr.msk.f32.gmra.mxu1 %vm3175_vm8, %v3566_v52 }
 0x422   :  { %4779 = vmatprep.subr.mxu0 %v5240_v32  ;;  %4781 = vmatprep.mubr.msk.f32.mxu0 %vm5241_vm6, %v5240_v32 }
 0x423   :  { %4780 = vmatpush3.msra.mxu0 %v4499_v4  ;;  %4828 = vmatprep.mubr.msk.f32.mxu1 %vm5241_vm6, %v5240_v32 }
 0x424   :  { %4782 = vmatmul.mubr.msk.f32.vlgmr.msra.gmra.mxu0 %vm3175_vm8, %v3418_v54  ;;  %4843 = vmatprep.subr.mxu0 %v5240_v32 }
 0x425   :  { %4829 = vmatmul.mubr.msk.f32.gmra.mxu1 %vm3175_vm8, %v3568_v3  ;;  %4784 = vmatprep.mubr.msk.f32.mxu0 %vm5241_vm6, %v5240_v32 }
 0x426   :  { %4831 = vmatprep.mubr.msk.f32.mxu1 %vm5241_vm6, %v5240_v32  ;;  %4844 = vmatpush3.msra.mxu0 %v4542_v41 }
 0x427   :  { %4845 = vmatprep.subr.mxu0 %v5240_v32  ;;  %4884 = vmatprep.subr.mxu1 %v5240_v32 }
 0x428   :  { %4785 = vmatmul.mubr.msk.f32.gmra.mxu0 %vm3175_vm8, %v3420_v59 }
 0x429   :  { %4832 = vmatmul.mubr.msk.f32.gmra.mxu1 %vm3175_vm8, %v3570_v63  ;;  %4787 = vmatprep.mubr.msk.f32.mxu0 %vm5241_vm6, %v5240_v32 }
 0x42a   :  { %4834 = vmatprep.mubr.msk.f32.mxu1 %vm5241_vm6, %v5240_v32  ;;  %4846 = vmatpush3.msra.mxu0 %v4541_v37 }
 0x42b   :  { %4847 = vmatprep.subr.mxu0 %v5240_v32 }
 0x42c   :  { %4788 = vmatmul.mubr.msk.f32.gmra.mxu0 %vm3175_vm8, %v3422_v57 }
 0x42d   :  { %4835 = vmatmul.mubr.msk.f32.gmra.mxu1 %vm3175_vm8, %v3572_v11  ;;  %4790 = vmatprep.mubr.msk.f32.mxu0 %vm5241_vm6, %v5240_v32 }
 0x42e   :  { %4837 = vmatprep.mubr.msk.f32.mxu1 %vm5241_vm6, %v5240_v32  ;;  %4848 = vmatpush3.msra.mxu0 %v4540_v55 }
 0x42f   :  { %4849 = vmatprep.subr.mxu0 %v5240_v32 }
 0x430   :  { %4791 = vmatmul.mubr.msk.f32.gmra.mxu0 %vm3175_vm8, %v3424_v21 }
 0x431   :  { %4838 = vmatmul.mubr.msk.f32.gmra.mxu1 %vm3175_vm8, %v3574_v8  ;;  %4793 = vmatprep.mubr.msk.f32.mxu0 %vm5241_vm6, %v5240_v32 }
 0x432   :  { %4850 = vmatpush3.msra.mxu0 %v4539_v33  ;;  %4840 = vmatprep.mubr.msk.f32.mxu1 %vm5241_vm6, %v5240_v32 }
 0x433   :  { %4851 = vmatprep.subr.mxu0 %v5240_v32 }
 0x434   :  { %4794 = vmatmul.mubr.msk.f32.gmra.mxu0 %vm3175_vm8, %v3426_v23 }
 0x435   :  { %4841 = vmatmul.mubr.msk.f32.gmra.mxu1 %vm3175_vm8, %v3573_v19  ;;  %4852 = vmatpush3.msra.mxu0 %v4538_v28 }
 0x436   :  { %4853 = vmatprep.subr.mxu0 %v5240_v32  ;;  %4796 = vmatprep.mubr.msk.f32.mxu0 %vm5241_vm6, %v5240_v32 }
 0x437   :  { %4854 = vmatpush3.msra.mxu0 %v4537_v12  ;;  %4898 = vmatprep.mubr.msk.f32.mxu1 %vm5241_vm6, %v5240_v32 }
 0x438   :  { %4797 = vmatmul.mubr.msk.f32.gmra.mxu0 %vm3175_vm8, %v3428_v35  ;;  %4855 = vmatprep.subr.mxu0 %v5240_v32 }
 0x439   :  { %4856 = vmatpush3.msra.mxu0 %v4536_v18  ;;  %4799 = vmatprep.mubr.msk.f32.mxu0 %vm5241_vm6, %v5240_v32 }
 0x43a   :  { %4857 = vmatprep.subr.mxu0 %v5240_v32 }
 0x43b   :  { %4858 = vmatpush3.msra.mxu0 %v4535_v2 }
 0x43c   :  { %4800 = vmatmul.mubr.msk.f32.gmra.mxu0 %vm3175_vm8, %v3427_v51  ;;  %4859 = vmatprep.subr.mxu0 %v5240_v32 }
 0x43d   :  { %4860 = vmatpush3.msra.mxu0 %v4534_v38  ;;  %4863 = vmatprep.mubr.msk.f32.mxu0 %vm5241_vm6, %v5240_v32 }
 0x43e   :  { %4861 = vmatprep.subr.mxu0 %v5240_v32 }
 0x43f   :  { %4862 = vmatpush3.msra.mxu0 %v4533_v27 }
 0x440   :  { %4864 = vmatmul.mubr.msk.f32.vlgmr.msra.gmra.mxu0 %vm3175_vm8, %v3710_v0  ;;  %4901 = vmatprep.subr.mxu0 %v5240_v32 }
 0x441   :  { %4866 = vmatprep.mubr.msk.f32.mxu0 %vm5241_vm6, %v5240_v32  ;;  %4902 = vmatpush3.msra.mxu0 %v3955_v6 }
 0x442   :  { %4903 = vmatprep.subr.mxu0 %v5240_v32 }
 0x443   :  { %4904 = vmatpush3.msra.mxu0 %v3954_v10 }
 0x444   :  { %4867 = vmatmul.mubr.msk.f32.gmra.mxu0 %vm3175_vm8, %v3712_v22  ;;  %4905 = vmatprep.subr.mxu0 %v5240_v32 }
 0x445   :  { %4869 = vmatprep.mubr.msk.f32.mxu0 %vm5241_vm6, %v5240_v32  ;;  %4906 = vmatpush3.msra.mxu0 %v3953_v16 }
 0x446   :  { %4907 = vmatprep.subr.mxu0 %v5240_v32 }
 0x447   :  { %4908 = vmatpush3.msra.mxu0 %v3952_v42 }
 0x448   :  { %4870 = vmatmul.mubr.msk.f32.gmra.mxu0 %vm3175_vm8, %v3714_v49  ;;  %4909 = vmatprep.subr.mxu0 %v5240_v32 }
 0x449   :  { %4872 = vmatprep.mubr.msk.f32.mxu0 %vm5241_vm6, %v5240_v32  ;;  %4910 = vmatpush3.msra.mxu0 %v3951_v29 }
 0x44a   :  { %4911 = vmatprep.subr.mxu0 %v5240_v32 }
 0x44b   :  { %4912 = vmatpush3.msra.mxu0 %v3950_v25 }
 0x44c   :  { %4873 = vmatmul.mubr.msk.f32.gmra.mxu0 %vm3175_vm8, %v3716_v53  ;;  %4913 = vmatprep.subr.mxu0 %v5240_v32 }
 0x44d   :  { %4875 = vmatprep.mubr.msk.f32.mxu0 %vm5241_vm6, %v5240_v32  ;;  %4914 = vmatpush3.msra.mxu0 %v3949_v50 }
 0x44e   :  { %4915 = vmatprep.subr.mxu0 %v5240_v32 }
 0x44f   :  { %4916 = vmatpush3.msra.mxu0 %v3948_v60 }
 0x450   :  { %4876 = vmatmul.mubr.msk.f32.gmra.mxu0 %vm3175_vm8, %v3718_v58  ;;  %4917 = vmatprep.subr.mxu0 %v5240_v32 }
 0x451   :  { %4878 = vmatprep.mubr.msk.f32.mxu0 %vm5241_vm6, %v5240_v32  ;;  %4918 = vmatpush3.msra.mxu0 %v3947_v15 }
 0x452   :  { %4919 = vmatprep.subr.mxu0 %v5240_v32 }
 0x453   :  { %4920 = vmatpush3.msra.mxu0 %v3946_v43 }
 0x454   :  { %4879 = vmatmul.mubr.msk.f32.gmra.mxu0 %vm3175_vm8, %v3720_v46  ;;  %4921 = vmatprep.subr.mxu0 %v5240_v32 }
 0x455   :  { %4881 = vmatprep.mubr.msk.f32.mxu0 %vm5241_vm6, %v5240_v32  ;;  %4922 = vmatpush3.msra.mxu0 %v3945_v34 }
 0x456   :  { %4923 = vmatprep.subr.mxu0 %v5240_v32 }
 0x457   :  { %4924 = vmatpush3.msra.mxu0 %v3944_v26 }
 0x458   :  { %4882 = vmatmul.mubr.msk.f32.gmra.mxu0 %vm3175_vm8, %v3719_v31  ;;  %4925 = vmatprep.subr.mxu0 %v5240_v32 }
 0x459   :  { %4931 = vmatprep.mubr.msk.f32.mxu0 %vm5241_vm6, %v5240_v32  ;;  %4926 = vmatpush3.msra.mxu0 %v3943_v62 }
 0x45a   :  { %4927 = vmatprep.subr.mxu0 %v5240_v32 }
 0x45b   :  { %4928 = vmatpush3.msra.mxu0 %v3942_v13 }
 0x45c   :  { %4929 = vmatprep.subr.mxu0 %v5240_v32 }
 0x4bf   :  { %v3370_v24 = vpop.f32.mrf.mxu1 }
 0x4c1   :  { %v4742_v9 = vpop.f32.mrf.mxu1 }
 0x4c3   :  { %v3375_v7 = vpop.f32.mrf.mxu1 }
 0x4c5   :  { %v4745_v17 = vpop.f32.mrf.mxu1 }
 0x4c6   :  { %v3256_v52 = vpop.f32.mrf.mxu0 }
 0x4c7   :  { %v3371_v4 = vadd.f32 %v3370_v24, %v3256_v52  ;;  %v3380_v14 = vpop.f32.mrf.mxu1 }
 0x4c8   :  { %v4701_v20 = vpop.f32.mrf.mxu0 }
 0x4c9   :  { %v4748_v54 = vpop.f32.mrf.mxu1 }
 0x4ca   :  { %v3261_v44 = vpop.f32.mrf.mxu0 }
 0x4cb   :  { %v7658_v41 = vadd.f32 %v3375_v7, %v3261_v44  ;;  %v3385_v3 = vpop.f32.mrf.mxu1 }
 0x4cc   :  { %v4704_v56 = vpop.f32.mrf.mxu0 }
 0x4cd   :  { %v4751_v59 = vpop.f32.mrf.mxu1 }
 0x4ce   :  { %v3266_v1 = vpop.f32.mrf.mxu0 }
 0x4cf   :  { %v7660_v37 = vadd.f32 %v3380_v14, %v3266_v1  ;;  %v3390_v63 = vpop.f32.mrf.mxu1 }
 0x4d0   :  { %v4707_v61 = vpop.f32.mrf.mxu0 }
 0x4d1   :  { %v4754_v57 = vpop.f32.mrf.mxu1 }
 0x4d2   :  { %v3271_v47 = vpop.f32.mrf.mxu0 }
 0x4d3   :  { %v3386_v55 = vadd.f32 %v3385_v3, %v3271_v47  ;;  %v3395_v11 = vpop.f32.mrf.mxu1 }
 0x4d4   :  { %v4710_v19 = vpop.f32.mrf.mxu0 }
 0x4d5   :  { %v4757_v21 = vpop.f32.mrf.mxu1 }
 0x4d6   :  { %v3276_v33 = vpop.f32.mrf.mxu0 }
 0x4d7   :  { %v3391_v5 = vadd.f32 %v3390_v63, %v3276_v33  ;;  %v3400_v8 = vpop.f32.mrf.mxu1 }
 0x4d8   :  { %v4713_v28 = vpop.f32.mrf.mxu0 }
 0x4d9   :  { %v4760_v23 = vpop.f32.mrf.mxu1 }
 0x4db   :  { %v3281_v51 = vpop.f32.mrf.mxu0 }
 0x4dc   :  { %v3396_v54 = vadd.f32 %v3395_v11, %v3281_v51 }
 0x4dd   :  { %v3655_v12 = vpop.f32.mrf.mxu1  ;;  %v4716_v18 = vpop.f32.mrf.mxu0 }
 0x4df   :  { %v4824_v35 = vpop.f32.mrf.mxu1 }
 0x4e0   :  { %v3286_v2 = vpop.f32.mrf.mxu0 }
 0x4e1   :  { %v7662_v38 = vpop.f32.mrf.mxu1  ;;  %v3401_v3 = vadd.f32 %v3400_v8, %v3286_v2 }
 0x4e2   :  { %v4719_v48 = vpop.f32.mrf.mxu0 }
 0x4e3   :  { %v4827_v27 = vpop.f32.mrf.mxu1 }
 0x4e4   :  { %v3509_v30 = vpop.f32.mrf.mxu0 }
 0x4e5   :  { %v3543_v0 = vadd.f32 %v3509_v30, %v3371_v4  ;;  %v3665_v45 = vpop.f32.mrf.mxu1 }
 0x4e6   :  { %v4783_v22 = vpop.f32.mrf.mxu0 }
 0x4e7   :  { %v4830_v36 = vpop.f32.mrf.mxu1  ;;  %v7664_v49 = vadd.f32 %v3655_v12, %v3543_v0 }
 0x4e8   :  { %v3514_v40 = vpop.f32.mrf.mxu0 }
 0x4e9   :  { %v3670_v53 = vpop.f32.mrf.mxu1  ;;  %v3544_v18 = vadd.f32 %v3514_v40, %v7658_v41 }
 0x4ea   :  { %v4786_v39 = vpop.f32.mrf.mxu0 }
 0x4eb   :  { %v4833_v58 = vpop.f32.mrf.mxu1 }
 0x4ec   :  { %v3519_v31 = vpop.f32.mrf.mxu0 }
 0x4ed   :  { %v3675_v46 = vpop.f32.mrf.mxu1  ;;  %v3545_v21 = vadd.f32 %v3519_v31, %v7660_v37  ;;  %v3690_v37 = vadd.f32 %v7662_v38, %v3544_v18 }
 0x4ee   :  { %v4789_v6 = vpop.f32.mrf.mxu0 }
 0x4ef   :  { %v4836_v10 = vpop.f32.mrf.mxu1  ;;  %v3691_v2 = vadd.f32 %v3665_v45, %v3545_v21 }
 0x4f0   :  { %v3524_v16 = vpop.f32.mrf.mxu0  ;;  %v3863_v10 = vld [vmem:[%s7751_s1] sm:$0xff] }
 0x4f1   :  { %v3680_v42 = vpop.f32.mrf.mxu1  ;;  %v3546_v57 = vadd.f32 %v3524_v16, %v3386_v55  ;;  %v3941_v16 = vld [vmem:[%s7749_s8] sm:$0xff] }
 0x4f2   :  { %v4792_v29 = vpop.f32.mrf.mxu0  ;;  %4930 = vmatpush3.msra.mxu0 %v3941_v16 }
 0x4f3   :  { %v4839_v25 = vpop.f32.mrf.mxu1  ;;  %v3692_v35 = vadd.f32 %v3670_v53, %v3546_v57  ;;  %v4047_v29 = vld [vmem:[%s7752_s10 + $0x48] sm:$0xff] }
 0x4f4   :  { %v3529_v50 = vpop.f32.mrf.mxu0  ;;  %v4046_v25 = vld [vmem:[%s7752_s10 + $0x40] sm:$0xff] }
 0x4f5   :  { %v3685_v60 = vpop.f32.mrf.mxu1  ;;  %v3547_v1 = vadd.f32 %v3529_v50, %v3391_v5  ;;  %v4550_v5 = vld [vmem:[%s7750_s7] ss:$0 sm:$0xff]  ;;  %v4045_v50 = vld [vmem:[%s7752_s10 + $0x38] sm:$0xff] }
 0x4f6   :  { %v4795_v15 = vpop.f32.mrf.mxu0 }
 0x4f7   :  { %v4842_v43 = vpop.f32.mrf.mxu1  ;;  %v3693_v33 = vadd.f32 %v3675_v46, %v3547_v1  ;;  %v4043_v15 = vld [vmem:[%s7752_s10 + $0x28] sm:$0xff] }
 0x4f8   :  { %v3534_v24 = vpop.f32.mrf.mxu0  ;;  %v4042_v43 = vld [vmem:[%s7752_s10 + $0x20] sm:$0xff] }
 0x4f9   :  { %v3548_v56 = vadd.f32 %v3534_v24, %v3396_v54  ;;  %v4041_v24 = vld [vmem:[%s7752_s10 + $0x18] sm:$0xff] }
 0x4fa   :  { %v4798_v34 = vpop.f32.mrf.mxu0 }
 0x4fb   :  { %v3694_v47 = vadd.f32 %v3680_v42, %v3548_v56  ;;  %v4048_v42 = vld [vmem:[%s7752_s10 + $0x50] sm:$0xf] }
 0x4fc   :  { %v3539_v9 = vpop.f32.mrf.mxu0 }
 0x4fd   :  { %v3549_v63 = vadd.f32 %v3539_v9, %v3401_v3 }
 0x4fe   :  { %v4801_v26 = vpop.f32.mrf.mxu0 }
 0x4ff   :  { %v3695_v23 = vadd.f32 %v3685_v60, %v3549_v63  ;;  %v4044_v60 = vld [vmem:[%s7752_s10 + $0x30] sm:$0xff] }
 0x500   :  { %v3801_v7 = vpop.f32.mrf.mxu0  ;;  %v4040_v26 = vld [vmem:[%s7752_s10 + $0x10] sm:$0xff] }
 0x501   :  { %v3835_v40 = vadd.f32 %v3801_v7, %v7664_v49  ;;  %v4039_v7 = vld [vmem:[%s7752_s10 + $0x8] sm:$0xff] }
 0x502   :  { %v4865_v62 = vpop.f32.mrf.mxu0 }
 0x503   :  { %v3849_v38 = vadd.f32 %v4550_v5, %v3835_v40  ;;  %v4038_v62 = vld [vmem:[%s7752_s10] sm:$0xff] }
 0x504   :  { %v3806_v17 = vpop.f32.mrf.mxu0 }
 0x505   :  { %v3836_v36 = vadd.f32 %v3806_v17, %v3690_v37  ;;  %v3856_v49 = vmax.f32 %v3849_v38, 0.0  ;;  %v4553_v17 = vld [vmem:[%s7753_s9] ss:$0 sm:$0xff] }
 0x506   :  { %v4868_v13 = vpop.f32.mrf.mxu0 }
 0x507   :  { %v3850_v45 = vadd.f32 %v4550_v5, %v3836_v36 }
 0x508   :  { %v3811_v52 = vpop.f32.mrf.mxu0 }
 0x509   :  { %v3837_v30 = vadd.f32 %v3811_v52, %v3691_v2  ;;  %v3857_v6 = vmax.f32 %v3850_v45, 0.0 }
 0x50a   :  { %v4871_v4 = vpop.f32.mrf.mxu0 }
 0x50b   :  { %v3851_v53 = vadd.f32 %v4550_v5, %v3837_v30 }
 0x50c   :  { %v3816_v14 = vpop.f32.mrf.mxu0 }
 0x50d   :  { %v3838_v55 = vadd.f32 %v3816_v14, %v3692_v35  ;;  %v3858_v46 = vmax.f32 %v3851_v53, 0.0 }
 0x50e   :  { %v4874_v20 = vpop.f32.mrf.mxu0 }
 0x50f   :  { %v3852_v39 = vadd.f32 %v4550_v5, %v3838_v55  ;;  %v4555_v20 = vld [vmem:[%s7754_s11] ss:$0 sm:$0xff] }
 0x510   :  { %v3821_v44 = vpop.f32.mrf.mxu0 }
 0x511   :  { %v3839_v11 = vadd.f32 %v3821_v44, %v3693_v33  ;;  %v3859_v31 = vmax.f32 %v3852_v39, 0.0 }
 0x512   :  { %v4877_v59 = vpop.f32.mrf.mxu0 }
 0x513   :  { %v3853_v0 = vadd.f32 %v4550_v5, %v3839_v11 }
 0x514   :  { %v3826_v61 = vpop.f32.mrf.mxu0 }
 0x515   :  { %v3840_v28 = vadd.f32 %v3826_v61, %v3694_v47  ;;  %v3860_v58 = vmax.f32 %v3853_v0, 0.0 }
 0x516   :  { %v4880_v19 = vpop.f32.mrf.mxu0 }
 0x517   :  { %v3854_v48 = vadd.f32 %v4550_v5, %v3840_v28 }
 0x518   :  { %v3831_v12 = vpop.f32.mrf.mxu0 }
 0x519   :  { %v3841_v51 = vadd.f32 %v3831_v12, %v3695_v23  ;;  %v3861_v41 = vmax.f32 %v3854_v48, 0.0 }
 0x51a   :  { %v4883_v8 = vpop.f32.mrf.mxu0 }
 0x51b   :  { %v3855_v27 = vadd.f32 %v4550_v5, %v3841_v51 }
 0x51d   :  { %v3862_v22 = vmax.f32 %v3855_v27, 0.0 }
 0x51f   :  { %4885 = vmatpush3.msk.msra.mxu1 %vm1759_vm1, %v3862_v22 }
 0x520   :  { %4886 = vmatprep.subr.mxu1 %v5240_v32 }
 0x521   :  { %4887 = vmatpush3.msra.mxu1 %v3861_v41 }
 0x522   :  { %4888 = vmatprep.subr.mxu1 %v5240_v32 }
 0x523   :  { %4889 = vmatpush3.msra.mxu1 %v3860_v58 }
 0x524   :  { %4890 = vmatprep.subr.mxu1 %v5240_v32 }
 0x525   :  { %4891 = vmatpush3.msra.mxu1 %v3859_v31 }
 0x526   :  { %4892 = vmatprep.subr.mxu1 %v5240_v32 }
 0x527   :  { %4893 = vmatpush3.msra.mxu1 %v3858_v46 }
 0x528   :  { %4894 = vmatprep.subr.mxu1 %v5240_v32 }
 0x529   :  { %4895 = vmatpush3.msra.mxu1 %v3857_v6 }
 0x52a   :  { %4896 = vmatprep.subr.mxu1 %v5240_v32 }
 0x52b   :  { %4897 = vmatpush3.msra.mxu1 %v3856_v49 }
 0x52c   :  { %4899 = vmatmul.mubr.msk.f32.vlgmr.msra.gmra.mxu1 %vm3864_vm12, %v3863_v10  ;;  %4934 = vmatprep.subr.mxu1 %v5240_v32 }
 0x52d   :  { %4956 = vmatprep.mubr.msk.f32.mxu1 %vm5241_vm6, %v5240_v32  ;;  %4935 = vmatpush3.msk.msra.mxu1 %vm3707_vm11, %v4048_v42 }
 0x52e   :  { %4936 = vmatprep.subr.mxu1 %v5240_v32 }
 0x52f   :  { %4937 = vmatpush3.msra.mxu1 %v4047_v29 }
 0x530   :  { %4938 = vmatprep.subr.mxu1 %v5240_v32 }
 0x531   :  { %4939 = vmatpush3.msra.mxu1 %v4046_v25 }
 0x532   :  { %4940 = vmatprep.subr.mxu1 %v5240_v32 }
 0x533   :  { %4941 = vmatpush3.msra.mxu1 %v4045_v50 }
 0x534   :  { %4942 = vmatprep.subr.mxu1 %v5240_v32 }
 0x535   :  { %4943 = vmatpush3.msra.mxu1 %v4044_v60 }
 0x536   :  { %4944 = vmatprep.subr.mxu1 %v5240_v32 }
 0x537   :  { %4945 = vmatpush3.msra.mxu1 %v4043_v15 }
 0x538   :  { %4946 = vmatprep.subr.mxu1 %v5240_v32 }
 0x539   :  { %4947 = vmatpush3.msra.mxu1 %v4042_v43 }
 0x53a   :  { %4948 = vmatprep.subr.mxu1 %v5240_v32 }
 0x53b   :  { %4949 = vmatpush3.msra.mxu1 %v4041_v24 }
 0x53c   :  { %4950 = vmatprep.subr.mxu1 %v5240_v32 }
 0x53d   :  { %4951 = vmatpush3.msra.mxu1 %v4040_v26 }
 0x53e   :  { %4952 = vmatprep.subr.mxu1 %v5240_v32 }
 0x53f   :  { %4953 = vmatpush3.msra.mxu1 %v4039_v7 }
 0x540   :  { %4954 = vmatprep.subr.mxu1 %v5240_v32 }
 0x541   :  { %4955 = vmatpush3.msra.mxu1 %v4038_v62 }
 0x5ec   :  { %v3937_v34 = vpop.f32.mrf.mxu1 }
 0x5ed   :  { %4932 = vmatmul.mubr.msk.f32.vlgmr.msra.gmra.mxu0 %vm3963_vm13, %v3937_v34 }
 0x5ee   :  { %v4900_v9 = vpop.f32.mrf.mxu1 }
 0x6ad   :  { %v4033_v13 = vpop.f32.mrf.mxu0 }
 0x6ae   :  { %v4034_v52 = vadd.f32 %v4553_v17, %v4033_v13 }
 0x6af   :  { %v4933_v4 = vpop.f32.mrf.mxu0 }
 0x6b0   :  { %v4037_v14 = vmax.f32 %v4034_v52, 0.0 }
 0x6b2   :  { %4957 = vmatmul.mubr.msk.f32.vlgmr.msra.gmra.mxu1 %vm1746_vm3, %v4037_v14 }
 0x772   :  { %v4128_v32 = vpop.f32.mrf.mxu1 }
 0x773   :  { %v4129_v54 = vadd.f32 %v4555_v20, %v4128_v32 }
 0x774   :  { %v4958_v44 = vpop.f32.mrf.mxu1 }
 0x775   :  { %4132 = vst [vmem:[%s7755_s12] sm:$0xff] %v4129_v54 }

</bundles_post_ra>
